<compile_context>
chip_gen: v6e
topology: v6e:2x2x1
jax: 0.10.0
libtpu: 0.0.40
codegen_flags: <defaults>
</compile_context>

<pallas_src>
import functools
import numpy as np

import jax
import jax.numpy as jnp
from jax.experimental import pallas as pl
from jax.experimental.pallas import tpu as pltpu

# ----------------------------- config (small) --------------------------------
NUM_LAYERS = 2
MODEL_DIM = 32
NUM_HEADS = 4
FFN_DIM = 64
VOCAB = 16          # token ids 1..VOCAB, 0 = PAD
BATCH = 2
SRC_LEN = 8
TGT_LEN = 8
NEG_INF = -1e9
LN_EPS = 1e-5


# ------------------------------ kernel helpers --------------------------------
def _layer_norm(x, gamma, beta):
    """f32 LayerNorm over the last dim (VPU math stays f32 for v5e)."""
    mu = jnp.mean(x, axis=-1, keepdims=True)
    var = jnp.mean((x - mu) ** 2, axis=-1, keepdims=True)
    return (x - mu) * jax.lax.rsqrt(var + LN_EPS) * gamma + beta


def _attention_block(x_q, x_kv, mask, aw, ab, attn_ref, ctx_sc, num_heads, scale):
    """Multi-head attention on batch-flattened activations.

    x_q   : [Mq, D]  f32 (Mq = B*Sq)         x_kv : [Mk, D] f32 (Mk = B*Sk)
    mask  : [Mq, Mk] additive (includes block-diagonal cross-batch -inf)
    aw    : [D, 4D]  bf16  = [wq | wk | wv | wo]
    ab    : [6, D]   f32   = [bq, bk, bv, bo, ln_g, ln_b]
    attn_ref : output ref, block [1, Mq, H*Mk] (lane-dense prob slab)
    ctx_sc   : VMEM scratch [Mq, D] f32
    Returns the post-residual, LayerNorm'ed activation [Mq, D] f32.
    """
    D = x_q.shape[-1]
    Mk = x_kv.shape[0]
    dk = D // num_heads

    # projections: bf16 MXU operands, f32 accumulation
    q = jnp.dot(x_q.astype(jnp.bfloat16), aw[:, :D],
                preferred_element_type=jnp.float32) + ab[0:1, :]
    kv = jnp.dot(x_kv.astype(jnp.bfloat16), aw[:, D:3 * D],
                 preferred_element_type=jnp.float32)
    k = kv[:, :D] + ab[1:2, :]
    v = kv[:, D:] + ab[2:3, :]

    # cast full slabs once (not per 8-lane head slice)
    q_bf = q.astype(jnp.bfloat16)
    k_bf = k.astype(jnp.bfloat16)
    v_bf = v.astype(jnp.bfloat16)

    for h in range(num_heads):
        qh = q_bf[:, h * dk:(h + 1) * dk]
        kh = k_bf[:, h * dk:(h + 1) * dk]
        vh = v_bf[:, h * dk:(h + 1) * dk]
        # scores over the whole folded batch: [Mq, Mk]
        s = jax.lax.dot_general(qh, kh, (((1,), (1,)), ((), ())),
                                preferred_element_type=jnp.float32)
        s = s * scale + mask
        s = s - jnp.max(s, axis=-1, keepdims=True)
        e = jnp.exp(s)
        p = e * pl.reciprocal(jnp.sum(e, axis=-1, keepdims=True), approx=True)
        attn_ref[0, :, h * Mk:(h + 1) * Mk] = p
        ctx_sc[:, h * dk:(h + 1) * dk] = jnp.dot(
            p.astype(jnp.bfloat16), vh, preferred_element_type=jnp.float32)

    out = jnp.dot(ctx_sc[...].astype(jnp.bfloat16), aw[:, 3 * D:],
                  preferred_element_type=jnp.float32) + ab[3:4, :]
    out = out + x_q                      # residual (dropout = identity in eval)
    return _layer_norm(out, ab[4:5, :], ab[5:6, :])


def _ffn_block(x, w1, b1, w2, fb):
    """relu(x@w1+b1)@w2+b2 + residual -> LayerNorm.  fb = [b2, ln_g, ln_b]."""
    h = jnp.dot(x.astype(jnp.bfloat16), w1,
                preferred_element_type=jnp.float32) + b1
    h = jnp.maximum(h, 0.0)
    y = jnp.dot(h.astype(jnp.bfloat16), w2,
                preferred_element_type=jnp.float32) + fb[0:1, :]
    y = y + x
    return _layer_norm(y, fb[1:2, :], fb[2:3, :])


# ------------------------------ fused kernels ---------------------------------
def _encoder_kernel(x_ref, mask_ref, aw_ref, ab_ref,
                    w1_ref, b1_ref, w2_ref, fb_ref,
                    out_ref, attn_ref, x_sc, ctx_sc, *, num_heads, scale):
    """One encoder layer per grid step; activation resident in x_sc."""
    @pl.when(pl.program_id(0) == 0)
    def _():
        x_sc[...] = x_ref[...]

    x = x_sc[...]
    y = _attention_block(x, x, mask_ref[...], aw_ref[0], ab_ref[0],
                         attn_ref, ctx_sc, num_heads, scale)
    y = _ffn_block(y, w1_ref[0], b1_ref[0], w2_ref[0], fb_ref[0])
    x_sc[...] = y

    @pl.when(pl.program_id(0) == pl.num_programs(0) - 1)
    def _():
        out_ref[...] = y


def _decoder_kernel(y_ref, enc_ref, smask_ref, cmask_ref,
                    saw_ref, sab_ref, caw_ref, cab_ref,
                    w1_ref, b1_ref, w2_ref, fb_ref,
                    wf_ref, bf_ref,
                    out_ref, sattn_ref, cattn_ref,
                    y_sc, ctx_sc, *, num_heads, scale):
    """One decoder layer per grid step; final linear+softmax fused in last step."""
    @pl.when(pl.program_id(0) == 0)
    def _():
        y_sc[...] = y_ref[...]

    y = y_sc[...]
    y = _attention_block(y, y, smask_ref[...], saw_ref[0], sab_ref[0],
                         sattn_ref, ctx_sc, num_heads, scale)
    y = _attention_block(y, enc_ref[...], cmask_ref[...], caw_ref[0], cab_ref[0],
                         cattn_ref, ctx_sc, num_heads, scale)
    y = _ffn_block(y, w1_ref[0], b1_ref[0], w2_ref[0], fb_ref[0])
    y_sc[...] = y

    @pl.when(pl.program_id(0) == pl.num_programs(0) - 1)
    def _():
        logits = jnp.dot(y.astype(jnp.bfloat16), wf_ref[...],
                         preferred_element_type=jnp.float32) + bf_ref[...]
        logits = logits - jnp.max(logits, axis=-1, keepdims=True)
        e = jnp.exp(logits)
        out_ref[...] = e * pl.reciprocal(jnp.sum(e, axis=-1, keepdims=True),
                                         approx=True)


# ------------------------------ call wrappers ----------------------------------
def encoder_forward(p, x, mask_bd):
    BS, D = x.shape
    L, F, H = NUM_LAYERS, FFN_DIM, NUM_HEADS
    scale = float(1.0 / np.sqrt(D // H))
    out, attn = pl.pallas_call(
        functools.partial(_encoder_kernel, num_heads=H, scale=scale),
        grid=(L,),
        out_shape=(jax.ShapeDtypeStruct((BS, D), jnp.float32),
                   jax.ShapeDtypeStruct((L, BS, H * BS), jnp.float32)),
        in_specs=[
            pl.BlockSpec((BS, D), lambda l: (0, 0)),            # x_in
            pl.BlockSpec((BS, BS), lambda l: (0, 0)),           # block-diag mask
            pl.BlockSpec((1, D, 4 * D), lambda l: (l, 0, 0)),   # [wq|wk|wv|wo]
            pl.BlockSpec((1, 6, D), lambda l: (l, 0, 0)),       # attn biases + LN
            pl.BlockSpec((1, D, F), lambda l: (l, 0, 0)),       # ffn w1
            pl.BlockSpec((1, 1, F), lambda l: (l, 0, 0)),       # ffn b1
            pl.BlockSpec((1, F, D), lambda l: (l, 0, 0)),       # ffn w2
            pl.BlockSpec((1, 3, D), lambda l: (l, 0, 0)),       # ffn b2 + LN
        ],
        out_specs=(pl.BlockSpec((BS, D), lambda l: (0, 0)),
                   pl.BlockSpec((1, BS, H * BS), lambda l: (l, 0, 0))),
        scratch_shapes=[pltpu.VMEM((BS, D), jnp.float32),       # resident activation
                        pltpu.VMEM((BS, D), jnp.float32)],      # per-head ctx
        compiler_params=pltpu.CompilerParams(
            dimension_semantics=("arbitrary",)),
    )(x, mask_bd, p["enc_attn_w"], p["enc_attn_b"],
      p["enc_ffn_w1"], p["enc_ffn_b1"], p["enc_ffn_w2"], p["enc_ffn_b"])
    return out, attn


def decoder_forward(p, y, enc_out, smask_bd, cmask_bd):
    BT, D = y.shape
    BS = enc_out.shape[0]
    L, F, H = NUM_LAYERS, FFN_DIM, NUM_HEADS
    scale = float(1.0 / np.sqrt(D // H))
    out, sattn, cattn = pl.pallas_call(
        functools.partial(_decoder_kernel, num_heads=H, scale=scale),
        grid=(L,),
        out_shape=(jax.ShapeDtypeStruct((BT, D), jnp.float32),
                   jax.ShapeDtypeStruct((L, BT, H * BT), jnp.float32),
                   jax.ShapeDtypeStruct((L, BT, H * BS), jnp.float32)),
        in_specs=[
            pl.BlockSpec((BT, D), lambda l: (0, 0)),            # y_in
            pl.BlockSpec((BS, D), lambda l: (0, 0)),            # encoder output
            pl.BlockSpec((BT, BT), lambda l: (0, 0)),           # self mask
            pl.BlockSpec((BT, BS), lambda l: (0, 0)),           # ctx mask
            pl.BlockSpec((1, D, 4 * D), lambda l: (l, 0, 0)),   # self-attn w
            pl.BlockSpec((1, 6, D), lambda l: (l, 0, 0)),       # self-attn b
            pl.BlockSpec((1, D, 4 * D), lambda l: (l, 0, 0)),   # ctx-attn w
            pl.BlockSpec((1, 6, D), lambda l: (l, 0, 0)),       # ctx-attn b
            pl.BlockSpec((1, D, F), lambda l: (l, 0, 0)),       # ffn w1
            pl.BlockSpec((1, 1, F), lambda l: (l, 0, 0)),       # ffn b1
            pl.BlockSpec((1, F, D), lambda l: (l, 0, 0)),       # ffn w2
            pl.BlockSpec((1, 3, D), lambda l: (l, 0, 0)),       # ffn b2 + LN
            pl.BlockSpec((D, D), lambda l: (0, 0)),             # final w
            pl.BlockSpec((1, D), lambda l: (0, 0)),             # final b
        ],
        out_specs=(pl.BlockSpec((BT, D), lambda l: (0, 0)),
                   pl.BlockSpec((1, BT, H * BT), lambda l: (l, 0, 0)),
                   pl.BlockSpec((1, BT, H * BS), lambda l: (l, 0, 0))),
        scratch_shapes=[pltpu.VMEM((BT, D), jnp.float32),       # resident activation
                        pltpu.VMEM((BT, D), jnp.float32)],      # per-head ctx
        compiler_params=pltpu.CompilerParams(
            dimension_semantics=("arbitrary",)),
    )(y, enc_out, smask_bd, cmask_bd,
      p["dec_self_w"], p["dec_self_b"], p["dec_ctx_w"], p["dec_ctx_b"],
      p["dec_ffn_w1"], p["dec_ffn_b1"], p["dec_ffn_w2"], p["dec_ffn_b"],
      p["w_final"], p["b_final"])
    return out, sattn, cattn


# --------------------------- masks / positional enc ---------------------------
def sinusoid_pos_enc(max_len, d):
    pos = np.arange(max_len)[:, None].astype(np.float64)
    i = np.arange(d)[None, :].astype(np.float64)
    angle = pos / np.power(10000.0, (2.0 * (i // 2)) / d)
    pe = np.zeros((max_len, d))
    pe[:, 0::2] = np.sin(angle[:, 0::2])
    pe[:, 1::2] = np.cos(angle[:, 1::2])
    return jnp.asarray(pe, jnp.float32)


def padding_mask_additive(seq_q, seq_k):
    """[B, len_q, len_k]; -1e9 where key token is PAD(0)."""
    len_q = seq_q.shape[1]
    pad = (seq_k == 0)[:, None, :]
    pad = jnp.broadcast_to(pad, (seq_k.shape[0], len_q, seq_k.shape[1]))
    return jnp.where(pad, NEG_INF, 0.0).astype(jnp.float32)


def decoder_self_mask_additive(tgt_seq):
    B, T = tgt_seq.shape
    pad = (tgt_seq == 0)[:, None, :]
    causal = np.triu(np.ones((T, T), dtype=bool), k=1)[None]
    masked = pad | jnp.asarray(causal)
    return jnp.where(jnp.broadcast_to(masked, (B, T, T)),
                     NEG_INF, 0.0).astype(jnp.float32)


def make_block_diag(attn_mask):
    """[B, Lq, Lk] additive -> [B*Lq, B*Lk] additive with cross-batch -inf."""
    B, Lq, Lk = attn_mask.shape
    eye = jnp.eye(B, dtype=bool)                         # [B, B]
    big = jnp.where(eye[:, None, :, None],
                    attn_mask[:, :, None, :],
                    jnp.float32(NEG_INF))                # [B, Lq, B, Lk]
    return big.reshape(B * Lq, B * Lk)


def unpack_attn(a, B, Lq, H, Lk):
    """[L, B*Lq, H*B*Lk] lane-dense prob slab -> [L, B, H, Lq, Lk]."""
    L = a.shape[0]
    a = a.reshape(L, B, Lq, H, B, Lk)
    idx = jnp.arange(B)
    a = a[:, idx, :, :, idx, :]            # diagonal over batch -> [B, L, Lq, H, Lk]
    return a.transpose(1, 0, 3, 2, 4)      # [L, B, H, Lq, Lk]


# ------------------------------- parameters ----------------------------------
def init_params(key):
    D, F, L = MODEL_DIM, FFN_DIM, NUM_LAYERS
    keys = iter(jax.random.split(key, 16))

    def w_bf16(shape):
        return (jax.random.normal(next(keys), shape, jnp.float32) * 0.02
                ).astype(jnp.bfloat16)

    def attn_bias():
        # rows: bq, bk, bv, bo, ln_gamma, ln_beta
        b = jnp.zeros((L, 6, D), jnp.float32)
        return b.at[:, 4, :].set(1.0)

    def ffn_bias():
        # rows: b2, ln_gamma, ln_beta
        b = jnp.zeros((L, 3, D), jnp.float32)
        return b.at[:, 1, :].set(1.0)

    return dict(
        src_emb=jax.random.normal(next(keys), (VOCAB + 1, D), jnp.float32) * 0.02,
        tgt_emb=jax.random.normal(next(keys), (VOCAB + 1, D), jnp.float32) * 0.02,
        # encoder (stacked per layer)
        enc_attn_w=w_bf16((L, D, 4 * D)), enc_attn_b=attn_bias(),
        enc_ffn_w1=w_bf16((L, D, F)), enc_ffn_b1=jnp.zeros((L, 1, F), jnp.float32),
        enc_ffn_w2=w_bf16((L, F, D)), enc_ffn_b=ffn_bias(),
        # decoder (stacked per layer)
        dec_self_w=w_bf16((L, D, 4 * D)), dec_self_b=attn_bias(),
        dec_ctx_w=w_bf16((L, D, 4 * D)), dec_ctx_b=attn_bias(),
        dec_ffn_w1=w_bf16((L, D, F)), dec_ffn_b1=jnp.zeros((L, 1, F), jnp.float32),
        dec_ffn_w2=w_bf16((L, F, D)), dec_ffn_b=ffn_bias(),
        # final projection (nn.Linear(model_dim)) fused into decoder call
        w_final=w_bf16((D, D)), b_final=jnp.zeros((1, D), jnp.float32),
    )


# --------------------------------- forward -----------------------------------
def transformer_forward(params, src_seq, tgt_seq):
    B, S = src_seq.shape
    T = tgt_seq.shape[1]
    D, H = MODEL_DIM, NUM_HEADS

    pe_src = sinusoid_pos_enc(S, D)
    pe_tgt = sinusoid_pos_enc(T, D)

    # TODO(synk): embedding gather / positional enc / mask build stay in plain JAX
    # (tiny data-dependent gathers + scalar ops, no useful Pallas equivalent).
    x = (jnp.take(params["src_emb"], src_seq, axis=0) + pe_src[None]).reshape(B * S, D)
    y = (jnp.take(params["tgt_emb"], tgt_seq, axis=0) + pe_tgt[None]).reshape(B * T, D)

    enc_mask = make_block_diag(padding_mask_additive(src_seq, src_seq))
    self_mask = make_block_diag(decoder_self_mask_additive(tgt_seq))
    ctx_mask = make_block_diag(padding_mask_additive(tgt_seq, src_seq))

    # one pallas_call for the whole encoder, one for the whole decoder (+ final)
    enc_out, enc_attn_raw = encoder_forward(params, x, enc_mask)
    out_flat, sattn_raw, cattn_raw = decoder_forward(params, y, enc_out,
                                                     self_mask, ctx_mask)

    out = out_flat.reshape(B, T, D)
    enc_attn = unpack_attn(enc_attn_raw, B, S, H, S)
    dec_attn = unpack_attn(sattn_raw, B, T, H, T)
    ctx_attn = unpack_attn(cattn_raw, B, T, H, S)
    return out, enc_attn, dec_attn, ctx_attn


# ----------------------------------- main -------------------------------------
if __name__ == "__main__":
    key = jax.random.PRNGKey(0)
    k_param, k_src, k_tgt = jax.random.split(key, 3)

    params = init_params(k_param)

    # token-id sequences, 0 is PAD; pad the tail of each sequence
    src_seq = jax.random.randint(k_src, (BATCH, SRC_LEN), 1, VOCAB + 1, jnp.int32)
    tgt_seq = jax.random.randint(k_tgt, (BATCH, TGT_LEN), 1, VOCAB + 1, jnp.int32)
    src_seq = src_seq.at[:, -2:].set(0)
    tgt_seq = tgt_seq.at[:, -1:].set(0)

    fwd = jax.jit(transformer_forward)
    out, enc_attn, dec_attn, ctx_attn = fwd(params, src_seq, tgt_seq)
    jax.block_until_ready((out, enc_attn, dec_attn, ctx_attn))

    assert out.shape == (BATCH, TGT_LEN, MODEL_DIM)
    assert enc_attn.shape == (NUM_LAYERS, BATCH, NUM_HEADS, SRC_LEN, SRC_LEN)
    assert dec_attn.shape == (NUM_LAYERS, BATCH, NUM_HEADS, TGT_LEN, TGT_LEN)
    assert ctx_attn.shape == (NUM_LAYERS, BATCH, NUM_HEADS, TGT_LEN, SRC_LEN)
    # softmax rows sum to ~1 (approx-reciprocal => ~1e-3/1e-4 relative error)
    assert np.allclose(np.asarray(out.sum(-1)), 1.0, atol=5e-3)
    assert np.allclose(np.asarray(enc_attn.sum(-1)), 1.0, atol=5e-3)
    # all values finite
    assert np.isfinite(np.asarray(out)).all()
    assert np.isfinite(np.asarray(enc_attn)).all()
    assert np.isfinite(np.asarray(dec_attn)).all()
    assert np.isfinite(np.asarray(ctx_attn)).all()

    print("KERNEL_OK")
</pallas_src>

<mosaic_0001>
module attributes {stable_mosaic.version = 11 : i64} {
  func.func @_decoder_kernel(%arg0: i32, %arg1: memref<16x32xf32, #tpu.memory_space<vmem>>, %arg2: memref<16x32xf32, #tpu.memory_space<vmem>>, %arg3: memref<16x16xf32, #tpu.memory_space<vmem>>, %arg4: memref<16x16xf32, #tpu.memory_space<vmem>>, %arg5: memref<1x32x128xbf16, #tpu.memory_space<vmem>>, %arg6: memref<1x6x32xf32, #tpu.memory_space<vmem>>, %arg7: memref<1x32x128xbf16, #tpu.memory_space<vmem>>, %arg8: memref<1x6x32xf32, #tpu.memory_space<vmem>>, %arg9: memref<1x32x64xbf16, #tpu.memory_space<vmem>>, %arg10: memref<1x1x64xf32, #tpu.memory_space<vmem>>, %arg11: memref<1x64x32xbf16, #tpu.memory_space<vmem>>, %arg12: memref<1x3x32xf32, #tpu.memory_space<vmem>>, %arg13: memref<32x32xbf16, #tpu.memory_space<vmem>>, %arg14: memref<1x32xf32, #tpu.memory_space<vmem>>, %arg15: memref<16x32xf32, #tpu.memory_space<vmem>>, %arg16: memref<1x16x64xf32, #tpu.memory_space<vmem>>, %arg17: memref<1x16x64xf32, #tpu.memory_space<vmem>>, %arg18: memref<16x32xf32, #tpu.memory_space<vmem>>, %arg19: memref<16x32xf32, #tpu.memory_space<vmem>>) attributes {dimension_semantics = [#tpu.dimension_semantics<arbitrary>], iteration_bounds = array<i64: 2>, scalar_prefetch = 0 : i64, scratch_operands = 2 : i64, tpu.core_type = #tpu.core_type<tc>, window_params = [{pipeline_mode = #tpu.pipeline_mode<synchronous>, transform_indices = @transform_0, window_bounds = array<i64: 16, 32>}, {pipeline_mode = #tpu.pipeline_mode<synchronous>, transform_indices = @transform_1, window_bounds = array<i64: 16, 32>}, {pipeline_mode = #tpu.pipeline_mode<synchronous>, transform_indices = @transform_2, window_bounds = array<i64: 16, 16>}, {pipeline_mode = #tpu.pipeline_mode<synchronous>, transform_indices = @transform_3, window_bounds = array<i64: 16, 16>}, {transform_indices = @transform_4, window_bounds = array<i64: 1, 32, 128>}, {transform_indices = @transform_5, window_bounds = array<i64: 1, 6, 32>}, {transform_indices = @transform_6, window_bounds = array<i64: 1, 32, 128>}, {transform_indices = @transform_7, window_bounds = array<i64: 1, 6, 32>}, {transform_indices = @transform_8, window_bounds = array<i64: 1, 32, 64>}, {transform_indices = @transform_9, window_bounds = array<i64: 1, 1, 64>}, {transform_indices = @transform_10, window_bounds = array<i64: 1, 64, 32>}, {transform_indices = @transform_11, window_bounds = array<i64: 1, 3, 32>}, {pipeline_mode = #tpu.pipeline_mode<synchronous>, transform_indices = @transform_12, window_bounds = array<i64: 32, 32>}, {pipeline_mode = #tpu.pipeline_mode<synchronous>, transform_indices = @transform_13, window_bounds = array<i64: 1, 32>}, {pipeline_mode = #tpu.pipeline_mode<synchronous>, transform_indices = @transform_14, window_bounds = array<i64: 16, 32>}, {transform_indices = @transform_15, window_bounds = array<i64: 1, 16, 64>}, {transform_indices = @transform_16, window_bounds = array<i64: 1, 16, 64>}]} {
    %c0_i32 = arith.constant 0 : i32
    %0 = arith.cmpi eq, %arg0, %c0_i32 : i32
    %1 = arith.extui %0 : i1 to i32
    %c0_i32_0 = arith.constant 0 : i32
    %2 = arith.cmpi ne, %1, %c0_i32_0 : i32
    scf.if %2 {
      %c0_137 = arith.constant 0 : index
      %c0_138 = arith.constant 0 : index
      %351 = vector.load %arg1[%c0_137, %c0_138] : memref<16x32xf32, #tpu.memory_space<vmem>>, vector<16x32xf32>
      %c0_139 = arith.constant 0 : index
      %c0_140 = arith.constant 0 : index
      %352 = vector.load %arg18[%c0_139, %c0_140] : memref<16x32xf32, #tpu.memory_space<vmem>>, vector<16x32xf32>
      tpu.vector_store %arg18[%c0_139, %c0_140], %351 {strides = array<i32>} : memref<16x32xf32, #tpu.memory_space<vmem>>, vector<16x32xf32>,
    } else {
    }
    %c0 = arith.constant 0 : index
    %c0_1 = arith.constant 0 : index
    %3 = vector.load %arg18[%c0, %c0_1] : memref<16x32xf32, #tpu.memory_space<vmem>>, vector<16x32xf32>
    %c0_2 = arith.constant 0 : index
    %c0_3 = arith.constant 0 : index
    %4 = vector.load %arg3[%c0_2, %c0_3] : memref<16x16xf32, #tpu.memory_space<vmem>>, vector<16x16xf32>
    %c0_4 = arith.constant 0 : index
    %c0_5 = arith.constant 0 : index
    %c0_6 = arith.constant 0 : index
    %5 = vector.load %arg5[%c0_4, %c0_5, %c0_6] : memref<1x32x128xbf16, #tpu.memory_space<vmem>>, vector<1x32x128xbf16>
    %6 = vector.shape_cast %5 : vector<1x32x128xbf16> to vector<32x128xbf16>
    %c0_7 = arith.constant 0 : index
    %c0_8 = arith.constant 0 : index
    %c0_9 = arith.constant 0 : index
    %7 = vector.load %arg6[%c0_7, %c0_8, %c0_9] : memref<1x6x32xf32, #tpu.memory_space<vmem>>, vector<1x6x32xf32>
    %8 = vector.shape_cast %7 : vector<1x6x32xf32> to vector<6x32xf32>
    %9 = arith.truncf %3 : vector<16x32xf32> to vector<16x32xbf16>
    %10 = vector.extract_strided_slice %6 {offsets = [0, 0], sizes = [32, 32], strides = [1, 1]} : vector<32x128xbf16> to vector<32x32xbf16>
    %cst = arith.constant dense<0.000000e+00> : vector<16x32xf32>
    %11 = tpu.matmul %9, %10, %cst {dimension_numbers = #tpu.dot_dimension_numbers<[1], [0], [0], [1], [0, 0, 1, 1], [], []>} : vector<16x32xbf16>, vector<32x32xbf16>, vector<16x32xf32> -> vector<16x32xf32>
    %12 = vector.extract_strided_slice %8 {offsets = [0, 0], sizes = [1, 32], strides = [1, 1]} : vector<6x32xf32> to vector<1x32xf32>
    %13 = vector.broadcast %12 : vector<1x32xf32> to vector<16x32xf32>
    %14 = arith.addf %11, %13 : vector<16x32xf32>
    %15 = arith.truncf %3 : vector<16x32xf32> to vector<16x32xbf16>
    %16 = vector.extract_strided_slice %6 {offsets = [0, 32], sizes = [32, 64], strides = [1, 1]} : vector<32x128xbf16> to vector<32x64xbf16>
    %cst_10 = arith.constant dense<0.000000e+00> : vector<16x64xf32>
    %17 = tpu.matmul %15, %16, %cst_10 {dimension_numbers = #tpu.dot_dimension_numbers<[1], [0], [0], [1], [0, 0, 1, 1], [], []>} : vector<16x32xbf16>, vector<32x64xbf16>, vector<16x64xf32> -> vector<16x64xf32>
    %18 = vector.extract_strided_slice %17 {offsets = [0, 0], sizes = [16, 32], strides = [1, 1]} : vector<16x64xf32> to vector<16x32xf32>
    %19 = vector.extract_strided_slice %8 {offsets = [1, 0], sizes = [1, 32], strides = [1, 1]} : vector<6x32xf32> to vector<1x32xf32>
    %20 = vector.broadcast %19 : vector<1x32xf32> to vector<16x32xf32>
    %21 = arith.addf %18, %20 : vector<16x32xf32>
    %22 = vector.extract_strided_slice %17 {offsets = [0, 32], sizes = [16, 32], strides = [1, 1]} : vector<16x64xf32> to vector<16x32xf32>
    %23 = vector.extract_strided_slice %8 {offsets = [2, 0], sizes = [1, 32], strides = [1, 1]} : vector<6x32xf32> to vector<1x32xf32>
    %24 = vector.broadcast %23 : vector<1x32xf32> to vector<16x32xf32>
    %25 = arith.addf %22, %24 : vector<16x32xf32>
    %26 = arith.truncf %14 : vector<16x32xf32> to vector<16x32xbf16>
    %27 = arith.truncf %21 : vector<16x32xf32> to vector<16x32xbf16>
    %28 = arith.truncf %25 : vector<16x32xf32> to vector<16x32xbf16>
    %29 = vector.extract_strided_slice %26 {offsets = [0, 0], sizes = [16, 8], strides = [1, 1]} : vector<16x32xbf16> to vector<16x8xbf16>
    %30 = vector.extract_strided_slice %27 {offsets = [0, 0], sizes = [16, 8], strides = [1, 1]} : vector<16x32xbf16> to vector<16x8xbf16>
    %31 = vector.extract_strided_slice %28 {offsets = [0, 0], sizes = [16, 8], strides = [1, 1]} : vector<16x32xbf16> to vector<16x8xbf16>
    %cst_11 = arith.constant dense<0.000000e+00> : vector<16x16xf32>
    %32 = tpu.matmul %29, %30, %cst_11 {dimension_numbers = #tpu.dot_dimension_numbers<[1], [1], [0], [0], [0, 0, 1, 0], [], []>} : vector<16x8xbf16>, vector<16x8xbf16>, vector<16x16xf32> -> vector<16x16xf32>
    %cst_12 = arith.constant 0.353553385 : f32
    %33 = vector.broadcast %cst_12 : f32 to vector<16x16xf32>
    %34 = arith.mulf %32, %33 : vector<16x16xf32>
    %35 = arith.addf %34, %4 : vector<16x16xf32>
    %cst_13 = arith.constant dense<0xFF800000> : vector<16xf32>
    %36 = vector.multi_reduction <maximumf>, %35, %cst_13 [1] : vector<16x16xf32> to vector<16xf32>
    %37 = vector.shape_cast %36 : vector<16xf32> to vector<16x1xf32>
    %38 = vector.broadcast %37 : vector<16x1xf32> to vector<16x16xf32>
    %39 = arith.subf %35, %38 : vector<16x16xf32>
    %40 = math.exp %39 : vector<16x16xf32>
    %cst_14 = arith.constant dense<0.000000e+00> : vector<16xf32>
    %41 = vector.multi_reduction <add>, %40, %cst_14 [1] : vector<16x16xf32> to vector<16xf32>
    %42 = vector.shape_cast %41 : vector<16xf32> to vector<16x1xf32>
    %43 = tpu.reciprocal %42 {approx = true} : vector<16x1xf32> -> vector<16x1xf32>
    %44 = vector.broadcast %43 : vector<16x1xf32> to vector<16x16xf32>
    %45 = arith.mulf %40, %44 : vector<16x16xf32>
    %c0_15 = arith.constant 0 : index
    %c0_16 = arith.constant 0 : index
    %c0_17 = arith.constant 0 : index
    %46 = vector.load %arg16[%c0_15, %c0_16, %c0_17] : memref<1x16x64xf32, #tpu.memory_space<vmem>>, vector<1x16x16xf32>
    %47 = vector.shape_cast %46 : vector<1x16x16xf32> to vector<16x16xf32>
    %48 = vector.shape_cast %45 : vector<16x16xf32> to vector<1x16x16xf32>
    tpu.vector_store %arg16[%c0_15, %c0_16, %c0_17], %48 {strides = array<i32>} : memref<1x16x64xf32, #tpu.memory_space<vmem>>, vector<1x16x16xf32>,
    %49 = arith.truncf %45 : vector<16x16xf32> to vector<16x16xbf16>
    %cst_18 = arith.constant dense<0.000000e+00> : vector<16x8xf32>
    %50 = tpu.matmul %49, %31, %cst_18 {dimension_numbers = #tpu.dot_dimension_numbers<[1], [0], [0], [1], [0, 0, 1, 1], [], []>} : vector<16x16xbf16>, vector<16x8xbf16>, vector<16x8xf32> -> vector<16x8xf32>
    %c0_19 = arith.constant 0 : index
    %c0_20 = arith.constant 0 : index
    %51 = vector.load %arg19[%c0_19, %c0_20] : memref<16x32xf32, #tpu.memory_space<vmem>>, vector<16x8xf32>
    tpu.vector_store %arg19[%c0_19, %c0_20], %50 {strides = array<i32>} : memref<16x32xf32, #tpu.memory_space<vmem>>, vector<16x8xf32>,
    %52 = vector.extract_strided_slice %26 {offsets = [0, 8], sizes = [16, 8], strides = [1, 1]} : vector<16x32xbf16> to vector<16x8xbf16>
    %53 = vector.extract_strided_slice %27 {offsets = [0, 8], sizes = [16, 8], strides = [1, 1]} : vector<16x32xbf16> to vector<16x8xbf16>
    %54 = vector.extract_strided_slice %28 {offsets = [0, 8], sizes = [16, 8], strides = [1, 1]} : vector<16x32xbf16> to vector<16x8xbf16>
    %cst_21 = arith.constant dense<0.000000e+00> : vector<16x16xf32>
    %55 = tpu.matmul %52, %53, %cst_21 {dimension_numbers = #tpu.dot_dimension_numbers<[1], [1], [0], [0], [0, 0, 1, 0], [], []>} : vector<16x8xbf16>, vector<16x8xbf16>, vector<16x16xf32> -> vector<16x16xf32>
    %cst_22 = arith.constant 0.353553385 : f32
    %56 = vector.broadcast %cst_22 : f32 to vector<16x16xf32>
    %57 = arith.mulf %55, %56 : vector<16x16xf32>
    %58 = arith.addf %57, %4 : vector<16x16xf32>
    %cst_23 = arith.constant dense<0xFF800000> : vector<16xf32>
    %59 = vector.multi_reduction <maximumf>, %58, %cst_23 [1] : vector<16x16xf32> to vector<16xf32>
    %60 = vector.shape_cast %59 : vector<16xf32> to vector<16x1xf32>
    %61 = vector.broadcast %60 : vector<16x1xf32> to vector<16x16xf32>
    %62 = arith.subf %58, %61 : vector<16x16xf32>
    %63 = math.exp %62 : vector<16x16xf32>
    %cst_24 = arith.constant dense<0.000000e+00> : vector<16xf32>
    %64 = vector.multi_reduction <add>, %63, %cst_24 [1] : vector<16x16xf32> to vector<16xf32>
    %65 = vector.shape_cast %64 : vector<16xf32> to vector<16x1xf32>
    %66 = tpu.reciprocal %65 {approx = true} : vector<16x1xf32> -> vector<16x1xf32>
    %67 = vector.broadcast %66 : vector<16x1xf32> to vector<16x16xf32>
    %68 = arith.mulf %63, %67 : vector<16x16xf32>
    %c0_25 = arith.constant 0 : index
    %c0_26 = arith.constant 0 : index
    %c16 = arith.constant 16 : index
    %69 = vector.load %arg16[%c0_25, %c0_26, %c16] : memref<1x16x64xf32, #tpu.memory_space<vmem>>, vector<1x16x16xf32>
    %70 = vector.shape_cast %69 : vector<1x16x16xf32> to vector<16x16xf32>
    %71 = vector.shape_cast %68 : vector<16x16xf32> to vector<1x16x16xf32>
    tpu.vector_store %arg16[%c0_25, %c0_26, %c16], %71 {strides = array<i32>} : memref<1x16x64xf32, #tpu.memory_space<vmem>>, vector<1x16x16xf32>,
    %72 = arith.truncf %68 : vector<16x16xf32> to vector<16x16xbf16>
    %cst_27 = arith.constant dense<0.000000e+00> : vector<16x8xf32>
    %73 = tpu.matmul %72, %54, %cst_27 {dimension_numbers = #tpu.dot_dimension_numbers<[1], [0], [0], [1], [0, 0, 1, 1], [], []>} : vector<16x16xbf16>, vector<16x8xbf16>, vector<16x8xf32> -> vector<16x8xf32>
    %c0_28 = arith.constant 0 : index
    %c8 = arith.constant 8 : index
    %74 = vector.load %arg19[%c0_28, %c8] : memref<16x32xf32, #tpu.memory_space<vmem>>, vector<16x8xf32>
    tpu.vector_store %arg19[%c0_28, %c8], %73 {strides = array<i32>} : memref<16x32xf32, #tpu.memory_space<vmem>>, vector<16x8xf32>,
    %75 = vector.extract_strided_slice %26 {offsets = [0, 16], sizes = [16, 8], strides = [1, 1]} : vector<16x32xbf16> to vector<16x8xbf16>
    %76 = vector.extract_strided_slice %27 {offsets = [0, 16], sizes = [16, 8], strides = [1, 1]} : vector<16x32xbf16> to vector<16x8xbf16>
    %77 = vector.extract_strided_slice %28 {offsets = [0, 16], sizes = [16, 8], strides = [1, 1]} : vector<16x32xbf16> to vector<16x8xbf16>
    %cst_29 = arith.constant dense<0.000000e+00> : vector<16x16xf32>
    %78 = tpu.matmul %75, %76, %cst_29 {dimension_numbers = #tpu.dot_dimension_numbers<[1], [1], [0], [0], [0, 0, 1, 0], [], []>} : vector<16x8xbf16>, vector<16x8xbf16>, vector<16x16xf32> -> vector<16x16xf32>
    %cst_30 = arith.constant 0.353553385 : f32
    %79 = vector.broadcast %cst_30 : f32 to vector<16x16xf32>
    %80 = arith.mulf %78, %79 : vector<16x16xf32>
    %81 = arith.addf %80, %4 : vector<16x16xf32>
    %cst_31 = arith.constant dense<0xFF800000> : vector<16xf32>
    %82 = vector.multi_reduction <maximumf>, %81, %cst_31 [1] : vector<16x16xf32> to vector<16xf32>
    %83 = vector.shape_cast %82 : vector<16xf32> to vector<16x1xf32>
    %84 = vector.broadcast %83 : vector<16x1xf32> to vector<16x16xf32>
    %85 = arith.subf %81, %84 : vector<16x16xf32>
    %86 = math.exp %85 : vector<16x16xf32>
    %cst_32 = arith.constant dense<0.000000e+00> : vector<16xf32>
    %87 = vector.multi_reduction <add>, %86, %cst_32 [1] : vector<16x16xf32> to vector<16xf32>
    %88 = vector.shape_cast %87 : vector<16xf32> to vector<16x1xf32>
    %89 = tpu.reciprocal %88 {approx = true} : vector<16x1xf32> -> vector<16x1xf32>
    %90 = vector.broadcast %89 : vector<16x1xf32> to vector<16x16xf32>
    %91 = arith.mulf %86, %90 : vector<16x16xf32>
    %c0_33 = arith.constant 0 : index
    %c0_34 = arith.constant 0 : index
    %c32 = arith.constant 32 : index
    %92 = vector.load %arg16[%c0_33, %c0_34, %c32] : memref<1x16x64xf32, #tpu.memory_space<vmem>>, vector<1x16x16xf32>
    %93 = vector.shape_cast %92 : vector<1x16x16xf32> to vector<16x16xf32>
    %94 = vector.shape_cast %91 : vector<16x16xf32> to vector<1x16x16xf32>
    tpu.vector_store %arg16[%c0_33, %c0_34, %c32], %94 {strides = array<i32>} : memref<1x16x64xf32, #tpu.memory_space<vmem>>, vector<1x16x16xf32>,
    %95 = arith.truncf %91 : vector<16x16xf32> to vector<16x16xbf16>
    %cst_35 = arith.constant dense<0.000000e+00> : vector<16x8xf32>
    %96 = tpu.matmul %95, %77, %cst_35 {dimension_numbers = #tpu.dot_dimension_numbers<[1], [0], [0], [1], [0, 0, 1, 1], [], []>} : vector<16x16xbf16>, vector<16x8xbf16>, vector<16x8xf32> -> vector<16x8xf32>
    %c0_36 = arith.constant 0 : index
    %c16_37 = arith.constant 16 : index
    %97 = vector.load %arg19[%c0_36, %c16_37] : memref<16x32xf32, #tpu.memory_space<vmem>>, vector<16x8xf32>
    tpu.vector_store %arg19[%c0_36, %c16_37], %96 {strides = array<i32>} : memref<16x32xf32, #tpu.memory_space<vmem>>, vector<16x8xf32>,
    %98 = vector.extract_strided_slice %26 {offsets = [0, 24], sizes = [16, 8], strides = [1, 1]} : vector<16x32xbf16> to vector<16x8xbf16>
    %99 = vector.extract_strided_slice %27 {offsets = [0, 24], sizes = [16, 8], strides = [1, 1]} : vector<16x32xbf16> to vector<16x8xbf16>
    %100 = vector.extract_strided_slice %28 {offsets = [0, 24], sizes = [16, 8], strides = [1, 1]} : vector<16x32xbf16> to vector<16x8xbf16>
    %cst_38 = arith.constant dense<0.000000e+00> : vector<16x16xf32>
    %101 = tpu.matmul %98, %99, %cst_38 {dimension_numbers = #tpu.dot_dimension_numbers<[1], [1], [0], [0], [0, 0, 1, 0], [], []>} : vector<16x8xbf16>, vector<16x8xbf16>, vector<16x16xf32> -> vector<16x16xf32>
    %cst_39 = arith.constant 0.353553385 : f32
    %102 = vector.broadcast %cst_39 : f32 to vector<16x16xf32>
    %103 = arith.mulf %101, %102 : vector<16x16xf32>
    %104 = arith.addf %103, %4 : vector<16x16xf32>
    %cst_40 = arith.constant dense<0xFF800000> : vector<16xf32>
    %105 = vector.multi_reduction <maximumf>, %104, %cst_40 [1] : vector<16x16xf32> to vector<16xf32>
    %106 = vector.shape_cast %105 : vector<16xf32> to vector<16x1xf32>
    %107 = vector.broadcast %106 : vector<16x1xf32> to vector<16x16xf32>
    %108 = arith.subf %104, %107 : vector<16x16xf32>
    %109 = math.exp %108 : vector<16x16xf32>
    %cst_41 = arith.constant dense<0.000000e+00> : vector<16xf32>
    %110 = vector.multi_reduction <add>, %109, %cst_41 [1] : vector<16x16xf32> to vector<16xf32>
    %111 = vector.shape_cast %110 : vector<16xf32> to vector<16x1xf32>
    %112 = tpu.reciprocal %111 {approx = true} : vector<16x1xf32> -> vector<16x1xf32>
    %113 = vector.broadcast %112 : vector<16x1xf32> to vector<16x16xf32>
    %114 = arith.mulf %109, %113 : vector<16x16xf32>
    %c0_42 = arith.constant 0 : index
    %c0_43 = arith.constant 0 : index
    %c48 = arith.constant 48 : index
    %115 = vector.load %arg16[%c0_42, %c0_43, %c48] : memref<1x16x64xf32, #tpu.memory_space<vmem>>, vector<1x16x16xf32>
    %116 = vector.shape_cast %115 : vector<1x16x16xf32> to vector<16x16xf32>
    %117 = vector.shape_cast %114 : vector<16x16xf32> to vector<1x16x16xf32>
    tpu.vector_store %arg16[%c0_42, %c0_43, %c48], %117 {strides = array<i32>} : memref<1x16x64xf32, #tpu.memory_space<vmem>>, vector<1x16x16xf32>,
    %118 = arith.truncf %114 : vector<16x16xf32> to vector<16x16xbf16>
    %cst_44 = arith.constant dense<0.000000e+00> : vector<16x8xf32>
    %119 = tpu.matmul %118, %100, %cst_44 {dimension_numbers = #tpu.dot_dimension_numbers<[1], [0], [0], [1], [0, 0, 1, 1], [], []>} : vector<16x16xbf16>, vector<16x8xbf16>, vector<16x8xf32> -> vector<16x8xf32>
    %c0_45 = arith.constant 0 : index
    %c24 = arith.constant 24 : index
    %120 = vector.load %arg19[%c0_45, %c24] : memref<16x32xf32, #tpu.memory_space<vmem>>, vector<16x8xf32>
    tpu.vector_store %arg19[%c0_45, %c24], %119 {strides = array<i32>} : memref<16x32xf32, #tpu.memory_space<vmem>>, vector<16x8xf32>,
    %c0_46 = arith.constant 0 : index
    %c0_47 = arith.constant 0 : index
    %121 = vector.load %arg19[%c0_46, %c0_47] : memref<16x32xf32, #tpu.memory_space<vmem>>, vector<16x32xf32>
    %122 = arith.truncf %121 : vector<16x32xf32> to vector<16x32xbf16>
    %123 = vector.extract_strided_slice %6 {offsets = [0, 96], sizes = [32, 32], strides = [1, 1]} : vector<32x128xbf16> to vector<32x32xbf16>
    %cst_48 = arith.constant dense<0.000000e+00> : vector<16x32xf32>
    %124 = tpu.matmul %122, %123, %cst_48 {dimension_numbers = #tpu.dot_dimension_numbers<[1], [0], [0], [1], [0, 0, 1, 1], [], []>} : vector<16x32xbf16>, vector<32x32xbf16>, vector<16x32xf32> -> vector<16x32xf32>
    %125 = vector.extract_strided_slice %8 {offsets = [3, 0], sizes = [1, 32], strides = [1, 1]} : vector<6x32xf32> to vector<1x32xf32>
    %126 = vector.broadcast %125 : vector<1x32xf32> to vector<16x32xf32>
    %127 = arith.addf %124, %126 : vector<16x32xf32>
    %128 = arith.addf %127, %3 : vector<16x32xf32>
    %129 = vector.extract_strided_slice %8 {offsets = [4, 0], sizes = [1, 32], strides = [1, 1]} : vector<6x32xf32> to vector<1x32xf32>
    %130 = vector.extract_strided_slice %8 {offsets = [5, 0], sizes = [1, 32], strides = [1, 1]} : vector<6x32xf32> to vector<1x32xf32>
    %cst_49 = arith.constant dense<0.000000e+00> : vector<16xf32>
    %131 = vector.multi_reduction <add>, %128, %cst_49 [1] : vector<16x32xf32> to vector<16xf32>
    %132 = vector.shape_cast %131 : vector<16xf32> to vector<16x1xf32>
    %cst_50 = arith.constant 3.200000e+01 : f32
    %133 = vector.broadcast %cst_50 : f32 to vector<16x1xf32>
    %134 = arith.divf %132, %133 : vector<16x1xf32>
    %135 = vector.broadcast %134 : vector<16x1xf32> to vector<16x32xf32>
    %136 = arith.subf %128, %135 : vector<16x32xf32>
    %137 = arith.mulf %136, %136 : vector<16x32xf32>
    %cst_51 = arith.constant dense<0.000000e+00> : vector<16xf32>
    %138 = vector.multi_reduction <add>, %137, %cst_51 [1] : vector<16x32xf32> to vector<16xf32>
    %139 = vector.shape_cast %138 : vector<16xf32> to vector<16x1xf32>
    %cst_52 = arith.constant 3.200000e+01 : f32
    %140 = vector.broadcast %cst_52 : f32 to vector<16x1xf32>
    %141 = arith.divf %139, %140 : vector<16x1xf32>
    %142 = vector.broadcast %134 : vector<16x1xf32> to vector<16x32xf32>
    %143 = arith.subf %128, %142 : vector<16x32xf32>
    %cst_53 = arith.constant 9.99999974E-6 : f32
    %144 = vector.broadcast %cst_53 : f32 to vector<16x1xf32>
    %145 = arith.addf %141, %144 : vector<16x1xf32>
    %146 = math.rsqrt %145 : vector<16x1xf32>
    %147 = vector.broadcast %146 : vector<16x1xf32> to vector<16x32xf32>
    %148 = arith.mulf %143, %147 : vector<16x32xf32>
    %149 = vector.broadcast %129 : vector<1x32xf32> to vector<16x32xf32>
    %150 = arith.mulf %148, %149 : vector<16x32xf32>
    %151 = vector.broadcast %130 : vector<1x32xf32> to vector<16x32xf32>
    %152 = arith.addf %150, %151 : vector<16x32xf32>
    %c0_54 = arith.constant 0 : index
    %c0_55 = arith.constant 0 : index
    %153 = vector.load %arg2[%c0_54, %c0_55] : memref<16x32xf32, #tpu.memory_space<vmem>>, vector<16x32xf32>
    %c0_56 = arith.constant 0 : index
    %c0_57 = arith.constant 0 : index
    %154 = vector.load %arg4[%c0_56, %c0_57] : memref<16x16xf32, #tpu.memory_space<vmem>>, vector<16x16xf32>
    %c0_58 = arith.constant 0 : index
    %c0_59 = arith.constant 0 : index
    %c0_60 = arith.constant 0 : index
    %155 = vector.load %arg7[%c0_58, %c0_59, %c0_60] : memref<1x32x128xbf16, #tpu.memory_space<vmem>>, vector<1x32x128xbf16>
    %156 = vector.shape_cast %155 : vector<1x32x128xbf16> to vector<32x128xbf16>
    %c0_61 = arith.constant 0 : index
    %c0_62 = arith.constant 0 : index
    %c0_63 = arith.constant 0 : index
    %157 = vector.load %arg8[%c0_61, %c0_62, %c0_63] : memref<1x6x32xf32, #tpu.memory_space<vmem>>, vector<1x6x32xf32>
    %158 = vector.shape_cast %157 : vector<1x6x32xf32> to vector<6x32xf32>
    %159 = arith.truncf %152 : vector<16x32xf32> to vector<16x32xbf16>
    %160 = vector.extract_strided_slice %156 {offsets = [0, 0], sizes = [32, 32], strides = [1, 1]} : vector<32x128xbf16> to vector<32x32xbf16>
    %cst_64 = arith.constant dense<0.000000e+00> : vector<16x32xf32>
    %161 = tpu.matmul %159, %160, %cst_64 {dimension_numbers = #tpu.dot_dimension_numbers<[1], [0], [0], [1], [0, 0, 1, 1], [], []>} : vector<16x32xbf16>, vector<32x32xbf16>, vector<16x32xf32> -> vector<16x32xf32>
    %162 = vector.extract_strided_slice %158 {offsets = [0, 0], sizes = [1, 32], strides = [1, 1]} : vector<6x32xf32> to vector<1x32xf32>
    %163 = vector.broadcast %162 : vector<1x32xf32> to vector<16x32xf32>
    %164 = arith.addf %161, %163 : vector<16x32xf32>
    %165 = arith.truncf %153 : vector<16x32xf32> to vector<16x32xbf16>
    %166 = vector.extract_strided_slice %156 {offsets = [0, 32], sizes = [32, 64], strides = [1, 1]} : vector<32x128xbf16> to vector<32x64xbf16>
    %cst_65 = arith.constant dense<0.000000e+00> : vector<16x64xf32>
    %167 = tpu.matmul %165, %166, %cst_65 {dimension_numbers = #tpu.dot_dimension_numbers<[1], [0], [0], [1], [0, 0, 1, 1], [], []>} : vector<16x32xbf16>, vector<32x64xbf16>, vector<16x64xf32> -> vector<16x64xf32>
    %168 = vector.extract_strided_slice %167 {offsets = [0, 0], sizes = [16, 32], strides = [1, 1]} : vector<16x64xf32> to vector<16x32xf32>
    %169 = vector.extract_strided_slice %158 {offsets = [1, 0], sizes = [1, 32], strides = [1, 1]} : vector<6x32xf32> to vector<1x32xf32>
    %170 = vector.broadcast %169 : vector<1x32xf32> to vector<16x32xf32>
    %171 = arith.addf %168, %170 : vector<16x32xf32>
    %172 = vector.extract_strided_slice %167 {offsets = [0, 32], sizes = [16, 32], strides = [1, 1]} : vector<16x64xf32> to vector<16x32xf32>
    %173 = vector.extract_strided_slice %158 {offsets = [2, 0], sizes = [1, 32], strides = [1, 1]} : vector<6x32xf32> to vector<1x32xf32>
    %174 = vector.broadcast %173 : vector<1x32xf32> to vector<16x32xf32>
    %175 = arith.addf %172, %174 : vector<16x32xf32>
    %176 = arith.truncf %164 : vector<16x32xf32> to vector<16x32xbf16>
    %177 = arith.truncf %171 : vector<16x32xf32> to vector<16x32xbf16>
    %178 = arith.truncf %175 : vector<16x32xf32> to vector<16x32xbf16>
    %179 = vector.extract_strided_slice %176 {offsets = [0, 0], sizes = [16, 8], strides = [1, 1]} : vector<16x32xbf16> to vector<16x8xbf16>
    %180 = vector.extract_strided_slice %177 {offsets = [0, 0], sizes = [16, 8], strides = [1, 1]} : vector<16x32xbf16> to vector<16x8xbf16>
    %181 = vector.extract_strided_slice %178 {offsets = [0, 0], sizes = [16, 8], strides = [1, 1]} : vector<16x32xbf16> to vector<16x8xbf16>
    %cst_66 = arith.constant dense<0.000000e+00> : vector<16x16xf32>
    %182 = tpu.matmul %179, %180, %cst_66 {dimension_numbers = #tpu.dot_dimension_numbers<[1], [1], [0], [0], [0, 0, 1, 0], [], []>} : vector<16x8xbf16>, vector<16x8xbf16>, vector<16x16xf32> -> vector<16x16xf32>
    %cst_67 = arith.constant 0.353553385 : f32
    %183 = vector.broadcast %cst_67 : f32 to vector<16x16xf32>
    %184 = arith.mulf %182, %183 : vector<16x16xf32>
    %185 = arith.addf %184, %154 : vector<16x16xf32>
    %cst_68 = arith.constant dense<0xFF800000> : vector<16xf32>
    %186 = vector.multi_reduction <maximumf>, %185, %cst_68 [1] : vector<16x16xf32> to vector<16xf32>
    %187 = vector.shape_cast %186 : vector<16xf32> to vector<16x1xf32>
    %188 = vector.broadcast %187 : vector<16x1xf32> to vector<16x16xf32>
    %189 = arith.subf %185, %188 : vector<16x16xf32>
    %190 = math.exp %189 : vector<16x16xf32>
    %cst_69 = arith.constant dense<0.000000e+00> : vector<16xf32>
    %191 = vector.multi_reduction <add>, %190, %cst_69 [1] : vector<16x16xf32> to vector<16xf32>
    %192 = vector.shape_cast %191 : vector<16xf32> to vector<16x1xf32>
    %193 = tpu.reciprocal %192 {approx = true} : vector<16x1xf32> -> vector<16x1xf32>
    %194 = vector.broadcast %193 : vector<16x1xf32> to vector<16x16xf32>
    %195 = arith.mulf %190, %194 : vector<16x16xf32>
    %c0_70 = arith.constant 0 : index
    %c0_71 = arith.constant 0 : index
    %c0_72 = arith.constant 0 : index
    %196 = vector.load %arg17[%c0_70, %c0_71, %c0_72] : memref<1x16x64xf32, #tpu.memory_space<vmem>>, vector<1x16x16xf32>
    %197 = vector.shape_cast %196 : vector<1x16x16xf32> to vector<16x16xf32>
    %198 = vector.shape_cast %195 : vector<16x16xf32> to vector<1x16x16xf32>
    tpu.vector_store %arg17[%c0_70, %c0_71, %c0_72], %198 {strides = array<i32>} : memref<1x16x64xf32, #tpu.memory_space<vmem>>, vector<1x16x16xf32>,
    %199 = arith.truncf %195 : vector<16x16xf32> to vector<16x16xbf16>
    %cst_73 = arith.constant dense<0.000000e+00> : vector<16x8xf32>
    %200 = tpu.matmul %199, %181, %cst_73 {dimension_numbers = #tpu.dot_dimension_numbers<[1], [0], [0], [1], [0, 0, 1, 1], [], []>} : vector<16x16xbf16>, vector<16x8xbf16>, vector<16x8xf32> -> vector<16x8xf32>
    %c0_74 = arith.constant 0 : index
    %c0_75 = arith.constant 0 : index
    %201 = vector.load %arg19[%c0_74, %c0_75] : memref<16x32xf32, #tpu.memory_space<vmem>>, vector<16x8xf32>
    tpu.vector_store %arg19[%c0_74, %c0_75], %200 {strides = array<i32>} : memref<16x32xf32, #tpu.memory_space<vmem>>, vector<16x8xf32>,
    %202 = vector.extract_strided_slice %176 {offsets = [0, 8], sizes = [16, 8], strides = [1, 1]} : vector<16x32xbf16> to vector<16x8xbf16>
    %203 = vector.extract_strided_slice %177 {offsets = [0, 8], sizes = [16, 8], strides = [1, 1]} : vector<16x32xbf16> to vector<16x8xbf16>
    %204 = vector.extract_strided_slice %178 {offsets = [0, 8], sizes = [16, 8], strides = [1, 1]} : vector<16x32xbf16> to vector<16x8xbf16>
    %cst_76 = arith.constant dense<0.000000e+00> : vector<16x16xf32>
    %205 = tpu.matmul %202, %203, %cst_76 {dimension_numbers = #tpu.dot_dimension_numbers<[1], [1], [0], [0], [0, 0, 1, 0], [], []>} : vector<16x8xbf16>, vector<16x8xbf16>, vector<16x16xf32> -> vector<16x16xf32>
    %cst_77 = arith.constant 0.353553385 : f32
    %206 = vector.broadcast %cst_77 : f32 to vector<16x16xf32>
    %207 = arith.mulf %205, %206 : vector<16x16xf32>
    %208 = arith.addf %207, %154 : vector<16x16xf32>
    %cst_78 = arith.constant dense<0xFF800000> : vector<16xf32>
    %209 = vector.multi_reduction <maximumf>, %208, %cst_78 [1] : vector<16x16xf32> to vector<16xf32>
    %210 = vector.shape_cast %209 : vector<16xf32> to vector<16x1xf32>
    %211 = vector.broadcast %210 : vector<16x1xf32> to vector<16x16xf32>
    %212 = arith.subf %208, %211 : vector<16x16xf32>
    %213 = math.exp %212 : vector<16x16xf32>
    %cst_79 = arith.constant dense<0.000000e+00> : vector<16xf32>
    %214 = vector.multi_reduction <add>, %213, %cst_79 [1] : vector<16x16xf32> to vector<16xf32>
    %215 = vector.shape_cast %214 : vector<16xf32> to vector<16x1xf32>
    %216 = tpu.reciprocal %215 {approx = true} : vector<16x1xf32> -> vector<16x1xf32>
    %217 = vector.broadcast %216 : vector<16x1xf32> to vector<16x16xf32>
    %218 = arith.mulf %213, %217 : vector<16x16xf32>
    %c0_80 = arith.constant 0 : index
    %c0_81 = arith.constant 0 : index
    %c16_82 = arith.constant 16 : index
    %219 = vector.load %arg17[%c0_80, %c0_81, %c16_82] : memref<1x16x64xf32, #tpu.memory_space<vmem>>, vector<1x16x16xf32>
    %220 = vector.shape_cast %219 : vector<1x16x16xf32> to vector<16x16xf32>
    %221 = vector.shape_cast %218 : vector<16x16xf32> to vector<1x16x16xf32>
    tpu.vector_store %arg17[%c0_80, %c0_81, %c16_82], %221 {strides = array<i32>} : memref<1x16x64xf32, #tpu.memory_space<vmem>>, vector<1x16x16xf32>,
    %222 = arith.truncf %218 : vector<16x16xf32> to vector<16x16xbf16>
    %cst_83 = arith.constant dense<0.000000e+00> : vector<16x8xf32>
    %223 = tpu.matmul %222, %204, %cst_83 {dimension_numbers = #tpu.dot_dimension_numbers<[1], [0], [0], [1], [0, 0, 1, 1], [], []>} : vector<16x16xbf16>, vector<16x8xbf16>, vector<16x8xf32> -> vector<16x8xf32>
    %c0_84 = arith.constant 0 : index
    %c8_85 = arith.constant 8 : index
    %224 = vector.load %arg19[%c0_84, %c8_85] : memref<16x32xf32, #tpu.memory_space<vmem>>, vector<16x8xf32>
    tpu.vector_store %arg19[%c0_84, %c8_85], %223 {strides = array<i32>} : memref<16x32xf32, #tpu.memory_space<vmem>>, vector<16x8xf32>,
    %225 = vector.extract_strided_slice %176 {offsets = [0, 16], sizes = [16, 8], strides = [1, 1]} : vector<16x32xbf16> to vector<16x8xbf16>
    %226 = vector.extract_strided_slice %177 {offsets = [0, 16], sizes = [16, 8], strides = [1, 1]} : vector<16x32xbf16> to vector<16x8xbf16>
    %227 = vector.extract_strided_slice %178 {offsets = [0, 16], sizes = [16, 8], strides = [1, 1]} : vector<16x32xbf16> to vector<16x8xbf16>
    %cst_86 = arith.constant dense<0.000000e+00> : vector<16x16xf32>
    %228 = tpu.matmul %225, %226, %cst_86 {dimension_numbers = #tpu.dot_dimension_numbers<[1], [1], [0], [0], [0, 0, 1, 0], [], []>} : vector<16x8xbf16>, vector<16x8xbf16>, vector<16x16xf32> -> vector<16x16xf32>
    %cst_87 = arith.constant 0.353553385 : f32
    %229 = vector.broadcast %cst_87 : f32 to vector<16x16xf32>
    %230 = arith.mulf %228, %229 : vector<16x16xf32>
    %231 = arith.addf %230, %154 : vector<16x16xf32>
    %cst_88 = arith.constant dense<0xFF800000> : vector<16xf32>
    %232 = vector.multi_reduction <maximumf>, %231, %cst_88 [1] : vector<16x16xf32> to vector<16xf32>
    %233 = vector.shape_cast %232 : vector<16xf32> to vector<16x1xf32>
    %234 = vector.broadcast %233 : vector<16x1xf32> to vector<16x16xf32>
    %235 = arith.subf %231, %234 : vector<16x16xf32>
    %236 = math.exp %235 : vector<16x16xf32>
    %cst_89 = arith.constant dense<0.000000e+00> : vector<16xf32>
    %237 = vector.multi_reduction <add>, %236, %cst_89 [1] : vector<16x16xf32> to vector<16xf32>
    %238 = vector.shape_cast %237 : vector<16xf32> to vector<16x1xf32>
    %239 = tpu.reciprocal %238 {approx = true} : vector<16x1xf32> -> vector<16x1xf32>
    %240 = vector.broadcast %239 : vector<16x1xf32> to vector<16x16xf32>
    %241 = arith.mulf %236, %240 : vector<16x16xf32>
    %c0_90 = arith.constant 0 : index
    %c0_91 = arith.constant 0 : index
    %c32_92 = arith.constant 32 : index
    %242 = vector.load %arg17[%c0_90, %c0_91, %c32_92] : memref<1x16x64xf32, #tpu.memory_space<vmem>>, vector<1x16x16xf32>
    %243 = vector.shape_cast %242 : vector<1x16x16xf32> to vector<16x16xf32>
    %244 = vector.shape_cast %241 : vector<16x16xf32> to vector<1x16x16xf32>
    tpu.vector_store %arg17[%c0_90, %c0_91, %c32_92], %244 {strides = array<i32>} : memref<1x16x64xf32, #tpu.memory_space<vmem>>, vector<1x16x16xf32>,
    %245 = arith.truncf %241 : vector<16x16xf32> to vector<16x16xbf16>
    %cst_93 = arith.constant dense<0.000000e+00> : vector<16x8xf32>
    %246 = tpu.matmul %245, %227, %cst_93 {dimension_numbers = #tpu.dot_dimension_numbers<[1], [0], [0], [1], [0, 0, 1, 1], [], []>} : vector<16x16xbf16>, vector<16x8xbf16>, vector<16x8xf32> -> vector<16x8xf32>
    %c0_94 = arith.constant 0 : index
    %c16_95 = arith.constant 16 : index
    %247 = vector.load %arg19[%c0_94, %c16_95] : memref<16x32xf32, #tpu.memory_space<vmem>>, vector<16x8xf32>
    tpu.vector_store %arg19[%c0_94, %c16_95], %246 {strides = array<i32>} : memref<16x32xf32, #tpu.memory_space<vmem>>, vector<16x8xf32>,
    %248 = vector.extract_strided_slice %176 {offsets = [0, 24], sizes = [16, 8], strides = [1, 1]} : vector<16x32xbf16> to vector<16x8xbf16>
    %249 = vector.extract_strided_slice %177 {offsets = [0, 24], sizes = [16, 8], strides = [1, 1]} : vector<16x32xbf16> to vector<16x8xbf16>
    %250 = vector.extract_strided_slice %178 {offsets = [0, 24], sizes = [16, 8], strides = [1, 1]} : vector<16x32xbf16> to vector<16x8xbf16>
    %cst_96 = arith.constant dense<0.000000e+00> : vector<16x16xf32>
    %251 = tpu.matmul %248, %249, %cst_96 {dimension_numbers = #tpu.dot_dimension_numbers<[1], [1], [0], [0], [0, 0, 1, 0], [], []>} : vector<16x8xbf16>, vector<16x8xbf16>, vector<16x16xf32> -> vector<16x16xf32>
    %cst_97 = arith.constant 0.353553385 : f32
    %252 = vector.broadcast %cst_97 : f32 to vector<16x16xf32>
    %253 = arith.mulf %251, %252 : vector<16x16xf32>
    %254 = arith.addf %253, %154 : vector<16x16xf32>
    %cst_98 = arith.constant dense<0xFF800000> : vector<16xf32>
    %255 = vector.multi_reduction <maximumf>, %254, %cst_98 [1] : vector<16x16xf32> to vector<16xf32>
    %256 = vector.shape_cast %255 : vector<16xf32> to vector<16x1xf32>
    %257 = vector.broadcast %256 : vector<16x1xf32> to vector<16x16xf32>
    %258 = arith.subf %254, %257 : vector<16x16xf32>
    %259 = math.exp %258 : vector<16x16xf32>
    %cst_99 = arith.constant dense<0.000000e+00> : vector<16xf32>
    %260 = vector.multi_reduction <add>, %259, %cst_99 [1] : vector<16x16xf32> to vector<16xf32>
    %261 = vector.shape_cast %260 : vector<16xf32> to vector<16x1xf32>
    %262 = tpu.reciprocal %261 {approx = true} : vector<16x1xf32> -> vector<16x1xf32>
    %263 = vector.broadcast %262 : vector<16x1xf32> to vector<16x16xf32>
    %264 = arith.mulf %259, %263 : vector<16x16xf32>
    %c0_100 = arith.constant 0 : index
    %c0_101 = arith.constant 0 : index
    %c48_102 = arith.constant 48 : index
    %265 = vector.load %arg17[%c0_100, %c0_101, %c48_102] : memref<1x16x64xf32, #tpu.memory_space<vmem>>, vector<1x16x16xf32>
    %266 = vector.shape_cast %265 : vector<1x16x16xf32> to vector<16x16xf32>
    %267 = vector.shape_cast %264 : vector<16x16xf32> to vector<1x16x16xf32>
    tpu.vector_store %arg17[%c0_100, %c0_101, %c48_102], %267 {strides = array<i32>} : memref<1x16x64xf32, #tpu.memory_space<vmem>>, vector<1x16x16xf32>,
    %268 = arith.truncf %264 : vector<16x16xf32> to vector<16x16xbf16>
    %cst_103 = arith.constant dense<0.000000e+00> : vector<16x8xf32>
    %269 = tpu.matmul %268, %250, %cst_103 {dimension_numbers = #tpu.dot_dimension_numbers<[1], [0], [0], [1], [0, 0, 1, 1], [], []>} : vector<16x16xbf16>, vector<16x8xbf16>, vector<16x8xf32> -> vector<16x8xf32>
    %c0_104 = arith.constant 0 : index
    %c24_105 = arith.constant 24 : index
    %270 = vector.load %arg19[%c0_104, %c24_105] : memref<16x32xf32, #tpu.memory_space<vmem>>, vector<16x8xf32>
    tpu.vector_store %arg19[%c0_104, %c24_105], %269 {strides = array<i32>} : memref<16x32xf32, #tpu.memory_space<vmem>>, vector<16x8xf32>,
    %c0_106 = arith.constant 0 : index
    %c0_107 = arith.constant 0 : index
    %271 = vector.load %arg19[%c0_106, %c0_107] : memref<16x32xf32, #tpu.memory_space<vmem>>, vector<16x32xf32>
    %272 = arith.truncf %271 : vector<16x32xf32> to vector<16x32xbf16>
    %273 = vector.extract_strided_slice %156 {offsets = [0, 96], sizes = [32, 32], strides = [1, 1]} : vector<32x128xbf16> to vector<32x32xbf16>
    %cst_108 = arith.constant dense<0.000000e+00> : vector<16x32xf32>
    %274 = tpu.matmul %272, %273, %cst_108 {dimension_numbers = #tpu.dot_dimension_numbers<[1], [0], [0], [1], [0, 0, 1, 1], [], []>} : vector<16x32xbf16>, vector<32x32xbf16>, vector<16x32xf32> -> vector<16x32xf32>
    %275 = vector.extract_strided_slice %158 {offsets = [3, 0], sizes = [1, 32], strides = [1, 1]} : vector<6x32xf32> to vector<1x32xf32>
    %276 = vector.broadcast %275 : vector<1x32xf32> to vector<16x32xf32>
    %277 = arith.addf %274, %276 : vector<16x32xf32>
    %278 = arith.addf %277, %152 : vector<16x32xf32>
    %279 = vector.extract_strided_slice %158 {offsets = [4, 0], sizes = [1, 32], strides = [1, 1]} : vector<6x32xf32> to vector<1x32xf32>
    %280 = vector.extract_strided_slice %158 {offsets = [5, 0], sizes = [1, 32], strides = [1, 1]} : vector<6x32xf32> to vector<1x32xf32>
    %cst_109 = arith.constant dense<0.000000e+00> : vector<16xf32>
    %281 = vector.multi_reduction <add>, %278, %cst_109 [1] : vector<16x32xf32> to vector<16xf32>
    %282 = vector.shape_cast %281 : vector<16xf32> to vector<16x1xf32>
    %cst_110 = arith.constant 3.200000e+01 : f32
    %283 = vector.broadcast %cst_110 : f32 to vector<16x1xf32>
    %284 = arith.divf %282, %283 : vector<16x1xf32>
    %285 = vector.broadcast %284 : vector<16x1xf32> to vector<16x32xf32>
    %286 = arith.subf %278, %285 : vector<16x32xf32>
    %287 = arith.mulf %286, %286 : vector<16x32xf32>
    %cst_111 = arith.constant dense<0.000000e+00> : vector<16xf32>
    %288 = vector.multi_reduction <add>, %287, %cst_111 [1] : vector<16x32xf32> to vector<16xf32>
    %289 = vector.shape_cast %288 : vector<16xf32> to vector<16x1xf32>
    %cst_112 = arith.constant 3.200000e+01 : f32
    %290 = vector.broadcast %cst_112 : f32 to vector<16x1xf32>
    %291 = arith.divf %289, %290 : vector<16x1xf32>
    %292 = vector.broadcast %284 : vector<16x1xf32> to vector<16x32xf32>
    %293 = arith.subf %278, %292 : vector<16x32xf32>
    %cst_113 = arith.constant 9.99999974E-6 : f32
    %294 = vector.broadcast %cst_113 : f32 to vector<16x1xf32>
    %295 = arith.addf %291, %294 : vector<16x1xf32>
    %296 = math.rsqrt %295 : vector<16x1xf32>
    %297 = vector.broadcast %296 : vector<16x1xf32> to vector<16x32xf32>
    %298 = arith.mulf %293, %297 : vector<16x32xf32>
    %299 = vector.broadcast %279 : vector<1x32xf32> to vector<16x32xf32>
    %300 = arith.mulf %298, %299 : vector<16x32xf32>
    %301 = vector.broadcast %280 : vector<1x32xf32> to vector<16x32xf32>
    %302 = arith.addf %300, %301 : vector<16x32xf32>
    %c0_114 = arith.constant 0 : index
    %c0_115 = arith.constant 0 : index
    %c0_116 = arith.constant 0 : index
    %303 = vector.load %arg9[%c0_114, %c0_115, %c0_116] : memref<1x32x64xbf16, #tpu.memory_space<vmem>>, vector<1x32x64xbf16>
    %304 = vector.shape_cast %303 : vector<1x32x64xbf16> to vector<32x64xbf16>
    %c0_117 = arith.constant 0 : index
    %c0_118 = arith.constant 0 : index
    %c0_119 = arith.constant 0 : index
    %305 = vector.load %arg10[%c0_117, %c0_118, %c0_119] : memref<1x1x64xf32, #tpu.memory_space<vmem>>, vector<1x1x64xf32>
    %306 = vector.shape_cast %305 : vector<1x1x64xf32> to vector<1x64xf32>
    %c0_120 = arith.constant 0 : index
    %c0_121 = arith.constant 0 : index
    %c0_122 = arith.constant 0 : index
    %307 = vector.load %arg11[%c0_120, %c0_121, %c0_122] : memref<1x64x32xbf16, #tpu.memory_space<vmem>>, vector<1x64x32xbf16>
    %308 = vector.shape_cast %307 : vector<1x64x32xbf16> to vector<64x32xbf16>
    %c0_123 = arith.constant 0 : index
    %c0_124 = arith.constant 0 : index
    %c0_125 = arith.constant 0 : index
    %309 = vector.load %arg12[%c0_123, %c0_124, %c0_125] : memref<1x3x32xf32, #tpu.memory_space<vmem>>, vector<1x3x32xf32>
    %310 = vector.shape_cast %309 : vector<1x3x32xf32> to vector<3x32xf32>
    %311 = arith.truncf %302 : vector<16x32xf32> to vector<16x32xbf16>
    %cst_126 = arith.constant dense<0.000000e+00> : vector<16x64xf32>
    %312 = tpu.matmul %311, %304, %cst_126 {dimension_numbers = #tpu.dot_dimension_numbers<[1], [0], [0], [1], [0, 0, 1, 1], [], []>} : vector<16x32xbf16>, vector<32x64xbf16>, vector<16x64xf32> -> vector<16x64xf32>
    %313 = vector.broadcast %306 : vector<1x64xf32> to vector<16x64xf32>
    %314 = arith.addf %312, %313 : vector<16x64xf32>
    %cst_127 = arith.constant 0.000000e+00 : f32
    %315 = vector.broadcast %cst_127 : f32 to vector<16x64xf32>
    %316 = arith.maximumf %314, %315 : vector<16x64xf32>
    %317 = arith.truncf %316 : vector<16x64xf32> to vector<16x64xbf16>
    %cst_128 = arith.constant dense<0.000000e+00> : vector<16x32xf32>
    %318 = tpu.matmul %317, %308, %cst_128 {dimension_numbers = #tpu.dot_dimension_numbers<[1], [0], [0], [1], [0, 0, 1, 1], [], []>} : vector<16x64xbf16>, vector<64x32xbf16>, vector<16x32xf32> -> vector<16x32xf32>
    %319 = vector.extract_strided_slice %310 {offsets = [0, 0], sizes = [1, 32], strides = [1, 1]} : vector<3x32xf32> to vector<1x32xf32>
    %320 = vector.broadcast %319 : vector<1x32xf32> to vector<16x32xf32>
    %321 = arith.addf %318, %320 : vector<16x32xf32>
    %322 = arith.addf %321, %302 : vector<16x32xf32>
    %323 = vector.extract_strided_slice %310 {offsets = [1, 0], sizes = [1, 32], strides = [1, 1]} : vector<3x32xf32> to vector<1x32xf32>
    %324 = vector.extract_strided_slice %310 {offsets = [2, 0], sizes = [1, 32], strides = [1, 1]} : vector<3x32xf32> to vector<1x32xf32>
    %cst_129 = arith.constant dense<0.000000e+00> : vector<16xf32>
    %325 = vector.multi_reduction <add>, %322, %cst_129 [1] : vector<16x32xf32> to vector<16xf32>
    %326 = vector.shape_cast %325 : vector<16xf32> to vector<16x1xf32>
    %cst_130 = arith.constant 3.200000e+01 : f32
    %327 = vector.broadcast %cst_130 : f32 to vector<16x1xf32>
    %328 = arith.divf %326, %327 : vector<16x1xf32>
    %329 = vector.broadcast %328 : vector<16x1xf32> to vector<16x32xf32>
    %330 = arith.subf %322, %329 : vector<16x32xf32>
    %331 = arith.mulf %330, %330 : vector<16x32xf32>
    %cst_131 = arith.constant dense<0.000000e+00> : vector<16xf32>
    %332 = vector.multi_reduction <add>, %331, %cst_131 [1] : vector<16x32xf32> to vector<16xf32>
    %333 = vector.shape_cast %332 : vector<16xf32> to vector<16x1xf32>
    %cst_132 = arith.constant 3.200000e+01 : f32
    %334 = vector.broadcast %cst_132 : f32 to vector<16x1xf32>
    %335 = arith.divf %333, %334 : vector<16x1xf32>
    %336 = vector.broadcast %328 : vector<16x1xf32> to vector<16x32xf32>
    %337 = arith.subf %322, %336 : vector<16x32xf32>
    %cst_133 = arith.constant 9.99999974E-6 : f32
    %338 = vector.broadcast %cst_133 : f32 to vector<16x1xf32>
    %339 = arith.addf %335, %338 : vector<16x1xf32>
    %340 = math.rsqrt %339 : vector<16x1xf32>
    %341 = vector.broadcast %340 : vector<16x1xf32> to vector<16x32xf32>
    %342 = arith.mulf %337, %341 : vector<16x32xf32>
    %343 = vector.broadcast %323 : vector<1x32xf32> to vector<16x32xf32>
    %344 = arith.mulf %342, %343 : vector<16x32xf32>
    %345 = vector.broadcast %324 : vector<1x32xf32> to vector<16x32xf32>
    %346 = arith.addf %344, %345 : vector<16x32xf32>
    %c0_134 = arith.constant 0 : index
    %c0_135 = arith.constant 0 : index
    %347 = vector.load %arg18[%c0_134, %c0_135] : memref<16x32xf32, #tpu.memory_space<vmem>>, vector<16x32xf32>
    tpu.vector_store %arg18[%c0_134, %c0_135], %346 {strides = array<i32>} : memref<16x32xf32, #tpu.memory_space<vmem>>, vector<16x32xf32>,
    %c1_i32 = arith.constant 1 : i32
    %348 = arith.cmpi eq, %arg0, %c1_i32 : i32
    %349 = arith.extui %348 : i1 to i32
    %c0_i32_136 = arith.constant 0 : i32
    %350 = arith.cmpi ne, %349, %c0_i32_136 : i32
    scf.if %350 {
      %351 = arith.truncf %346 : vector<16x32xf32> to vector<16x32xbf16>
      %c0_137 = arith.constant 0 : index
      %c0_138 = arith.constant 0 : index
      %352 = vector.load %arg13[%c0_137, %c0_138] : memref<32x32xbf16, #tpu.memory_space<vmem>>, vector<32x32xbf16>
      %cst_139 = arith.constant dense<0.000000e+00> : vector<16x32xf32>
      %353 = tpu.matmul %351, %352, %cst_139 {dimension_numbers = #tpu.dot_dimension_numbers<[1], [0], [0], [1], [0, 0, 1, 1], [], []>} : vector<16x32xbf16>, vector<32x32xbf16>, vector<16x32xf32> -> vector<16x32xf32>
      %c0_140 = arith.constant 0 : index
      %c0_141 = arith.constant 0 : index
      %354 = vector.load %arg14[%c0_140, %c0_141] : memref<1x32xf32, #tpu.memory_space<vmem>>, vector<1x32xf32>
      %355 = vector.broadcast %354 : vector<1x32xf32> to vector<16x32xf32>
      %356 = arith.addf %353, %355 : vector<16x32xf32>
      %cst_142 = arith.constant dense<0xFF800000> : vector<16xf32>
      %357 = vector.multi_reduction <maximumf>, %356, %cst_142 [1] : vector<16x32xf32> to vector<16xf32>
      %358 = vector.shape_cast %357 : vector<16xf32> to vector<16x1xf32>
      %359 = vector.broadcast %358 : vector<16x1xf32> to vector<16x32xf32>
      %360 = arith.subf %356, %359 : vector<16x32xf32>
      %361 = math.exp %360 : vector<16x32xf32>
      %cst_143 = arith.constant dense<0.000000e+00> : vector<16xf32>
      %362 = vector.multi_reduction <add>, %361, %cst_143 [1] : vector<16x32xf32> to vector<16xf32>
      %363 = vector.shape_cast %362 : vector<16xf32> to vector<16x1xf32>
      %364 = tpu.reciprocal %363 {approx = true} : vector<16x1xf32> -> vector<16x1xf32>
      %365 = vector.broadcast %364 : vector<16x1xf32> to vector<16x32xf32>
      %366 = arith.mulf %361, %365 : vector<16x32xf32>
      %c0_144 = arith.constant 0 : index
      %c0_145 = arith.constant 0 : index
      %367 = vector.load %arg15[%c0_144, %c0_145] : memref<16x32xf32, #tpu.memory_space<vmem>>, vector<16x32xf32>
      tpu.vector_store %arg15[%c0_144, %c0_145], %366 {strides = array<i32>} : memref<16x32xf32, #tpu.memory_space<vmem>>, vector<16x32xf32>,
    } else {
    }
    return
  }
  func.func @transform_0(%arg0: i32) -> (i32, i32) {
    %c0_i32 = arith.constant 0 : i32
    %c0_i32_0 = arith.constant 0 : i32
    %c0_i32_1 = arith.constant 0 : i32
    return %c0_i32, %c0_i32_0 : i32, i32
  }
  func.func @transform_1(%arg0: i32) -> (i32, i32) {
    %c0_i32 = arith.constant 0 : i32
    %c0_i32_0 = arith.constant 0 : i32
    %c0_i32_1 = arith.constant 0 : i32
    return %c0_i32, %c0_i32_0 : i32, i32
  }
  func.func @transform_2(%arg0: i32) -> (i32, i32) {
    %c0_i32 = arith.constant 0 : i32
    %c0_i32_0 = arith.constant 0 : i32
    %c0_i32_1 = arith.constant 0 : i32
    return %c0_i32, %c0_i32_0 : i32, i32
  }
  func.func @transform_3(%arg0: i32) -> (i32, i32) {
    %c0_i32 = arith.constant 0 : i32
    %c0_i32_0 = arith.constant 0 : i32
    %c0_i32_1 = arith.constant 0 : i32
    return %c0_i32, %c0_i32_0 : i32, i32
  }
  func.func @transform_4(%arg0: i32) -> (i32, i32, i32) {
    %c0_i32 = arith.constant 0 : i32
    %c0_i32_0 = arith.constant 0 : i32
    %c0_i32_1 = arith.constant 0 : i32
    return %arg0, %c0_i32, %c0_i32_0 : i32, i32, i32
  }
  func.func @transform_5(%arg0: i32) -> (i32, i32, i32) {
    %c0_i32 = arith.constant 0 : i32
    %c0_i32_0 = arith.constant 0 : i32
    %c0_i32_1 = arith.constant 0 : i32
    return %arg0, %c0_i32, %c0_i32_0 : i32, i32, i32
  }
  func.func @transform_6(%arg0: i32) -> (i32, i32, i32) {
    %c0_i32 = arith.constant 0 : i32
    %c0_i32_0 = arith.constant 0 : i32
    %c0_i32_1 = arith.constant 0 : i32
    return %arg0, %c0_i32, %c0_i32_0 : i32, i32, i32
  }
  func.func @transform_7(%arg0: i32) -> (i32, i32, i32) {
    %c0_i32 = arith.constant 0 : i32
    %c0_i32_0 = arith.constant 0 : i32
    %c0_i32_1 = arith.constant 0 : i32
    return %arg0, %c0_i32, %c0_i32_0 : i32, i32, i32
  }
  func.func @transform_8(%arg0: i32) -> (i32, i32, i32) {
    %c0_i32 = arith.constant 0 : i32
    %c0_i32_0 = arith.constant 0 : i32
    %c0_i32_1 = arith.constant 0 : i32
    return %arg0, %c0_i32, %c0_i32_0 : i32, i32, i32
  }
  func.func @transform_9(%arg0: i32) -> (i32, i32, i32) {
    %c0_i32 = arith.constant 0 : i32
    %c0_i32_0 = arith.constant 0 : i32
    %c0_i32_1 = arith.constant 0 : i32
    return %arg0, %c0_i32, %c0_i32_0 : i32, i32, i32
  }
  func.func @transform_10(%arg0: i32) -> (i32, i32, i32) {
    %c0_i32 = arith.constant 0 : i32
    %c0_i32_0 = arith.constant 0 : i32
    %c0_i32_1 = arith.constant 0 : i32
    return %arg0, %c0_i32, %c0_i32_0 : i32, i32, i32
  }
  func.func @transform_11(%arg0: i32) -> (i32, i32, i32) {
    %c0_i32 = arith.constant 0 : i32
    %c0_i32_0 = arith.constant 0 : i32
    %c0_i32_1 = arith.constant 0 : i32
    return %arg0, %c0_i32, %c0_i32_0 : i32, i32, i32
  }
  func.func @transform_12(%arg0: i32) -> (i32, i32) {
    %c0_i32 = arith.constant 0 : i32
    %c0_i32_0 = arith.constant 0 : i32
    %c0_i32_1 = arith.constant 0 : i32
    return %c0_i32, %c0_i32_0 : i32, i32
  }
  func.func @transform_13(%arg0: i32) -> (i32, i32) {
    %c0_i32 = arith.constant 0 : i32
    %c0_i32_0 = arith.constant 0 : i32
    %c0_i32_1 = arith.constant 0 : i32
    return %c0_i32, %c0_i32_0 : i32, i32
  }
  func.func @transform_14(%arg0: i32) -> (i32, i32) {
    %c0_i32 = arith.constant 0 : i32
    %c0_i32_0 = arith.constant 0 : i32
    %c0_i32_1 = arith.constant 0 : i32
    return %c0_i32, %c0_i32_0 : i32, i32
  }
  func.func @transform_15(%arg0: i32) -> (i32, i32, i32) {
    %c0_i32 = arith.constant 0 : i32
    %c0_i32_0 = arith.constant 0 : i32
    %c0_i32_1 = arith.constant 0 : i32
    return %arg0, %c0_i32, %c0_i32_0 : i32, i32, i32
  }
  func.func @transform_16(%arg0: i32) -> (i32, i32, i32) {
    %c0_i32 = arith.constant 0 : i32
    %c0_i32_0 = arith.constant 0 : i32
    %c0_i32_1 = arith.constant 0 : i32
    return %arg0, %c0_i32, %c0_i32_0 : i32, i32, i32
  }
}

module attributes {stable_mosaic.version = 11 : i64} {
  func.func @_encoder_kernel(%arg0: i32, %arg1: memref<16x32xf32, #tpu.memory_space<vmem>>, %arg2: memref<16x16xf32, #tpu.memory_space<vmem>>, %arg3: memref<1x32x128xbf16, #tpu.memory_space<vmem>>, %arg4: memref<1x6x32xf32, #tpu.memory_space<vmem>>, %arg5: memref<1x32x64xbf16, #tpu.memory_space<vmem>>, %arg6: memref<1x1x64xf32, #tpu.memory_space<vmem>>, %arg7: memref<1x64x32xbf16, #tpu.memory_space<vmem>>, %arg8: memref<1x3x32xf32, #tpu.memory_space<vmem>>, %arg9: memref<16x32xf32, #tpu.memory_space<vmem>>, %arg10: memref<1x16x64xf32, #tpu.memory_space<vmem>>, %arg11: memref<16x32xf32, #tpu.memory_space<vmem>>, %arg12: memref<16x32xf32, #tpu.memory_space<vmem>>) attributes {dimension_semantics = [#tpu.dimension_semantics<arbitrary>], iteration_bounds = array<i64: 2>, scalar_prefetch = 0 : i64, scratch_operands = 2 : i64, tpu.core_type = #tpu.core_type<tc>, window_params = [{pipeline_mode = #tpu.pipeline_mode<synchronous>, transform_indices = @transform_0, window_bounds = array<i64: 16, 32>}, {pipeline_mode = #tpu.pipeline_mode<synchronous>, transform_indices = @transform_1, window_bounds = array<i64: 16, 16>}, {transform_indices = @transform_2, window_bounds = array<i64: 1, 32, 128>}, {transform_indices = @transform_3, window_bounds = array<i64: 1, 6, 32>}, {transform_indices = @transform_4, window_bounds = array<i64: 1, 32, 64>}, {transform_indices = @transform_5, window_bounds = array<i64: 1, 1, 64>}, {transform_indices = @transform_6, window_bounds = array<i64: 1, 64, 32>}, {transform_indices = @transform_7, window_bounds = array<i64: 1, 3, 32>}, {pipeline_mode = #tpu.pipeline_mode<synchronous>, transform_indices = @transform_8, window_bounds = array<i64: 16, 32>}, {transform_indices = @transform_9, window_bounds = array<i64: 1, 16, 64>}]} {
    %c0_i32 = arith.constant 0 : i32
    %0 = arith.cmpi eq, %arg0, %c0_i32 : i32
    %1 = arith.extui %0 : i1 to i32
    %c0_i32_0 = arith.constant 0 : i32
    %2 = arith.cmpi ne, %1, %c0_i32_0 : i32
    scf.if %2 {
      %c0_77 = arith.constant 0 : index
      %c0_78 = arith.constant 0 : index
      %201 = vector.load %arg1[%c0_77, %c0_78] : memref<16x32xf32, #tpu.memory_space<vmem>>, vector<16x32xf32>
      %c0_79 = arith.constant 0 : index
      %c0_80 = arith.constant 0 : index
      %202 = vector.load %arg11[%c0_79, %c0_80] : memref<16x32xf32, #tpu.memory_space<vmem>>, vector<16x32xf32>
      tpu.vector_store %arg11[%c0_79, %c0_80], %201 {strides = array<i32>} : memref<16x32xf32, #tpu.memory_space<vmem>>, vector<16x32xf32>,
    } else {
    }
    %c0 = arith.constant 0 : index
    %c0_1 = arith.constant 0 : index
    %3 = vector.load %arg11[%c0, %c0_1] : memref<16x32xf32, #tpu.memory_space<vmem>>, vector<16x32xf32>
    %c0_2 = arith.constant 0 : index
    %c0_3 = arith.constant 0 : index
    %4 = vector.load %arg2[%c0_2, %c0_3] : memref<16x16xf32, #tpu.memory_space<vmem>>, vector<16x16xf32>
    %c0_4 = arith.constant 0 : index
    %c0_5 = arith.constant 0 : index
    %c0_6 = arith.constant 0 : index
    %5 = vector.load %arg3[%c0_4, %c0_5, %c0_6] : memref<1x32x128xbf16, #tpu.memory_space<vmem>>, vector<1x32x128xbf16>
    %6 = vector.shape_cast %5 : vector<1x32x128xbf16> to vector<32x128xbf16>
    %c0_7 = arith.constant 0 : index
    %c0_8 = arith.constant 0 : index
    %c0_9 = arith.constant 0 : index
    %7 = vector.load %arg4[%c0_7, %c0_8, %c0_9] : memref<1x6x32xf32, #tpu.memory_space<vmem>>, vector<1x6x32xf32>
    %8 = vector.shape_cast %7 : vector<1x6x32xf32> to vector<6x32xf32>
    %9 = arith.truncf %3 : vector<16x32xf32> to vector<16x32xbf16>
    %10 = vector.extract_strided_slice %6 {offsets = [0, 0], sizes = [32, 32], strides = [1, 1]} : vector<32x128xbf16> to vector<32x32xbf16>
    %cst = arith.constant dense<0.000000e+00> : vector<16x32xf32>
    %11 = tpu.matmul %9, %10, %cst {dimension_numbers = #tpu.dot_dimension_numbers<[1], [0], [0], [1], [0, 0, 1, 1], [], []>} : vector<16x32xbf16>, vector<32x32xbf16>, vector<16x32xf32> -> vector<16x32xf32>
    %12 = vector.extract_strided_slice %8 {offsets = [0, 0], sizes = [1, 32], strides = [1, 1]} : vector<6x32xf32> to vector<1x32xf32>
    %13 = vector.broadcast %12 : vector<1x32xf32> to vector<16x32xf32>
    %14 = arith.addf %11, %13 : vector<16x32xf32>
    %15 = arith.truncf %3 : vector<16x32xf32> to vector<16x32xbf16>
    %16 = vector.extract_strided_slice %6 {offsets = [0, 32], sizes = [32, 64], strides = [1, 1]} : vector<32x128xbf16> to vector<32x64xbf16>
    %cst_10 = arith.constant dense<0.000000e+00> : vector<16x64xf32>
    %17 = tpu.matmul %15, %16, %cst_10 {dimension_numbers = #tpu.dot_dimension_numbers<[1], [0], [0], [1], [0, 0, 1, 1], [], []>} : vector<16x32xbf16>, vector<32x64xbf16>, vector<16x64xf32> -> vector<16x64xf32>
    %18 = vector.extract_strided_slice %17 {offsets = [0, 0], sizes = [16, 32], strides = [1, 1]} : vector<16x64xf32> to vector<16x32xf32>
    %19 = vector.extract_strided_slice %8 {offsets = [1, 0], sizes = [1, 32], strides = [1, 1]} : vector<6x32xf32> to vector<1x32xf32>
    %20 = vector.broadcast %19 : vector<1x32xf32> to vector<16x32xf32>
    %21 = arith.addf %18, %20 : vector<16x32xf32>
    %22 = vector.extract_strided_slice %17 {offsets = [0, 32], sizes = [16, 32], strides = [1, 1]} : vector<16x64xf32> to vector<16x32xf32>
    %23 = vector.extract_strided_slice %8 {offsets = [2, 0], sizes = [1, 32], strides = [1, 1]} : vector<6x32xf32> to vector<1x32xf32>
    %24 = vector.broadcast %23 : vector<1x32xf32> to vector<16x32xf32>
    %25 = arith.addf %22, %24 : vector<16x32xf32>
    %26 = arith.truncf %14 : vector<16x32xf32> to vector<16x32xbf16>
    %27 = arith.truncf %21 : vector<16x32xf32> to vector<16x32xbf16>
    %28 = arith.truncf %25 : vector<16x32xf32> to vector<16x32xbf16>
    %29 = vector.extract_strided_slice %26 {offsets = [0, 0], sizes = [16, 8], strides = [1, 1]} : vector<16x32xbf16> to vector<16x8xbf16>
    %30 = vector.extract_strided_slice %27 {offsets = [0, 0], sizes = [16, 8], strides = [1, 1]} : vector<16x32xbf16> to vector<16x8xbf16>
    %31 = vector.extract_strided_slice %28 {offsets = [0, 0], sizes = [16, 8], strides = [1, 1]} : vector<16x32xbf16> to vector<16x8xbf16>
    %cst_11 = arith.constant dense<0.000000e+00> : vector<16x16xf32>
    %32 = tpu.matmul %29, %30, %cst_11 {dimension_numbers = #tpu.dot_dimension_numbers<[1], [1], [0], [0], [0, 0, 1, 0], [], []>} : vector<16x8xbf16>, vector<16x8xbf16>, vector<16x16xf32> -> vector<16x16xf32>
    %cst_12 = arith.constant 0.353553385 : f32
    %33 = vector.broadcast %cst_12 : f32 to vector<16x16xf32>
    %34 = arith.mulf %32, %33 : vector<16x16xf32>
    %35 = arith.addf %34, %4 : vector<16x16xf32>
    %cst_13 = arith.constant dense<0xFF800000> : vector<16xf32>
    %36 = vector.multi_reduction <maximumf>, %35, %cst_13 [1] : vector<16x16xf32> to vector<16xf32>
    %37 = vector.shape_cast %36 : vector<16xf32> to vector<16x1xf32>
    %38 = vector.broadcast %37 : vector<16x1xf32> to vector<16x16xf32>
    %39 = arith.subf %35, %38 : vector<16x16xf32>
    %40 = math.exp %39 : vector<16x16xf32>
    %cst_14 = arith.constant dense<0.000000e+00> : vector<16xf32>
    %41 = vector.multi_reduction <add>, %40, %cst_14 [1] : vector<16x16xf32> to vector<16xf32>
    %42 = vector.shape_cast %41 : vector<16xf32> to vector<16x1xf32>
    %43 = tpu.reciprocal %42 {approx = true} : vector<16x1xf32> -> vector<16x1xf32>
    %44 = vector.broadcast %43 : vector<16x1xf32> to vector<16x16xf32>
    %45 = arith.mulf %40, %44 : vector<16x16xf32>
    %c0_15 = arith.constant 0 : index
    %c0_16 = arith.constant 0 : index
    %c0_17 = arith.constant 0 : index
    %46 = vector.load %arg10[%c0_15, %c0_16, %c0_17] : memref<1x16x64xf32, #tpu.memory_space<vmem>>, vector<1x16x16xf32>
    %47 = vector.shape_cast %46 : vector<1x16x16xf32> to vector<16x16xf32>
    %48 = vector.shape_cast %45 : vector<16x16xf32> to vector<1x16x16xf32>
    tpu.vector_store %arg10[%c0_15, %c0_16, %c0_17], %48 {strides = array<i32>} : memref<1x16x64xf32, #tpu.memory_space<vmem>>, vector<1x16x16xf32>,
    %49 = arith.truncf %45 : vector<16x16xf32> to vector<16x16xbf16>
    %cst_18 = arith.constant dense<0.000000e+00> : vector<16x8xf32>
    %50 = tpu.matmul %49, %31, %cst_18 {dimension_numbers = #tpu.dot_dimension_numbers<[1], [0], [0], [1], [0, 0, 1, 1], [], []>} : vector<16x16xbf16>, vector<16x8xbf16>, vector<16x8xf32> -> vector<16x8xf32>
    %c0_19 = arith.constant 0 : index
    %c0_20 = arith.constant 0 : index
    %51 = vector.load %arg12[%c0_19, %c0_20] : memref<16x32xf32, #tpu.memory_space<vmem>>, vector<16x8xf32>
    tpu.vector_store %arg12[%c0_19, %c0_20], %50 {strides = array<i32>} : memref<16x32xf32, #tpu.memory_space<vmem>>, vector<16x8xf32>,
    %52 = vector.extract_strided_slice %26 {offsets = [0, 8], sizes = [16, 8], strides = [1, 1]} : vector<16x32xbf16> to vector<16x8xbf16>
    %53 = vector.extract_strided_slice %27 {offsets = [0, 8], sizes = [16, 8], strides = [1, 1]} : vector<16x32xbf16> to vector<16x8xbf16>
    %54 = vector.extract_strided_slice %28 {offsets = [0, 8], sizes = [16, 8], strides = [1, 1]} : vector<16x32xbf16> to vector<16x8xbf16>
    %cst_21 = arith.constant dense<0.000000e+00> : vector<16x16xf32>
    %55 = tpu.matmul %52, %53, %cst_21 {dimension_numbers = #tpu.dot_dimension_numbers<[1], [1], [0], [0], [0, 0, 1, 0], [], []>} : vector<16x8xbf16>, vector<16x8xbf16>, vector<16x16xf32> -> vector<16x16xf32>
    %cst_22 = arith.constant 0.353553385 : f32
    %56 = vector.broadcast %cst_22 : f32 to vector<16x16xf32>
    %57 = arith.mulf %55, %56 : vector<16x16xf32>
    %58 = arith.addf %57, %4 : vector<16x16xf32>
    %cst_23 = arith.constant dense<0xFF800000> : vector<16xf32>
    %59 = vector.multi_reduction <maximumf>, %58, %cst_23 [1] : vector<16x16xf32> to vector<16xf32>
    %60 = vector.shape_cast %59 : vector<16xf32> to vector<16x1xf32>
    %61 = vector.broadcast %60 : vector<16x1xf32> to vector<16x16xf32>
    %62 = arith.subf %58, %61 : vector<16x16xf32>
    %63 = math.exp %62 : vector<16x16xf32>
    %cst_24 = arith.constant dense<0.000000e+00> : vector<16xf32>
    %64 = vector.multi_reduction <add>, %63, %cst_24 [1] : vector<16x16xf32> to vector<16xf32>
    %65 = vector.shape_cast %64 : vector<16xf32> to vector<16x1xf32>
    %66 = tpu.reciprocal %65 {approx = true} : vector<16x1xf32> -> vector<16x1xf32>
    %67 = vector.broadcast %66 : vector<16x1xf32> to vector<16x16xf32>
    %68 = arith.mulf %63, %67 : vector<16x16xf32>
    %c0_25 = arith.constant 0 : index
    %c0_26 = arith.constant 0 : index
    %c16 = arith.constant 16 : index
    %69 = vector.load %arg10[%c0_25, %c0_26, %c16] : memref<1x16x64xf32, #tpu.memory_space<vmem>>, vector<1x16x16xf32>
    %70 = vector.shape_cast %69 : vector<1x16x16xf32> to vector<16x16xf32>
    %71 = vector.shape_cast %68 : vector<16x16xf32> to vector<1x16x16xf32>
    tpu.vector_store %arg10[%c0_25, %c0_26, %c16], %71 {strides = array<i32>} : memref<1x16x64xf32, #tpu.memory_space<vmem>>, vector<1x16x16xf32>,
    %72 = arith.truncf %68 : vector<16x16xf32> to vector<16x16xbf16>
    %cst_27 = arith.constant dense<0.000000e+00> : vector<16x8xf32>
    %73 = tpu.matmul %72, %54, %cst_27 {dimension_numbers = #tpu.dot_dimension_numbers<[1], [0], [0], [1], [0, 0, 1, 1], [], []>} : vector<16x16xbf16>, vector<16x8xbf16>, vector<16x8xf32> -> vector<16x8xf32>
    %c0_28 = arith.constant 0 : index
    %c8 = arith.constant 8 : index
    %74 = vector.load %arg12[%c0_28, %c8] : memref<16x32xf32, #tpu.memory_space<vmem>>, vector<16x8xf32>
    tpu.vector_store %arg12[%c0_28, %c8], %73 {strides = array<i32>} : memref<16x32xf32, #tpu.memory_space<vmem>>, vector<16x8xf32>,
    %75 = vector.extract_strided_slice %26 {offsets = [0, 16], sizes = [16, 8], strides = [1, 1]} : vector<16x32xbf16> to vector<16x8xbf16>
    %76 = vector.extract_strided_slice %27 {offsets = [0, 16], sizes = [16, 8], strides = [1, 1]} : vector<16x32xbf16> to vector<16x8xbf16>
    %77 = vector.extract_strided_slice %28 {offsets = [0, 16], sizes = [16, 8], strides = [1, 1]} : vector<16x32xbf16> to vector<16x8xbf16>
    %cst_29 = arith.constant dense<0.000000e+00> : vector<16x16xf32>
    %78 = tpu.matmul %75, %76, %cst_29 {dimension_numbers = #tpu.dot_dimension_numbers<[1], [1], [0], [0], [0, 0, 1, 0], [], []>} : vector<16x8xbf16>, vector<16x8xbf16>, vector<16x16xf32> -> vector<16x16xf32>
    %cst_30 = arith.constant 0.353553385 : f32
    %79 = vector.broadcast %cst_30 : f32 to vector<16x16xf32>
    %80 = arith.mulf %78, %79 : vector<16x16xf32>
    %81 = arith.addf %80, %4 : vector<16x16xf32>
    %cst_31 = arith.constant dense<0xFF800000> : vector<16xf32>
    %82 = vector.multi_reduction <maximumf>, %81, %cst_31 [1] : vector<16x16xf32> to vector<16xf32>
    %83 = vector.shape_cast %82 : vector<16xf32> to vector<16x1xf32>
    %84 = vector.broadcast %83 : vector<16x1xf32> to vector<16x16xf32>
    %85 = arith.subf %81, %84 : vector<16x16xf32>
    %86 = math.exp %85 : vector<16x16xf32>
    %cst_32 = arith.constant dense<0.000000e+00> : vector<16xf32>
    %87 = vector.multi_reduction <add>, %86, %cst_32 [1] : vector<16x16xf32> to vector<16xf32>
    %88 = vector.shape_cast %87 : vector<16xf32> to vector<16x1xf32>
    %89 = tpu.reciprocal %88 {approx = true} : vector<16x1xf32> -> vector<16x1xf32>
    %90 = vector.broadcast %89 : vector<16x1xf32> to vector<16x16xf32>
    %91 = arith.mulf %86, %90 : vector<16x16xf32>
    %c0_33 = arith.constant 0 : index
    %c0_34 = arith.constant 0 : index
    %c32 = arith.constant 32 : index
    %92 = vector.load %arg10[%c0_33, %c0_34, %c32] : memref<1x16x64xf32, #tpu.memory_space<vmem>>, vector<1x16x16xf32>
    %93 = vector.shape_cast %92 : vector<1x16x16xf32> to vector<16x16xf32>
    %94 = vector.shape_cast %91 : vector<16x16xf32> to vector<1x16x16xf32>
    tpu.vector_store %arg10[%c0_33, %c0_34, %c32], %94 {strides = array<i32>} : memref<1x16x64xf32, #tpu.memory_space<vmem>>, vector<1x16x16xf32>,
    %95 = arith.truncf %91 : vector<16x16xf32> to vector<16x16xbf16>
    %cst_35 = arith.constant dense<0.000000e+00> : vector<16x8xf32>
    %96 = tpu.matmul %95, %77, %cst_35 {dimension_numbers = #tpu.dot_dimension_numbers<[1], [0], [0], [1], [0, 0, 1, 1], [], []>} : vector<16x16xbf16>, vector<16x8xbf16>, vector<16x8xf32> -> vector<16x8xf32>
    %c0_36 = arith.constant 0 : index
    %c16_37 = arith.constant 16 : index
    %97 = vector.load %arg12[%c0_36, %c16_37] : memref<16x32xf32, #tpu.memory_space<vmem>>, vector<16x8xf32>
    tpu.vector_store %arg12[%c0_36, %c16_37], %96 {strides = array<i32>} : memref<16x32xf32, #tpu.memory_space<vmem>>, vector<16x8xf32>,
    %98 = vector.extract_strided_slice %26 {offsets = [0, 24], sizes = [16, 8], strides = [1, 1]} : vector<16x32xbf16> to vector<16x8xbf16>
    %99 = vector.extract_strided_slice %27 {offsets = [0, 24], sizes = [16, 8], strides = [1, 1]} : vector<16x32xbf16> to vector<16x8xbf16>
    %100 = vector.extract_strided_slice %28 {offsets = [0, 24], sizes = [16, 8], strides = [1, 1]} : vector<16x32xbf16> to vector<16x8xbf16>
    %cst_38 = arith.constant dense<0.000000e+00> : vector<16x16xf32>
    %101 = tpu.matmul %98, %99, %cst_38 {dimension_numbers = #tpu.dot_dimension_numbers<[1], [1], [0], [0], [0, 0, 1, 0], [], []>} : vector<16x8xbf16>, vector<16x8xbf16>, vector<16x16xf32> -> vector<16x16xf32>
    %cst_39 = arith.constant 0.353553385 : f32
    %102 = vector.broadcast %cst_39 : f32 to vector<16x16xf32>
    %103 = arith.mulf %101, %102 : vector<16x16xf32>
    %104 = arith.addf %103, %4 : vector<16x16xf32>
    %cst_40 = arith.constant dense<0xFF800000> : vector<16xf32>
    %105 = vector.multi_reduction <maximumf>, %104, %cst_40 [1] : vector<16x16xf32> to vector<16xf32>
    %106 = vector.shape_cast %105 : vector<16xf32> to vector<16x1xf32>
    %107 = vector.broadcast %106 : vector<16x1xf32> to vector<16x16xf32>
    %108 = arith.subf %104, %107 : vector<16x16xf32>
    %109 = math.exp %108 : vector<16x16xf32>
    %cst_41 = arith.constant dense<0.000000e+00> : vector<16xf32>
    %110 = vector.multi_reduction <add>, %109, %cst_41 [1] : vector<16x16xf32> to vector<16xf32>
    %111 = vector.shape_cast %110 : vector<16xf32> to vector<16x1xf32>
    %112 = tpu.reciprocal %111 {approx = true} : vector<16x1xf32> -> vector<16x1xf32>
    %113 = vector.broadcast %112 : vector<16x1xf32> to vector<16x16xf32>
    %114 = arith.mulf %109, %113 : vector<16x16xf32>
    %c0_42 = arith.constant 0 : index
    %c0_43 = arith.constant 0 : index
    %c48 = arith.constant 48 : index
    %115 = vector.load %arg10[%c0_42, %c0_43, %c48] : memref<1x16x64xf32, #tpu.memory_space<vmem>>, vector<1x16x16xf32>
    %116 = vector.shape_cast %115 : vector<1x16x16xf32> to vector<16x16xf32>
    %117 = vector.shape_cast %114 : vector<16x16xf32> to vector<1x16x16xf32>
    tpu.vector_store %arg10[%c0_42, %c0_43, %c48], %117 {strides = array<i32>} : memref<1x16x64xf32, #tpu.memory_space<vmem>>, vector<1x16x16xf32>,
    %118 = arith.truncf %114 : vector<16x16xf32> to vector<16x16xbf16>
    %cst_44 = arith.constant dense<0.000000e+00> : vector<16x8xf32>
    %119 = tpu.matmul %118, %100, %cst_44 {dimension_numbers = #tpu.dot_dimension_numbers<[1], [0], [0], [1], [0, 0, 1, 1], [], []>} : vector<16x16xbf16>, vector<16x8xbf16>, vector<16x8xf32> -> vector<16x8xf32>
    %c0_45 = arith.constant 0 : index
    %c24 = arith.constant 24 : index
    %120 = vector.load %arg12[%c0_45, %c24] : memref<16x32xf32, #tpu.memory_space<vmem>>, vector<16x8xf32>
    tpu.vector_store %arg12[%c0_45, %c24], %119 {strides = array<i32>} : memref<16x32xf32, #tpu.memory_space<vmem>>, vector<16x8xf32>,
    %c0_46 = arith.constant 0 : index
    %c0_47 = arith.constant 0 : index
    %121 = vector.load %arg12[%c0_46, %c0_47] : memref<16x32xf32, #tpu.memory_space<vmem>>, vector<16x32xf32>
    %122 = arith.truncf %121 : vector<16x32xf32> to vector<16x32xbf16>
    %123 = vector.extract_strided_slice %6 {offsets = [0, 96], sizes = [32, 32], strides = [1, 1]} : vector<32x128xbf16> to vector<32x32xbf16>
    %cst_48 = arith.constant dense<0.000000e+00> : vector<16x32xf32>
    %124 = tpu.matmul %122, %123, %cst_48 {dimension_numbers = #tpu.dot_dimension_numbers<[1], [0], [0], [1], [0, 0, 1, 1], [], []>} : vector<16x32xbf16>, vector<32x32xbf16>, vector<16x32xf32> -> vector<16x32xf32>
    %125 = vector.extract_strided_slice %8 {offsets = [3, 0], sizes = [1, 32], strides = [1, 1]} : vector<6x32xf32> to vector<1x32xf32>
    %126 = vector.broadcast %125 : vector<1x32xf32> to vector<16x32xf32>
    %127 = arith.addf %124, %126 : vector<16x32xf32>
    %128 = arith.addf %127, %3 : vector<16x32xf32>
    %129 = vector.extract_strided_slice %8 {offsets = [4, 0], sizes = [1, 32], strides = [1, 1]} : vector<6x32xf32> to vector<1x32xf32>
    %130 = vector.extract_strided_slice %8 {offsets = [5, 0], sizes = [1, 32], strides = [1, 1]} : vector<6x32xf32> to vector<1x32xf32>
    %cst_49 = arith.constant dense<0.000000e+00> : vector<16xf32>
    %131 = vector.multi_reduction <add>, %128, %cst_49 [1] : vector<16x32xf32> to vector<16xf32>
    %132 = vector.shape_cast %131 : vector<16xf32> to vector<16x1xf32>
    %cst_50 = arith.constant 3.200000e+01 : f32
    %133 = vector.broadcast %cst_50 : f32 to vector<16x1xf32>
    %134 = arith.divf %132, %133 : vector<16x1xf32>
    %135 = vector.broadcast %134 : vector<16x1xf32> to vector<16x32xf32>
    %136 = arith.subf %128, %135 : vector<16x32xf32>
    %137 = arith.mulf %136, %136 : vector<16x32xf32>
    %cst_51 = arith.constant dense<0.000000e+00> : vector<16xf32>
    %138 = vector.multi_reduction <add>, %137, %cst_51 [1] : vector<16x32xf32> to vector<16xf32>
    %139 = vector.shape_cast %138 : vector<16xf32> to vector<16x1xf32>
    %cst_52 = arith.constant 3.200000e+01 : f32
    %140 = vector.broadcast %cst_52 : f32 to vector<16x1xf32>
    %141 = arith.divf %139, %140 : vector<16x1xf32>
    %142 = vector.broadcast %134 : vector<16x1xf32> to vector<16x32xf32>
    %143 = arith.subf %128, %142 : vector<16x32xf32>
    %cst_53 = arith.constant 9.99999974E-6 : f32
    %144 = vector.broadcast %cst_53 : f32 to vector<16x1xf32>
    %145 = arith.addf %141, %144 : vector<16x1xf32>
    %146 = math.rsqrt %145 : vector<16x1xf32>
    %147 = vector.broadcast %146 : vector<16x1xf32> to vector<16x32xf32>
    %148 = arith.mulf %143, %147 : vector<16x32xf32>
    %149 = vector.broadcast %129 : vector<1x32xf32> to vector<16x32xf32>
    %150 = arith.mulf %148, %149 : vector<16x32xf32>
    %151 = vector.broadcast %130 : vector<1x32xf32> to vector<16x32xf32>
    %152 = arith.addf %150, %151 : vector<16x32xf32>
    %c0_54 = arith.constant 0 : index
    %c0_55 = arith.constant 0 : index
    %c0_56 = arith.constant 0 : index
    %153 = vector.load %arg5[%c0_54, %c0_55, %c0_56] : memref<1x32x64xbf16, #tpu.memory_space<vmem>>, vector<1x32x64xbf16>
    %154 = vector.shape_cast %153 : vector<1x32x64xbf16> to vector<32x64xbf16>
    %c0_57 = arith.constant 0 : index
    %c0_58 = arith.constant 0 : index
    %c0_59 = arith.constant 0 : index
    %155 = vector.load %arg6[%c0_57, %c0_58, %c0_59] : memref<1x1x64xf32, #tpu.memory_space<vmem>>, vector<1x1x64xf32>
    %156 = vector.shape_cast %155 : vector<1x1x64xf32> to vector<1x64xf32>
    %c0_60 = arith.constant 0 : index
    %c0_61 = arith.constant 0 : index
    %c0_62 = arith.constant 0 : index
    %157 = vector.load %arg7[%c0_60, %c0_61, %c0_62] : memref<1x64x32xbf16, #tpu.memory_space<vmem>>, vector<1x64x32xbf16>
    %158 = vector.shape_cast %157 : vector<1x64x32xbf16> to vector<64x32xbf16>
    %c0_63 = arith.constant 0 : index
    %c0_64 = arith.constant 0 : index
    %c0_65 = arith.constant 0 : index
    %159 = vector.load %arg8[%c0_63, %c0_64, %c0_65] : memref<1x3x32xf32, #tpu.memory_space<vmem>>, vector<1x3x32xf32>
    %160 = vector.shape_cast %159 : vector<1x3x32xf32> to vector<3x32xf32>
    %161 = arith.truncf %152 : vector<16x32xf32> to vector<16x32xbf16>
    %cst_66 = arith.constant dense<0.000000e+00> : vector<16x64xf32>
    %162 = tpu.matmul %161, %154, %cst_66 {dimension_numbers = #tpu.dot_dimension_numbers<[1], [0], [0], [1], [0, 0, 1, 1], [], []>} : vector<16x32xbf16>, vector<32x64xbf16>, vector<16x64xf32> -> vector<16x64xf32>
    %163 = vector.broadcast %156 : vector<1x64xf32> to vector<16x64xf32>
    %164 = arith.addf %162, %163 : vector<16x64xf32>
    %cst_67 = arith.constant 0.000000e+00 : f32
    %165 = vector.broadcast %cst_67 : f32 to vector<16x64xf32>
    %166 = arith.maximumf %164, %165 : vector<16x64xf32>
    %167 = arith.truncf %166 : vector<16x64xf32> to vector<16x64xbf16>
    %cst_68 = arith.constant dense<0.000000e+00> : vector<16x32xf32>
    %168 = tpu.matmul %167, %158, %cst_68 {dimension_numbers = #tpu.dot_dimension_numbers<[1], [0], [0], [1], [0, 0, 1, 1], [], []>} : vector<16x64xbf16>, vector<64x32xbf16>, vector<16x32xf32> -> vector<16x32xf32>
    %169 = vector.extract_strided_slice %160 {offsets = [0, 0], sizes = [1, 32], strides = [1, 1]} : vector<3x32xf32> to vector<1x32xf32>
    %170 = vector.broadcast %169 : vector<1x32xf32> to vector<16x32xf32>
    %171 = arith.addf %168, %170 : vector<16x32xf32>
    %172 = arith.addf %171, %152 : vector<16x32xf32>
    %173 = vector.extract_strided_slice %160 {offsets = [1, 0], sizes = [1, 32], strides = [1, 1]} : vector<3x32xf32> to vector<1x32xf32>
    %174 = vector.extract_strided_slice %160 {offsets = [2, 0], sizes = [1, 32], strides = [1, 1]} : vector<3x32xf32> to vector<1x32xf32>
    %cst_69 = arith.constant dense<0.000000e+00> : vector<16xf32>
    %175 = vector.multi_reduction <add>, %172, %cst_69 [1] : vector<16x32xf32> to vector<16xf32>
    %176 = vector.shape_cast %175 : vector<16xf32> to vector<16x1xf32>
    %cst_70 = arith.constant 3.200000e+01 : f32
    %177 = vector.broadcast %cst_70 : f32 to vector<16x1xf32>
    %178 = arith.divf %176, %177 : vector<16x1xf32>
    %179 = vector.broadcast %178 : vector<16x1xf32> to vector<16x32xf32>
    %180 = arith.subf %172, %179 : vector<16x32xf32>
    %181 = arith.mulf %180, %180 : vector<16x32xf32>
    %cst_71 = arith.constant dense<0.000000e+00> : vector<16xf32>
    %182 = vector.multi_reduction <add>, %181, %cst_71 [1] : vector<16x32xf32> to vector<16xf32>
    %183 = vector.shape_cast %182 : vector<16xf32> to vector<16x1xf32>
    %cst_72 = arith.constant 3.200000e+01 : f32
    %184 = vector.broadcast %cst_72 : f32 to vector<16x1xf32>
    %185 = arith.divf %183, %184 : vector<16x1xf32>
    %186 = vector.broadcast %178 : vector<16x1xf32> to vector<16x32xf32>
    %187 = arith.subf %172, %186 : vector<16x32xf32>
    %cst_73 = arith.constant 9.99999974E-6 : f32
    %188 = vector.broadcast %cst_73 : f32 to vector<16x1xf32>
    %189 = arith.addf %185, %188 : vector<16x1xf32>
    %190 = math.rsqrt %189 : vector<16x1xf32>
    %191 = vector.broadcast %190 : vector<16x1xf32> to vector<16x32xf32>
    %192 = arith.mulf %187, %191 : vector<16x32xf32>
    %193 = vector.broadcast %173 : vector<1x32xf32> to vector<16x32xf32>
    %194 = arith.mulf %192, %193 : vector<16x32xf32>
    %195 = vector.broadcast %174 : vector<1x32xf32> to vector<16x32xf32>
    %196 = arith.addf %194, %195 : vector<16x32xf32>
    %c0_74 = arith.constant 0 : index
    %c0_75 = arith.constant 0 : index
    %197 = vector.load %arg11[%c0_74, %c0_75] : memref<16x32xf32, #tpu.memory_space<vmem>>, vector<16x32xf32>
    tpu.vector_store %arg11[%c0_74, %c0_75], %196 {strides = array<i32>} : memref<16x32xf32, #tpu.memory_space<vmem>>, vector<16x32xf32>,
    %c1_i32 = arith.constant 1 : i32
    %198 = arith.cmpi eq, %arg0, %c1_i32 : i32
    %199 = arith.extui %198 : i1 to i32
    %c0_i32_76 = arith.constant 0 : i32
    %200 = arith.cmpi ne, %199, %c0_i32_76 : i32
    scf.if %200 {
      %c0_77 = arith.constant 0 : index
      %c0_78 = arith.constant 0 : index
      %201 = vector.load %arg9[%c0_77, %c0_78] : memref<16x32xf32, #tpu.memory_space<vmem>>, vector<16x32xf32>
      tpu.vector_store %arg9[%c0_77, %c0_78], %196 {strides = array<i32>} : memref<16x32xf32, #tpu.memory_space<vmem>>, vector<16x32xf32>,
    } else {
    }
    return
  }
  func.func @transform_0(%arg0: i32) -> (i32, i32) {
    %c0_i32 = arith.constant 0 : i32
    %c0_i32_0 = arith.constant 0 : i32
    %c0_i32_1 = arith.constant 0 : i32
    return %c0_i32, %c0_i32_0 : i32, i32
  }
  func.func @transform_1(%arg0: i32) -> (i32, i32) {
    %c0_i32 = arith.constant 0 : i32
    %c0_i32_0 = arith.constant 0 : i32
    %c0_i32_1 = arith.constant 0 : i32
    return %c0_i32, %c0_i32_0 : i32, i32
  }
  func.func @transform_2(%arg0: i32) -> (i32, i32, i32) {
    %c0_i32 = arith.constant 0 : i32
    %c0_i32_0 = arith.constant 0 : i32
    %c0_i32_1 = arith.constant 0 : i32
    return %arg0, %c0_i32, %c0_i32_0 : i32, i32, i32
  }
  func.func @transform_3(%arg0: i32) -> (i32, i32, i32) {
    %c0_i32 = arith.constant 0 : i32
    %c0_i32_0 = arith.constant 0 : i32
    %c0_i32_1 = arith.constant 0 : i32
    return %arg0, %c0_i32, %c0_i32_0 : i32, i32, i32
  }
  func.func @transform_4(%arg0: i32) -> (i32, i32, i32) {
    %c0_i32 = arith.constant 0 : i32
    %c0_i32_0 = arith.constant 0 : i32
    %c0_i32_1 = arith.constant 0 : i32
    return %arg0, %c0_i32, %c0_i32_0 : i32, i32, i32
  }
  func.func @transform_5(%arg0: i32) -> (i32, i32, i32) {
    %c0_i32 = arith.constant 0 : i32
    %c0_i32_0 = arith.constant 0 : i32
    %c0_i32_1 = arith.constant 0 : i32
    return %arg0, %c0_i32, %c0_i32_0 : i32, i32, i32
  }
  func.func @transform_6(%arg0: i32) -> (i32, i32, i32) {
    %c0_i32 = arith.constant 0 : i32
    %c0_i32_0 = arith.constant 0 : i32
    %c0_i32_1 = arith.constant 0 : i32
    return %arg0, %c0_i32, %c0_i32_0 : i32, i32, i32
  }
  func.func @transform_7(%arg0: i32) -> (i32, i32, i32) {
    %c0_i32 = arith.constant 0 : i32
    %c0_i32_0 = arith.constant 0 : i32
    %c0_i32_1 = arith.constant 0 : i32
    return %arg0, %c0_i32, %c0_i32_0 : i32, i32, i32
  }
  func.func @transform_8(%arg0: i32) -> (i32, i32) {
    %c0_i32 = arith.constant 0 : i32
    %c0_i32_0 = arith.constant 0 : i32
    %c0_i32_1 = arith.constant 0 : i32
    return %c0_i32, %c0_i32_0 : i32, i32
  }
  func.func @transform_9(%arg0: i32) -> (i32, i32, i32) {
    %c0_i32 = arith.constant 0 : i32
    %c0_i32_0 = arith.constant 0 : i32
    %c0_i32_1 = arith.constant 0 : i32
    return %arg0, %c0_i32, %c0_i32_0 : i32, i32, i32
  }
}

</mosaic_0001>

<bundles_post_ra>
// kernel: transformer_forward.2
= control target key start
LH: loop header
LB: loop body
LE: loop exit
PB: predicated region body
PF: predicated region fallthrough
CT: control target
= control target key end

     0   :  { %s1866_s30 = smov 0   ;;  %s2168_s0 = inlined_call_operand.vmem [shape: f32[16,32], index: 0, kind: input, shape index: {}]   ;;  %s2169_s1 = inlined_call_operand.vmem [shape: f32[16,16], index: 1, kind: input, shape index: {}]   ;;  %s2170_s2 = inlined_call_operand.vmem [shape: bf16[2,32,128], index: 2, kind: input, shape index: {}]   ;;  %s2171_s3 = inlined_call_operand.vmem [shape: f32[2,6,32], index: 3, kind: input, shape index: {}]   ;;  %s2172_s4 = inlined_call_operand.vmem [shape: bf16[2,32,64], index: 4, kind: input, shape index: {}]   ;;  %s2173_s5 = inlined_call_operand.vmem [shape: f32[2,1,64], index: 5, kind: input, shape index: {}]   ;;  %s2174_s6 = inlined_call_operand.vmem [shape: bf16[2,64,32], index: 6, kind: input, shape index: {}]   ;;  %s2175_s7 = inlined_call_operand.vmem [shape: f32[2,3,32], index: 7, kind: input, shape index: {}]   ;;  %s2176_s8 = inlined_call_operand.vmem [shape: f32[16,32], index: 8, kind: output, shape index: {0}]   ;;  %s2177_s9 = inlined_call_operand.vmem [shape: f32[2,16,64], index: 9, kind: output, shape index: {1}]  }
   0x1 LB: > { %s1872_s10 = sadd.s32 4294967295, %s1800_s30   ;;  %p1558_p0 = scmp.ge.s32.totalorder %s1800_s30, 1  ;;  %s1800_s30 = sphi %s1866_s30, %s20_s30  }
   0x2   : > { %p331_p1 = scmp.lt.s32.totalorder %s1800_s30, 3 }
   0x4   : > { %p332_p2 = pnand %p1558_p0, %p331_p1 }
   0x5   : > { %p388_p3 = scmp.lt.s32.totalorder (!%p332_p2), %s1872_s10, 1  ;;  %p1569_p4 = scmp.ne.s32.totalorder (!%p332_p2), %s1872_s10, 0 }
   0x6   : > { %335 = sbr.rel (%p332_p2) target bundleno = 2598 (0xa26), region = 52 }
   0xb   : > { %s1878_s11 = scalar_select %p388_p3, %s1872_s10, 1 }
   0xd   : > { %s1595_s12 = sshll.u32 %s1878_s11, 4  ;;  %s1561_s13 = sshll.u32 %s1878_s11, 3 }
   0xe   : > { %s392_s16 = scalar_lea.vmem %s2170_s2, %s1595_s12  ;;  %s1888_s19 = scalar_lea.vmem %s2171_s3, %s1561_s13 }
   0xf   : > { %s1893_s22 = scalar_lea.vmem %s2172_s4, %s1595_s12  ;;  %s404_s25 = scalar_lea.vmem %s2173_s5, %s1878_s11 }
  0x10   : > { %s1597_s26 = sshll.u32 %s1878_s11, 5  ;;  %s1566_s27 = sshll.u32 %s1878_s11, 2 }
  0x11   : > { %s1904_s14 = scalar_lea.vmem %s2174_s6, %s1597_s26  ;;  %s1909_s13 = scalar_lea.vmem %s2175_s7, %s1566_s27 }
  0x12   : > { %s1914_s21 = scalar_lea.vmem %s2177_s9, %s1595_s12  ;;  %423 = sbr.rel (%p1569_p4) target bundleno = 25 (0x19), region = 56 }
  0x17   : > { %v424_v0 = vld [vmem:[%s2168_s0] sm:$0xff]  ;;  %vm426_vm0 = vcmask 261120   ;;  %v425_v1 = vld [vmem:[%s2168_s0 + $0x8] sm:$0xff] }
  0x18   : > { %427 = vst.msk [vmem:[#allocation2] sm:$0xff] %vm426_vm0, %v424_v0  ;;  %428 = vst.msk [vmem:[#allocation2 + $0x8] sm:$0xff] %vm426_vm0, %v425_v1 }
  0x19 PF: > { %v1923_v2 = vld [vmem:[%s392_s16 + $0x8] sm:$0xff]   ;;  %s1802_s27 = smov 96   ;;  %v1927_v3 = vld [vmem:[%s392_s16] sm:$0xff]   ;;  %v1803_v4 = vmov 0.0   ;;  %vm1804_vm1 = vmmov 0   ;;  %vm455_vm2 = vcmask 261120   ;;  %v439_v10 = vlaneseq }
  0x1a   : > { %502 = vrot.lane.b32.xlu0 %v1923_v2, %s1802_s27  ;;  %1632 = vmatprep.subr.bf16.mxu1 %v1803_v4  ;;  %v1959_v13 = vld [vmem:[%s1888_s19] sm:$0x3f]  ;;  %vm566_vm3 = vcmask 64512   ;;  %s1805_s12 = smov 112   ;;  %s1806_s16 = smov 120   ;;  %vm618_vm4 = vcmask 130048  }
  0x1b   : > { %1633 = vmatpush3.bf16.msra.mxu1 %v1923_v2  ;;  %1636 = vmatprep.mubr.msk.bf16.mxu1 %vm1804_vm1, %v1803_v4  ;;  %v1955_v11 = vshrl.u32 %v439_v10, 7  ;;  %s1807_s19 = smov 104   ;;  %v431_v42 = vld [vmem:[%s2169_s1] sm:$0xff]  ;;  %v432_v47 = vld [vmem:[%s2169_s1 + $0x8] sm:$0xff]  ;;  %s1808_s20 = smov 32   ;;  %vm840_vm5 = vcmask 130112  }
  0x1c   : > { %1634 = vmatprep.subr.bf16.mxu1 %v1803_v4  ;;  %1648 = vmatprep.subr.bf16.mxu0 %v1803_v4  ;;  %s1809_s23 = smov 88   ;;  %s1810_s24 = smov 80   ;;  %vm987_vm6 = vcmask 195712   ;;  %vm1134_vm7 = vcmask 261312   ;;  %vm1343_vm8 = vcmask 523264   ;;  %vm781_vm9 = vcmask 261248  }
  0x1d   : > { %1650 = vmatprep.mubr.msk.bf16.mxu0 %vm1804_vm1, %v1803_v4  ;;  %v441_v12 = vsub.s32 0, %v1955_v11  ;;  %v549_v22 = vsub.s32 1, %v1955_v11  ;;  %s1811_s26 = smov 72   ;;  %s1812_s28 = smov 8   ;;  %vm928_vm10 = vcmask 392448   ;;  %vm1075_vm11 = vcmask 523648  }
  0x1e   : > { %500 = vrot.lane.b32.xlu0 %v1927_v3, %s1802_s27  ;;  %s1815_s11 = smov 48   ;;  %p1592_p5 = scmp.ne.s32.totalorder %s1872_s10, 1 }
  0x1f   : > { %v1930_v5 = vld [vmem:[#allocation2] sm:$0xff]  ;;  %v1935_v6 = vld [vmem:[#allocation2 + $0x8] sm:$0xff]  ;;  %1635 = vmatpush3.bf16.msra.mxu1 %v1927_v3  ;;  %v442_v14 = vrot.slane %v1959_v13, %v441_v12  ;;  %v550_v24 = vrot.slane %v1959_v13, %v549_v22 }
  0x20   : > { %v438_v7 = vpack.c.bf16 %v1935_v6, %v1930_v5  ;;  %1640 = vmatprep.subr.bf16.mxu1 %v1803_v4 }
  0x22   : > { %1637 = vmatmul.mubr.msk.bf16.vlgmr.msra.gmra.mxu1 %vm455_vm2, %v438_v7 }
  0x23   : > { %1644 = vmatprep.mubr.msk.bf16.mxu1 %vm1804_vm1, %v1803_v4 }
  0x8c   : > { %v503_v8 = vpop.permute.xlu0 %502 }
  0x8d   : > { %1641 = vmatpush3.bf16.msra.mxu1 %v503_v8 }
  0x8e   : > { %1642 = vmatprep.subr.bf16.mxu1 %v1803_v4 }
  0x90   : > { %v501_v9 = vpop.permute.xlu0 %500 }
  0x91   : > { %1643 = vmatpush3.bf16.msra.mxu1 %v501_v9 }
  0x92   : > { %1654 = vmatprep.subr.bf16.mxu1 %v1803_v4 }
  0x94   : > { %1645 = vmatmul.mubr.msk.bf16.vlgmr.msra.gmra.mxu1 %vm455_vm2, %v438_v7 }
  0x95   : > { %1656 = vmatprep.mubr.msk.bf16.mxu1 %vm1804_vm1, %v1803_v4 }
  0xe2   : > { %v493_v15 = vpop.f32.mrf.mxu1 }
  0xe3   : > { %v494_v17 = vadd.f32 %v493_v15, %v442_v14 }
  0xe4   : > { %v1638_v16 = vpop.f32.mrf.mxu1 }
  0xe6   : > { %v496_v18 = vpop.f32.mrf.mxu1 }
  0xe7   : > { %v497_v19 = vadd.f32 %v496_v18, %v442_v14 }
  0xe8   : > { %v1639_v20 = vpop.f32.mrf.mxu1 }
  0xe9   : > { %v563_v21 = vpack.c.bf16 %v497_v19, %v494_v17 }
 0x154   : > { %v1965_v23 = vpop.f32.mrf.mxu1 }
 0x155   : > { %v551_v27 = vadd.f32 %v550_v24, %v1965_v23 }
 0x156   : > { %v1646_v25 = vpop.f32.mrf.mxu1 }
 0x158   : > { %v1970_v26 = vpop.f32.mrf.mxu1 }
 0x159   : > { %v552_v28 = vadd.f32 %v550_v24, %v1970_v26 }
 0x15a   : > { %v1647_v29 = vpop.f32.mrf.mxu1 }
 0x15b   : > { %v564_v30 = vpack.c.bf16 %v552_v28, %v551_v27 }
 0x15d   : > { %845 = vrot.lane.b32.xlu0 %v564_v30, %s1805_s12  ;;  %698 = vrot.lane.b32.xlu1 %v564_v30, %s1806_s16  ;;  %v571_v31 = vsel %vm566_vm3, %v564_v30, 0 }
 0x15e   : > { %1649 = vmatpush3.bf16.xpose.msra.mxu0 %v571_v31 }
 0x15f   : > { %1660 = vmatprep.subr.bf16.mxu0 %v1803_v4 }
 0x161   : > { %992 = vrot.lane.b32.xlu0 %v564_v30, %s1807_s19  ;;  %695 = vrot.lane.b32.xlu1 %v563_v21, %s1806_s16  ;;  %v555_v30 = vsub.s32 2, %v1955_v11 }
 0x163   : > { %v556_v31 = vrot.slane %v1959_v13, %v555_v30 }
 0x165   : > { %843 = vrot.lane.b32.xlu1 %v563_v21, %s1805_s12  ;;  %1651 = vmatmul.mubr.msk.bf16.vlgmr.msra.gmra.mxu0 %vm566_vm3, %v563_v21  ;;  %s1814_s12 = smov 24  }
 0x166   : > { %1662 = vmatprep.mubr.msk.bf16.mxu0 %vm1804_vm1, %v1803_v4 }
 0x169   : > { %990 = vrot.lane.b32.xlu1 %v563_v21, %s1807_s19 }
 0x1cf   : > { %v699_v32 = vpop.permute.xlu1 %698  ;;  %v846_v34 = vpop.permute.xlu0 %845 }
 0x1d0   : > { %v704_v33 = vsel %vm566_vm3, %v699_v32, 0  ;;  %v851_v36 = vsel %vm566_vm3, %v846_v34, 0 }
 0x1d1   : > { %1661 = vmatpush3.bf16.xpose.msra.mxu0 %v704_v33 }
 0x1d2   : > { %1672 = vmatprep.subr.bf16.mxu0 %v1803_v4 }
 0x1d3   : > { %v696_v35 = vpop.permute.xlu1 %695  ;;  %v993_v37 = vpop.permute.xlu0 %992 }
 0x1d4   : > { %v998_v39 = vsel %vm566_vm3, %v993_v37, 0 }
 0x1d7   : > { %v844_v38 = vpop.permute.xlu1 %843 }
 0x1d8   : > { %1663 = vmatmul.mubr.msk.bf16.vlgmr.msra.gmra.mxu0 %vm566_vm3, %v696_v35 }
 0x1d9   : > { %1673 = vmatpush3.bf16.xpose.msra.mxu0 %v851_v36  ;;  %1674 = vmatprep.mubr.msk.bf16.mxu0 %vm1804_vm1, %v1803_v4 }
 0x1da   : > { %1684 = vmatprep.subr.bf16.mxu0 %v1803_v4 }
 0x1db   : > { %v991_v40 = vpop.permute.xlu1 %990 }
 0x1e0   : > { %1675 = vmatmul.mubr.msk.bf16.vlgmr.msra.gmra.mxu0 %vm566_vm3, %v844_v38 }
 0x1e1   : > { %1685 = vmatpush3.bf16.xpose.msra.mxu0 %v998_v39  ;;  %1686 = vmatprep.mubr.msk.bf16.mxu0 %vm1804_vm1, %v1803_v4 }
 0x1e2   : > { %1696 = vmatprep.subr.bf16.mxu0 %v1803_v4 }
 0x1e8   : > { %1687 = vmatmul.mubr.msk.bf16.vlgmr.msra.gmra.mxu0 %vm566_vm3, %v991_v40 }
 0x1e9   : > { %1700 = vmatprep.mubr.msk.bf16.mxu0 %vm1804_vm1, %v1803_v4 }
 0x225   : > { %v607_v41 = vpop.f32.mrf.mxu0 }
 0x226   : > { %v614_v43 = vmul.f32 0.35355338, %v607_v41 }
 0x227   : > { %v1652_v44 = vpop.f32.mrf.mxu0 }
 0x228   : > { %v1997_v45 = vadd.f32 %v614_v43, %v431_v42 }
 0x229   : > { %v610_v46 = vpop.f32.mrf.mxu0 }
 0x22a   : > { %v615_v48 = vmul.f32 0.35355338, %v610_v46  ;;  %v619_v49 = vsel %vm618_vm4, %v1997_v45, -inf }
 0x22b   : > { %620 = vmax.xlane.f32.xlu0 %v619_v49  ;;  %v1653_v50 = vpop.f32.mrf.mxu0 }
 0x22c   : > { %v2004_v51 = vadd.f32 %v615_v48, %v432_v47 }
 0x22e   : > { %v622_v52 = vsel %vm618_vm4, %v2004_v51, -inf }
 0x22f   : > { %623 = vmax.xlane.f32.xlu1 %v622_v52 }
 0x298   : > { %v740_v53 = vpop.f32.mrf.mxu0 }
 0x299   : > { %v747_v54 = vmul.f32 0.35355338, %v740_v53 }
 0x29a   : > { %v1664_v55 = vpop.f32.mrf.mxu0 }
 0x29b   : > { %v2008_v56 = vadd.f32 %v747_v54, %v431_v42 }
 0x29c   : > { %v743_v57 = vpop.f32.mrf.mxu0 }
 0x29d   : > { %v748_v58 = vmul.f32 0.35355338, %v743_v57  ;;  %v751_v59 = vsel %vm618_vm4, %v2008_v56, -inf }
 0x29e   : > { %752 = vmax.xlane.f32.xlu0 %v751_v59  ;;  %v1665_v60 = vpop.f32.mrf.mxu0 }
 0x29f   : > { %v2012_v61 = vadd.f32 %v748_v58, %v432_v47 }
 0x2a0   : > { %v887_v62 = vpop.f32.mrf.mxu0 }
 0x2a1   : > { %v894_v63 = vmul.f32 0.35355338, %v887_v62  ;;  %v754_v0 = vsel %vm618_vm4, %v2012_v61, -inf }
 0x2a2   : > { %755 = vmax.xlane.f32.xlu0 %v754_v0  ;;  %v1676_v1 = vpop.f32.mrf.mxu0 }
 0x2a3   : > { %v896_v7 = vadd.f32 %v894_v63, %v431_v42 }
 0x2a4   : > { %v890_v8 = vpop.f32.mrf.mxu0 }
 0x2a5   : > { %v895_v9 = vmul.f32 0.35355338, %v890_v8  ;;  %v898_v10 = vsel %vm618_vm4, %v896_v7, -inf }
 0x2a6   : > { %899 = vmax.xlane.f32.xlu1 %v898_v10  ;;  %v1677_v14 = vpop.f32.mrf.mxu0 }
 0x2a7   : > { %v897_v15 = vadd.f32 %v895_v9, %v432_v47 }
 0x2a8   : > { %v1034_v16 = vpop.f32.mrf.mxu0 }
 0x2a9   : > { %v1041_v17 = vmul.f32 0.35355338, %v1034_v16  ;;  %v901_v18 = vsel %vm618_vm4, %v897_v15, -inf }
 0x2aa   : > { %902 = vmax.xlane.f32.xlu0 %v901_v18  ;;  %v1688_v19 = vpop.f32.mrf.mxu0 }
 0x2ab   : > { %v1043_v20 = vadd.f32 %v1041_v17, %v431_v42 }
 0x2ac   : > { %v1037_v21 = vpop.f32.mrf.mxu0 }
 0x2ad   : > { %v1042_v24 = vmul.f32 0.35355338, %v1037_v21  ;;  %v1045_v25 = vsel %vm618_vm4, %v1043_v20, -inf }
 0x2ae   : > { %1046 = vmax.xlane.f32.xlu1 %v1045_v25  ;;  %v1689_v27 = vpop.f32.mrf.mxu0 }
 0x2af   : > { %v1044_v28 = vadd.f32 %v1042_v24, %v432_v47 }
 0x2b1   : > { %v1048_v29 = vsel %vm618_vm4, %v1044_v28, -inf }
 0x2b2   : > { %1049 = vmax.xlane.f32.xlu0 %v1048_v29 }
 0x2b4   : > { %v621_v43 = vpop.xlane.xlu0 %620 }
 0x2b5   : > { %v625_v44 = vsub.f32 %v1997_v45, %v621_v43 }
 0x2b7   : > { %v627_v47 = vmul.f32 1.442695, %v625_v44 }
 0x2b8   : > { %v624_v32 = vpop.xlane.xlu1 %623 }
 0x2bf   : > { %558 = vrot.lane.b32.xlu1 %v556_v31, %s1808_s20 }
 0x327   : > { %v753_v46 = vpop.xlane.xlu0 %752 }
 0x328   : > { %v757_v48 = vsub.f32 %v2008_v56, %v753_v46 }
 0x32a   : > { %v759_v50 = vmul.f32 1.442695, %v757_v48 }
 0x32b   : > { %v756_v49 = vpop.xlane.xlu0 %755 }
 0x32c   : > { %v758_v52 = vsub.f32 %v2012_v61, %v756_v49 }
 0x32e   : > { %v761_v54 = vmul.f32 1.442695, %v758_v52 }
 0x32f   : > { %v900_v33 = vpop.xlane.xlu1 %899 }
 0x330   : > { %v904_v34 = vsub.f32 %v896_v7, %v900_v33 }
 0x332   : > { %v906_v35 = vmul.f32 1.442695, %v904_v34 }
 0x333   : > { %v903_v53 = vpop.xlane.xlu0 %902 }
 0x334   : > { %1754 = vpow2.f32 %v906_v35  ;;  %v905_v55 = vsub.f32 %v897_v15, %v903_v53 }
 0x335   : > { %1756 = vpow2.f32 %v627_v47 }
 0x336   : > { %v908_v45 = vmul.f32 1.442695, %v905_v55 }
 0x337   : > { %v1047_v36 = vpop.xlane.xlu1 %1046 }
 0x338   : > { %v1051_v57 = vsub.f32 %v1043_v20, %v1047_v36 }
 0x33a   : > { %v1053_v59 = vmul.f32 1.442695, %v1051_v57 }
 0x33b   : > { %v559_v37 = vpop.permute.xlu1 %558 }
 0x33c   : > { %v561_v38 = vadd.f32 %v559_v37, %v1965_v23  ;;  %v562_v39 = vadd.f32 %v559_v37, %v1970_v26  ;;  %v626_v23 = vsub.f32 %v2004_v51, %v624_v32  ;;  %v1050_v51 = vpop.xlane.xlu0 %1049 }
 0x33d   : > { %v1052_v60 = vsub.f32 %v1044_v28, %v1050_v51 }
 0x33e   : > { %v565_v40 = vpack.c.bf16 %v562_v39, %v561_v38  ;;  %v629_v26 = vmul.f32 1.442695, %v626_v23 }
 0x33f   : > { %v1055_v63 = vmul.f32 1.442695, %v1052_v60 }
 0x340   : > { %645 = vrot.lane.b32.xlu0 %v565_v40, %s1802_s27  ;;  %1758 = vpow2.f32 %v629_v26  ;;  %s1813_s27 = smov 16  }
 0x341   : > { %v2028_v41 = vpop.eup %1754  ;;  %1760 = vpow2.f32 %v759_v50 }
 0x342   : > { %v910_v42 = vsel %vm618_vm4, %v2028_v41, 0.0  ;;  %1762 = vpow2.f32 %v761_v54  ;;  %v1757_v58 = vpop.eup %1756 }
 0x343   : > { %911 = vadd.xlane.f32.xlu1 %v910_v42  ;;  %1764 = vpow2.f32 %v908_v45  ;;  %v631_v56 = vsel %vm618_vm4, %v1757_v58, 0.0 }
 0x344   : > { %785 = vrot.lane.b32.xlu0 %v565_v40, %s1809_s23  ;;  %1766 = vpow2.f32 %v1053_v59 }
 0x345   : > { %1768 = vpow2.f32 %v1055_v63 }
 0x34d   : > { %v1759_v62 = vpop.eup %1758 }
 0x34e   : > { %v634_v61 = vsel %vm618_vm4, %v1759_v62, 0.0  ;;  %v1761_v0 = vpop.eup %1760 }
 0x34f   : > { %v763_v1 = vsel %vm618_vm4, %v1761_v0, 0.0  ;;  %v1763_v7 = vpop.eup %1762 }
 0x350   : > { %v766_v8 = vsel %vm618_vm4, %v1763_v7, 0.0  ;;  %v1765_v9 = vpop.eup %1764 }
 0x351   : > { %v913_v10 = vsel %vm618_vm4, %v1765_v9, 0.0  ;;  %v2041_v14 = vpop.eup %1766 }
 0x352   : > { %v1057_v15 = vsel %vm618_vm4, %v2041_v14, 0.0  ;;  %v1769_v16 = vpop.eup %1768 }
 0x353   : > { %v1060_v17 = vsel %vm618_vm4, %v1769_v16, 0.0 }
 0x354   : > { %932 = vrot.lane.b32.xlu1 %v565_v40, %s1810_s24 }
 0x363   : > { %632 = vadd.xlane.f32.xlu0 %v631_v56 }
 0x367   : > { %635 = vadd.xlane.f32.xlu0 %v634_v61 }
 0x36b   : > { %764 = vadd.xlane.f32.xlu0 %v763_v1 }
 0x36f   : > { %767 = vadd.xlane.f32.xlu0 %v766_v8 }
 0x373   : > { %914 = vadd.xlane.f32.xlu0 %v913_v10 }
 0x377   : > { %1058 = vadd.xlane.f32.xlu0 %v1057_v15 }
 0x37b   : > { %1061 = vadd.xlane.f32.xlu0 %v1060_v17 }
 0x391   : > { %1079 = vrot.lane.b32.xlu0 %v565_v40, %s1811_s26 }
 0x3b2   : > { %v646_v18 = vpop.permute.xlu0 %645 }
 0x3b3   : > { %1655 = vmatpush3.bf16.msra.mxu1 %v646_v18 }
 0x3b4   : > { %1666 = vmatprep.subr.bf16.mxu1 %v1803_v4 }
 0x3b6   : > { %v786_v19 = vpop.permute.xlu0 %785 }
 0x3cc   : > { %v912_v29 = vpop.xlane.xlu1 %911 }
 0x3d0   : > { %v933_v44 = vpop.permute.xlu1 %932 }
 0x3ec   : > { %v633_v20 = vpop.xlane.xlu0 %632 }
 0x3ed   : > { %1770 = vrcp.f32 %v633_v20 }
 0x3f0   : > { %v636_v21 = vpop.xlane.xlu0 %635 }
 0x3f1   : > { %1772 = vrcp.f32 %v636_v21  ;;  %v1142_v21 = vsub.s32 3, %v1955_v11 }
 0x3f4   : > { %v765_v24 = vpop.xlane.xlu0 %764 }
 0x3f5   : > { %1774 = vrcp.f32 %v765_v24  ;;  %v1143_v24 = vrot.slane %v1959_v13, %v1142_v21 }
 0x3f8   : > { %v768_v25 = vpop.xlane.xlu0 %767 }
 0x3f9   : > { %1776 = vrcp.f32 %v768_v25 }
 0x3fa   : > { %v1771_v27 = vpop.eup %1770 }
 0x3fb   : > { %v639_v28 = vmul.f32 %v1771_v27, %v1757_v58 }
 0x3fc   : > { %v915_v31 = vpop.xlane.xlu0 %914 }
 0x3fd   : > { %1778 = vrcp.f32 %v915_v31  ;;  %641 = vst.msk [vmem:[%s1914_s21] sm:$0xff] %vm618_vm4, %v639_v28 }
 0x3fe   : > { %v1773_v32 = vpop.eup %1772  ;;  %1780 = vrcp.f32 %v912_v29 }
 0x3ff   : > { %v640_v33 = vmul.f32 %v1773_v32, %v1759_v62 }
 0x400   : > { %v1059_v34 = vpop.xlane.xlu0 %1058 }
 0x401   : > { %v643_v35 = vpack.c.bf16 %v640_v33, %v639_v28  ;;  %642 = vst.msk [vmem:[%s1914_s21 + $0x8] sm:$0xff] %vm618_vm4, %v640_v33 }
 0x402   : > { %v1775_v36 = vpop.eup %1774 }
 0x403   : > { %1657 = vmatmul.mubr.msk.bf16.vlgmr.msra.gmra.mxu1 %vm618_vm4, %v643_v35  ;;  %v2055_v39 = vmul.f32 %v1775_v36, %v1761_v0 }
 0x404   : > { %1667 = vmatpush3.bf16.msra.mxu1 %v786_v19  ;;  %v1062_v37 = vpop.xlane.xlu0 %1061  ;;  %1668 = vmatprep.mubr.msk.bf16.mxu1 %vm1804_vm1, %v1803_v4 }
 0x405   : > { %1782 = vrcp.f32 %v1062_v37  ;;  %1678 = vmatprep.subr.bf16.mxu1 %v1803_v4 }
 0x406   : > { %v1777_v38 = vpop.eup %1776  ;;  %1784 = vrcp.f32 %v1059_v34 }
 0x407   : > { %v2057_v40 = vmul.f32 %v1777_v38, %v1763_v7 }
 0x408   : > { %v1080_v49 = vpop.permute.xlu0 %1079 }
 0x409   : > { %v784_v42 = vpack.c.bf16 %v2057_v40, %v2055_v39 }
 0x40a   : > { %v1779_v43 = vpop.eup %1778 }
 0x40b   : > { %1669 = vmatmul.mubr.msk.bf16.vlgmr.msra.gmra.mxu1 %vm618_vm4, %v784_v42  ;;  %v1781_v46 = vpop.eup %1780  ;;  %v2065_v47 = vmul.f32 %v1779_v43, %v1765_v9 }
 0x40c   : > { %1679 = vmatpush3.bf16.msra.mxu1 %v933_v44  ;;  %1680 = vmatprep.mubr.msk.bf16.mxu1 %vm1804_vm1, %v1803_v4  ;;  %v2068_v23 = vmul.f32 %v1781_v46, %v2028_v41 }
 0x40d   : > { %1690 = vmatprep.subr.bf16.mxu1 %v1803_v4 }
 0x40e   : > { %v931_v26 = vpack.c.bf16 %v2065_v47, %v2068_v23 }
 0x412   : > { %v1783_v48 = vpop.eup %1782 }
 0x413   : > { %1681 = vmatmul.mubr.msk.bf16.vlgmr.msra.gmra.mxu1 %vm618_vm4, %v931_v26  ;;  %v1785_v50 = vpop.eup %1784  ;;  %v2075_v52 = vmul.f32 %v1783_v48, %v1769_v16 }
 0x414   : > { %1691 = vmatpush3.bf16.msra.mxu1 %v1080_v49  ;;  %1692 = vmatprep.mubr.msk.bf16.mxu1 %vm1804_vm1, %v1803_v4  ;;  %v2079_v53 = vmul.f32 %v1785_v50, %v2041_v14  ;;  %v1749_v50 = vld [vmem:[%s1893_s22] sm:$0xff]  }
 0x415   : > { %1704 = vmatprep.subr.bf16.mxu1 %v1803_v4 }
 0x416   : > { %v1078_v41 = vpack.c.bf16 %v2075_v52, %v2079_v53 }
 0x41b   : > { %1693 = vmatmul.mubr.msk.bf16.vlgmr.msra.gmra.mxu1 %vm618_vm4, %v1078_v41  ;;  %v1750_v41 = vld [vmem:[%s1904_s14 + $0x18] sm:$0xff]  }
 0x41c   : > { %1708 = vmatprep.mubr.msk.bf16.mxu1 %vm1804_vm1, %v1803_v4 }
 0x4c3   : > { %v685_v54 = vpop.f32.mrf.mxu1 }
 0x4c4   : > { %692 = vst.msk [vmem:[#allocation3] sm:$0xff] %vm566_vm3, %v685_v54 }
 0x4c5   : > { %v1658_v55 = vpop.f32.mrf.mxu1 }
 0x4c7   : > { %v688_v45 = vpop.f32.mrf.mxu1 }
 0x4c8   : > { %693 = vst.msk [vmem:[#allocation3 + $0x8] sm:$0xff] %vm566_vm3, %v688_v45 }
 0x4c9   : > { %v1659_v57 = vpop.f32.mrf.mxu1 }
 0x4cb   : > { %v825_v58 = vpop.f32.mrf.mxu1 }
 0x4cc   : > { %834 = vrot.lane.b32.xlu0 %v825_v58, %s1812_s28 }
 0x4cd   : > { %v1670_v51 = vpop.f32.mrf.mxu1 }
 0x4cf   : > { %v828_v59 = vpop.f32.mrf.mxu1 }
 0x4d0   : > { %836 = vrot.lane.b32.xlu0 %v828_v59, %s1812_s28  ;;  %v1225_v59 = vsub.s32 4, %v1955_v11 }
 0x4d1   : > { %v1671_v60 = vpop.f32.mrf.mxu1 }
 0x4d3   : > { %v972_v56 = vpop.f32.mrf.mxu1 }
 0x4d4   : > { %981 = vrot.lane.b32.xlu0 %v972_v56, %s1813_s27 }
 0x4d5   : > { %v1682_v62 = vpop.f32.mrf.mxu1 }
 0x4d6   : > { %v1226_v62 = vrot.slane %v1959_v13, %v1225_v59 }
 0x4d7   : > { %v975_v63 = vpop.f32.mrf.mxu1 }
 0x4d8   : > { %983 = vrot.lane.b32.xlu1 %v975_v63, %s1813_s27  ;;  %v1231_v63 = vsub.s32 5, %v1955_v11 }
 0x4d9   : > { %v1683_v61 = vpop.f32.mrf.mxu1 }
 0x4db   : > { %v1119_v0 = vpop.f32.mrf.mxu1 }
 0x4dc   : > { %1128 = vrot.lane.b32.xlu0 %v1119_v0, %s1814_s12 }
 0x4dd   : > { %v1694_v1 = vpop.f32.mrf.mxu1 }
 0x4df   : > { %v1122_v7 = vpop.f32.mrf.mxu1 }
 0x4e0   : > { %1130 = vrot.lane.b32.xlu1 %v1122_v7, %s1814_s12  ;;  %1146 = vrot.lane.b32.xlu0 %v1923_v2, %s1808_s20  ;;  %v1232_v7 = vrot.slane %v1959_v13, %v1231_v63  ;;  %v1583_v13 = vld [vmem:[%s404_s25] ss:$0 sm:$0xff] }
 0x4e1   : > { %v1695_v8 = vpop.f32.mrf.mxu1 }
 0x4e4   : > { %1144 = vrot.lane.b32.xlu1 %v1927_v3, %s1808_s20 }
 0x53e   : > { %v835_v9 = vpop.permute.xlu0 %834 }
 0x53f   : > { %841 = vst.msk [vmem:[#allocation3] sm:$0xff] %vm840_vm5, %v835_v9 }
 0x542   : > { %v837_v10 = vpop.permute.xlu0 %836 }
 0x543   : > { %842 = vst.msk [vmem:[#allocation3 + $0x8] sm:$0xff] %vm840_vm5, %v837_v10 }
 0x546   : > { %v982_v14 = vpop.permute.xlu0 %981 }
 0x547   : > { %988 = vst.msk [vmem:[#allocation3] sm:$0xff] %vm987_vm6, %v982_v14 }
 0x54a   : > { %v984_v15 = vpop.permute.xlu1 %983 }
 0x54b   : > { %989 = vst.msk [vmem:[#allocation3 + $0x8] sm:$0xff] %vm987_vm6, %v984_v15  ;;  %v1751_v15 = vld [vmem:[%s1904_s14 + $0x10] sm:$0xff]  }
 0x54e   : > { %v1129_v16 = vpop.permute.xlu0 %1128 }
 0x54f   : > { %1135 = vst.msk [vmem:[#allocation3] sm:$0xff] %vm1134_vm7, %v1129_v16  ;;  %v1752_v16 = vld [vmem:[%s1904_s14 + $0x8] sm:$0xff]  }
 0x552   : > { %v1131_v17 = vpop.permute.xlu1 %1130  ;;  %v1147_v18 = vpop.permute.xlu0 %1146 }
 0x553   : > { %1136 = vst.msk [vmem:[#allocation3 + $0x8] sm:$0xff] %vm1134_vm7, %v1131_v17  ;;  %1697 = vmatpush3.bf16.msra.mxu0 %v1147_v18  ;;  %v1753_v17 = vld [vmem:[%s1904_s14] sm:$0xff]  }
 0x554   : > { %1698 = vmatprep.subr.bf16.mxu0 %v1803_v4 }
 0x556   : > { %v1145_v2 = vpop.permute.xlu1 %1144  ;;  %v1137_v3 = vld [vmem:[#allocation3] sm:$0xff] }
 0x557   : > { %1699 = vmatpush3.bf16.msra.mxu0 %v1145_v2 }
 0x558   : > { %1712 = vmatprep.subr.bf16.mxu0 %v1803_v4 }
 0x55a   : > { %v1138_v19 = vld [vmem:[#allocation3 + $0x8] sm:$0xff] }
 0x55b   : > { %v1139_v20 = vpack.c.bf16 %v1138_v19, %v1137_v3 }
 0x55d   : > { %1701 = vmatmul.mubr.msk.bf16.vlgmr.msra.gmra.mxu0 %vm455_vm2, %v1139_v20 }
 0x55e   : > { %1720 = vmatprep.mubr.msk.bf16.mxu0 %vm1804_vm1, %v1803_v4  ;;  %1713 = vmatpush3.bf16.msra.mxu0 %v1750_v41 }
 0x55f   : > { %1714 = vmatprep.subr.bf16.mxu0 %v1803_v4 }
 0x562   : > { %1715 = vmatpush3.bf16.msra.mxu0 %v1751_v15 }
 0x563   : > { %1716 = vmatprep.subr.bf16.mxu0 %v1803_v4 }
 0x566   : > { %1717 = vmatpush3.bf16.msra.mxu0 %v1752_v16 }
 0x567   : > { %1718 = vmatprep.subr.bf16.mxu0 %v1803_v4 }
 0x56a   : > { %1719 = vmatpush3.bf16.msra.mxu0 %v1753_v17 }
 0x61d   : > { %v1187_v25 = vpop.f32.mrf.mxu0 }
 0x61e   : > { %v1188_v27 = vadd.f32 %v1187_v25, %v1143_v24 }
 0x61f   : > { %v1702_v28 = vpop.f32.mrf.mxu0 }
 0x620   : > { %v1194_v29 = vadd.f32 %v1188_v27, %v1930_v5  ;;  %v1248_v28 = vld [vmem:[%s1909_s13] sm:$0x7] }
 0x621   : > { %v1190_v31 = vpop.f32.mrf.mxu0 }
 0x622   : > { %v1191_v32 = vadd.f32 %v1190_v31, %v1143_v24  ;;  %v1196_v33 = vsel %vm455_vm2, %v1194_v29, 0.0 }
 0x623   : > { %1197 = vadd.xlane.f32.xlu0 %v1196_v33  ;;  %v1703_v34 = vpop.f32.mrf.mxu0 }
 0x624   : > { %v1195_v35 = vadd.f32 %v1191_v32, %v1935_v6  ;;  %v1748_v6 = vld [vmem:[%s1893_s22 + $0x8] sm:$0xff]  }
 0x625   : > { %1705 = vmatpush3.bf16.msra.mxu1 %v1748_v6 }
 0x626   : > { %v1199_v36 = vsel %vm455_vm2, %v1195_v35, 0.0  ;;  %1706 = vmatprep.subr.bf16.mxu1 %v1803_v4  ;;  %v1318_v4 = vrot.slane %v1248_v28, %v441_v12 }
 0x627   : > { %1200 = vadd.xlane.f32.xlu1 %v1199_v36 }
 0x629   : > { %1707 = vmatpush3.bf16.msra.mxu1 %v1749_v50 }
 0x6ac   : > { %v1198_v37 = vpop.xlane.xlu0 %1197 }
 0x6ad   : > { %v1203_v38 = vmul.f32 0.03125, %v1198_v37 }
 0x6af   : > { %v1205_v42 = vsub.f32 %v1194_v29, %v1203_v38 }
 0x6b0   : > { %v1201_v43 = vpop.xlane.xlu1 %1200 }
 0x6b1   : > { %v1204_v44 = vmul.f32 0.03125, %v1201_v43  ;;  %v1207_v5 = vmul.f32 %v1205_v42, %v1205_v42 }
 0x6b3   : > { %v1206_v46 = vsub.f32 %v1195_v35, %v1204_v44  ;;  %v1209_v26 = vsel %vm455_vm2, %v1207_v5, 0.0 }
 0x6b4   : > { %1210 = vadd.xlane.f32.xlu0 %v1209_v26 }
 0x6b5   : > { %v1208_v48 = vmul.f32 %v1206_v46, %v1206_v46 }
 0x6b7   : > { %v1212_v49 = vsel %vm455_vm2, %v1208_v48, 0.0 }
 0x6b8   : > { %1213 = vadd.xlane.f32.xlu0 %v1212_v49 }
 0x73d   : > { %v1211_v54 = vpop.xlane.xlu0 %1210 }
 0x73e   : > { %v1215_v55 = vmul.f32 0.03125, %v1211_v54 }
 0x740   : > { %v1217_v45 = vadd.f32 1e-05, %v1215_v55 }
 0x741   : > { %v1214_v57 = vpop.xlane.xlu0 %1213 }
 0x742   : > { %1786 = vrsqrt.f32 %v1217_v45  ;;  %v1216_v58 = vmul.f32 0.03125, %v1214_v57 }
 0x744   : > { %v1218_v51 = vadd.f32 1e-05, %v1216_v58 }
 0x746   : > { %1788 = vrsqrt.f32 %v1218_v51  ;;  %v1419_v51 = vrot.slane %v1248_v28, %v549_v22 }
 0x74f   : > { %v1787_v60 = vpop.eup %1786 }
 0x750   : > { %v1221_v56 = vmul.f32 %v1787_v60, %v1205_v42  ;;  %v1425_v60 = vrot.slane %v1248_v28, %v555_v30 }
 0x752   : > { %v1227_v1 = vmul.f32 %v1226_v62, %v1221_v56 }
 0x753   : > { %v1789_v61 = vpop.eup %1788 }
 0x754   : > { %v1222_v0 = vmul.f32 %v1789_v61, %v1206_v46  ;;  %v1233_v9 = vadd.f32 %v1232_v7, %v1227_v1 }
 0x756   : > { %v1228_v8 = vmul.f32 %v1226_v62, %v1222_v0 }
 0x758   : > { %v1234_v10 = vadd.f32 %v1232_v7, %v1228_v8 }
 0x75a   : > { %v1249_v14 = vpack.c.bf16 %v1234_v10, %v1233_v9 }
 0x75c   : > { %1709 = vmatmul.mubr.msk.bf16.vlgmr.msra.gmra.mxu1 %vm455_vm2, %v1249_v14 }
 0x81c   : > { %v1305_v18 = vpop.f32.mrf.mxu1 }
 0x81d   : > { %v1306_v3 = vadd.f32 %v1583_v13, %v1305_v18 }
 0x81e   : > { %v1710_v2 = vpop.f32.mrf.mxu1 }
 0x81f   : > { %v1312_v24 = vmax.f32 %v1306_v3, 0.0 }
 0x820   : > { %v1308_v19 = vpop.f32.mrf.mxu1 }
 0x821   : > { %v1309_v20 = vadd.f32 %v1583_v13, %v1308_v19 }
 0x822   : > { %v1711_v21 = vpop.f32.mrf.mxu1 }
 0x823   : > { %v1313_v25 = vmax.f32 %v1309_v20, 0.0 }
 0x825   : > { %v1314_v27 = vpack.c.bf16 %v1313_v25, %v1312_v24 }
 0x827   : > { %1721 = vmatmul.mubr.msk.bf16.vlgmr.msra.gmra.mxu0 %vm1343_vm8, %v1314_v27 }
 0x8e7   : > { %v1381_v29 = vpop.f32.mrf.mxu0 }
 0x8e8   : > { %v1382_v31 = vadd.f32 %v1381_v29, %v1318_v4 }
 0x8e9   : > { %v1722_v32 = vpop.f32.mrf.mxu0 }
 0x8ea   : > { %v1388_v33 = vadd.f32 %v1382_v31, %v1233_v9 }
 0x8eb   : > { %v1384_v34 = vpop.f32.mrf.mxu0 }
 0x8ec   : > { %v1385_v35 = vadd.f32 %v1384_v34, %v1318_v4  ;;  %v1390_v36 = vsel %vm455_vm2, %v1388_v33, 0.0 }
 0x8ed   : > { %1391 = vadd.xlane.f32.xlu1 %v1390_v36  ;;  %v1723_v37 = vpop.f32.mrf.mxu0 }
 0x8ee   : > { %v1389_v38 = vadd.f32 %v1385_v35, %v1234_v10 }
 0x8f0   : > { %v1393_v42 = vsel %vm455_vm2, %v1389_v38, 0.0 }
 0x8f1   : > { %1394 = vadd.xlane.f32.xlu0 %v1393_v42 }
 0x976   : > { %v1392_v43 = vpop.xlane.xlu1 %1391 }
 0x977   : > { %v1396_v44 = vmul.f32 0.03125, %v1392_v43 }
 0x979   : > { %v1398_v5 = vsub.f32 %v1388_v33, %v1396_v44 }
 0x97a   : > { %v1395_v46 = vpop.xlane.xlu0 %1394 }
 0x97b   : > { %v1397_v26 = vmul.f32 0.03125, %v1395_v46  ;;  %v1400_v12 = vmul.f32 %v1398_v5, %v1398_v5 }
 0x97d   : > { %v1399_v48 = vsub.f32 %v1389_v38, %v1397_v26  ;;  %v1402_v49 = vsel %vm455_vm2, %v1400_v12, 0.0 }
 0x97e   : > { %1403 = vadd.xlane.f32.xlu1 %v1402_v49 }
 0x97f   : > { %v1401_v6 = vmul.f32 %v1399_v48, %v1399_v48 }
 0x981   : > { %v1405_v50 = vsel %vm455_vm2, %v1401_v6, 0.0 }
 0x982   : > { %1406 = vadd.xlane.f32.xlu0 %v1405_v50 }
 0x98f   : > { %775 = vrot.lane.b32.xlu1 %v2055_v39, %s1813_s27 }
 0x993   : > { %922 = vrot.lane.b32.xlu1 %v2068_v23, %s1808_s20 }
 0x997   : > { %924 = vrot.lane.b32.xlu1 %v2065_v47, %s1808_s20 }
 0x998   : > { %777 = vrot.lane.b32.xlu0 %v2057_v40, %s1813_s27 }
 0x99b   : > { %1071 = vrot.lane.b32.xlu1 %v2075_v52, %s1815_s11 }
 0x99c   : > { %1069 = vrot.lane.b32.xlu0 %v2079_v53, %s1815_s11 }
 0xa07   : > { %v1404_v41 = vpop.xlane.xlu1 %1403 }
 0xa08   : > { %v1408_v54 = vmul.f32 0.03125, %v1404_v41 }
 0xa0a   : > { %v1410_v39 = vadd.f32 1e-05, %v1408_v54 }
 0xa0b   : > { %v776_v55 = vpop.permute.xlu1 %775  ;;  %v1407_v23 = vpop.xlane.xlu0 %1406 }
 0xa0c   : > { %1790 = vrsqrt.f32 %v1410_v39  ;;  %782 = vst.msk [vmem:[%s1914_s21] sm:$0xff] %vm781_vm9, %v776_v55  ;;  %v1409_v47 = vmul.f32 0.03125, %v1407_v23 }
 0xa0e   : > { %v1411_v40 = vadd.f32 1e-05, %v1409_v47 }
 0xa0f   : > { %v923_v45 = vpop.permute.xlu1 %922  ;;  %v778_v52 = vpop.permute.xlu0 %777 }
 0xa10   : > { %1792 = vrsqrt.f32 %v1411_v40  ;;  %929 = vst.msk [vmem:[%s1914_s21] sm:$0xff] %vm928_vm10, %v923_v45 }
 0xa11   : > { %783 = vst.msk [vmem:[%s1914_s21 + $0x8] sm:$0xff] %vm781_vm9, %v778_v52 }
 0xa13   : > { %v925_v53 = vpop.permute.xlu1 %924  ;;  %v1070_v57 = vpop.permute.xlu0 %1069 }
 0xa14   : > { %930 = vst.msk [vmem:[%s1914_s21 + $0x8] sm:$0xff] %vm928_vm10, %v925_v53 }
 0xa15   : > { %1076 = vst.msk [vmem:[%s1914_s21] sm:$0xff] %vm1075_vm11, %v1070_v57 }
 0xa17   : > { %v1072_v58 = vpop.permute.xlu1 %1071 }
 0xa18   : > { %1077 = vst.msk [vmem:[%s1914_s21 + $0x8] sm:$0xff] %vm1075_vm11, %v1072_v58 }
 0xa19   : > { %v1791_v59 = vpop.eup %1790 }
 0xa1a   : > { %v1414_v56 = vmul.f32 %v1791_v59, %v1398_v5 }
 0xa1c   : > { %v1420_v62 = vmul.f32 %v1419_v51, %v1414_v56 }
 0xa1d   : > { %v1793_v63 = vpop.eup %1792 }
 0xa1e   : > { %v1426_v61 = vadd.f32 %v1425_v60, %v1420_v62  ;;  %v1415_v0 = vmul.f32 %v1793_v63, %v1399_v48 }
 0xa20   : > { %1428 = vst.msk [vmem:[#allocation2] sm:$0xff] %vm455_vm2, %v1426_v61  ;;  %v1421_v1 = vmul.f32 %v1419_v51, %v1415_v0  ;;  %1433 = sbr.rel (%p1592_p5) target bundleno = 2598 (0xa26), region = 60 }
 0xa22   : > { %v1427_v7 = vadd.f32 %v1425_v60, %v1421_v1 }
 0xa24   : > { %1429 = vst.msk [vmem:[#allocation2 + $0x8] sm:$0xff] %vm455_vm2, %v1427_v7 }
 0xa25   : > { %1434 = vst.msk [vmem:[%s2176_s8] sm:$0xff] %vm455_vm2, %v1426_v61  ;;  %1435 = vst.msk [vmem:[%s2176_s8 + $0x8] sm:$0xff] %vm455_vm2, %v1427_v7 }
 0xa26 PF: > { %s20_s30 = sadd.s32 1, %s1800_s30  }
 0xa27   : > { %p17_p6 = scmp.ge.s32.totalorder %s20_s30, 4  }
 0xa29   :  { %19 = sbr.rel (!%p17_p6) target bundleno = 1 (0x1), region = 113 }

// kernel: transformer_forward.3
= control target key start
LH: loop header
LB: loop body
LE: loop exit
PB: predicated region body
PF: predicated region fallthrough
CT: control target
= control target key end

     0   :  { %s3919_s0 = inlined_call_operand.vmem [shape: f32[16,32], index: 0, kind: input, shape index: {}]   ;;  %s3920_s1 = inlined_call_operand.vmem [shape: f32[16,32], index: 1, kind: input, shape index: {}]   ;;  %s3921_s2 = inlined_call_operand.vmem [shape: f32[16,16], index: 2, kind: input, shape index: {}]   ;;  %s3922_s3 = inlined_call_operand.vmem [shape: f32[16,16], index: 3, kind: input, shape index: {}]   ;;  %s3923_s4 = inlined_call_operand.vmem [shape: bf16[2,32,128], index: 4, kind: input, shape index: {}]   ;;  %s3924_s5 = inlined_call_operand.vmem [shape: f32[2,6,32], index: 5, kind: input, shape index: {}]   ;;  %s3925_s6 = inlined_call_operand.vmem [shape: bf16[2,32,128], index: 6, kind: input, shape index: {}]   ;;  %s3926_s7 = inlined_call_operand.vmem [shape: f32[2,6,32], index: 7, kind: input, shape index: {}]   ;;  %s3927_s8 = inlined_call_operand.vmem [shape: bf16[2,32,64], index: 8, kind: input, shape index: {}]   ;;  %s3928_s9 = inlined_call_operand.vmem [shape: f32[2,1,64], index: 9, kind: input, shape index: {}]   ;;  %s3929_s10 = inlined_call_operand.vmem [shape: bf16[2,64,32], index: 10, kind: input, shape index: {}]   ;;  %s3930_s11 = inlined_call_operand.vmem [shape: f32[2,3,32], index: 11, kind: input, shape index: {}]   ;;  %s3931_s12 = inlined_call_operand.vmem [shape: bf16[32,32], index: 12, kind: input, shape index: {}]   ;;  %s3932_s13 = inlined_call_operand.vmem [shape: f32[1,32], index: 13, kind: input, shape index: {}]   ;;  %s3933_s14 = inlined_call_operand.hbm [shape: f32[16,32], index: 14, kind: output, shape index: {0}]   ;;  %s3934_s15 = inlined_call_operand.vmem [shape: f32[2,16,64], index: 15, kind: output, shape index: {1}]   ;;  %s3935_s16 = inlined_call_operand.vmem [shape: f32[2,16,64], index: 16, kind: output, shape index: {2}]  }
   0x1   :  { %3942 = sst [smem:[#allocation8_spill]] %s3919_s0 }
   0x2   :  { %3943 = sst [smem:[#allocation9_spill]] %s3922_s3 }
   0x3   :  { %3944 = sst [smem:[#allocation10_spill]] %s3923_s4 }
   0x4   :  { %3945 = sst [smem:[#allocation11_spill]] %s3924_s5 }
   0x5   :  { %3946 = sst [smem:[#allocation12_spill]] %s3925_s6 }
   0x6   :  { %3947 = sst [smem:[#allocation13_spill]] %s3926_s7 }
   0x7   :  { %3948 = sst [smem:[#allocation14_spill]] %s3931_s12 }
   0x8   :  { %3949 = sst [smem:[#allocation15_spill]] %s3932_s13 }
   0x9   :  { %3950 = sst [smem:[#allocation16_spill]] %s3933_s14 }
   0xa   :  { %22 = vsyncpa [#allocation5], 0  ;;  %s3331_s21 = smov 0  }
   0xb LB: > { %3951 = sst [smem:[#allocation7_spill]] %s3226_s21  ;;  %s3337_s22 = sadd.s32 4294967295, %s3226_s21   ;;  %s3226_s21 = sphi %s3331_s21, %s28_s21  }
   0xc   : > { %p2764_p0 = scmp.ge.s32.totalorder %s3226_s21, 1  ;;  %p528_p1 = scmp.lt.s32.totalorder %s3226_s21, 3 }
   0xe   : > { %p529_p2 = pnand %p2764_p0, %p528_p1 }
   0xf   : > { %p613_p3 = scmp.lt.s32.totalorder (!%p529_p2), %s3337_s22, 1  ;;  %s3952_s4 = sld [smem:[#allocation10_spill]] (!%p529_p2) }
  0x10   : > { %532 = sbr.rel (%p529_p2) target bundleno = 4878 (0x130e), region = 76  ;;  %s3953_s5 = sld [smem:[#allocation11_spill]] (!%p529_p2) }
  0x11   : > { %s3954_s6 = sld [smem:[#allocation12_spill]] (!%p529_p2)  ;;  %p2780_p4 = scmp.ne.s32.totalorder (!%p529_p2), %s3337_s22, 0 }
  0x12   : > { %s3955_s7 = sld [smem:[#allocation13_spill]] (!%p529_p2) }
  0x15   : > { %s3343_s23 = scalar_select %p613_p3, %s3337_s22, 1 }
  0x16   : > { %s3956_s17 = sld [smem:[#allocation8_spill]] (!%p2780_p4) }
  0x17   : > { %s2825_s24 = sshll.u32 %s3343_s23, 4  ;;  %s2767_s25 = sshll.u32 %s3343_s23, 3 }
  0x18   : > { %s617_s28 = scalar_lea.vmem %s3952_s4, %s2825_s24  ;;  %s3353_s0 = scalar_lea.vmem %s3953_s5, %s2767_s25 }
  0x19   : > { %s3358_s19 = scalar_lea.vmem %s3954_s6, %s2825_s24  ;;  %s3363_s14 = scalar_lea.vmem %s3955_s7, %s2767_s25 }
  0x1a   : > { %s3368_s26 = scalar_lea.vmem %s3927_s8, %s2825_s24  ;;  %s2828_s30 = sshll.u32 %s3343_s23, 5 }
  0x1b   : > { %s2775_s5 = sshll.u32 %s3343_s23, 2  ;;  %s3379_s18 = scalar_lea.vmem %s3929_s10, %s2828_s30 }
  0x1c   : > { %s3384_s25 = scalar_lea.vmem %s3930_s11, %s2775_s5  ;;  %s3389_s13 = scalar_lea.vmem %s3934_s15, %s2825_s24 }
  0x1d   : > { %s3394_s27 = scalar_lea.vmem %s3935_s16, %s2825_s24  ;;  %662 = sbr.rel (%p2780_p4) target bundleno = 36 (0x24), region = 80 }
  0x22   : > { %v663_v0 = vld [vmem:[%s3956_s17] sm:$0xff]  ;;  %vm665_vm0 = vcmask 261120   ;;  %v664_v1 = vld [vmem:[%s3956_s17 + $0x8] sm:$0xff] }
  0x23   : > { %666 = vst.msk [vmem:[#allocation2] sm:$0xff] %vm665_vm0, %v663_v0  ;;  %667 = vst.msk [vmem:[#allocation2 + $0x8] sm:$0xff] %vm665_vm0, %v664_v1 }
  0x24 PF: > { %v3403_v2 = vld [vmem:[%s617_s28 + $0x8] sm:$0xff]   ;;  %s3228_s7 = smov 96   ;;  %v3407_v3 = vld [vmem:[%s617_s28] sm:$0xff]   ;;  %v3229_v4 = vmov 0.0   ;;  %vm3230_vm1 = vmmov 0   ;;  %vm694_vm2 = vcmask 261120   ;;  %v678_v10 = vlaneseq }
  0x25   : > { %741 = vrot.lane.b32.xlu0 %v3403_v2, %s3228_s7  ;;  %2900 = vmatprep.subr.bf16.mxu1 %v3229_v4  ;;  %v3441_v13 = vld [vmem:[%s3353_s0] sm:$0x3f]  ;;  %vm805_vm3 = vcmask 64512   ;;  %s3231_s24 = smov 112   ;;  %s3232_s28 = smov 120   ;;  %vm857_vm4 = vcmask 130048  }
  0x26   : > { %2892 = vmatprep.subr.bf16.mxu0 %v3229_v4  ;;  %2904 = vmatprep.mubr.msk.bf16.mxu1 %vm3230_vm1, %v3229_v4  ;;  %v3435_v11 = vshrl.u32 %v678_v10, 7  ;;  %s3233_s0 = smov 104   ;;  %v670_v42 = vld [vmem:[%s3921_s2] sm:$0xff]  ;;  %v671_v47 = vld [vmem:[%s3921_s2 + $0x8] sm:$0xff]  ;;  %s3234_s3 = smov 32   ;;  %vm1079_vm5 = vcmask 130112  }
  0x27   : > { %2893 = vmatpush3.bf16.msra.mxu0 %v3403_v2  ;;  %2896 = vmatprep.mubr.msk.bf16.mxu0 %vm3230_vm1, %v3229_v4  ;;  %s3235_s30 = smov 88   ;;  %s3236_s5 = smov 80   ;;  %vm1226_vm6 = vcmask 195712   ;;  %vm1373_vm7 = vcmask 261312   ;;  %vm2382_vm8 = vcmask 523264   ;;  %vm1020_vm9 = vcmask 261248  }
  0x28   : > { %2894 = vmatprep.subr.bf16.mxu0 %v3229_v4  ;;  %v3438_v12 = vsub.s32 0, %v3435_v11  ;;  %v3446_v22 = vsub.s32 1, %v3435_v11  ;;  %s3237_s6 = smov 72   ;;  %s3238_s21 = smov 8   ;;  %vm1167_vm10 = vcmask 392448   ;;  %vm1314_vm11 = vcmask 523648  }
  0x29   : > { %739 = vrot.lane.b32.xlu0 %v3407_v3, %s3228_s7  ;;  %s3239_s20 = smov 16   ;;  %s3940_s12 = smov 24  }
  0x2a   : > { %v3414_v5 = vld [vmem:[#allocation2] sm:$0xff]  ;;  %v3416_v6 = vld [vmem:[#allocation2 + $0x8] sm:$0xff]  ;;  %v681_v14 = vrot.slane %v3441_v13, %v3438_v12  ;;  %v789_v24 = vrot.slane %v3441_v13, %v3446_v22  ;;  %p2816_p5 = scmp.ne.s32.totalorder %s3337_s22, 1 }
  0x2b   : > { %2895 = vmatpush3.bf16.msra.mxu0 %v3407_v3  ;;  %v677_v7 = vpack.c.bf16 %v3416_v6, %v3414_v5 }
  0x2c   : > { %2908 = vmatprep.subr.bf16.mxu0 %v3229_v4 }
  0x2e   : > { %2897 = vmatmul.mubr.msk.bf16.vlgmr.msra.gmra.mxu0 %vm694_vm2, %v677_v7 }
  0x2f   : > { %2910 = vmatprep.mubr.msk.bf16.mxu0 %vm3230_vm1, %v3229_v4 }
  0x97   : > { %v742_v8 = vpop.permute.xlu0 %741 }
  0x98   : > { %2901 = vmatpush3.bf16.msra.mxu1 %v742_v8 }
  0x99   : > { %2902 = vmatprep.subr.bf16.mxu1 %v3229_v4 }
  0x9b   : > { %v740_v9 = vpop.permute.xlu0 %739 }
  0x9c   : > { %2903 = vmatpush3.bf16.msra.mxu1 %v740_v9 }
  0x9d   : > { %2914 = vmatprep.subr.bf16.mxu1 %v3229_v4 }
  0x9f   : > { %2905 = vmatmul.mubr.msk.bf16.vlgmr.msra.gmra.mxu1 %vm694_vm2, %v677_v7 }
  0xa0   : > { %2916 = vmatprep.mubr.msk.bf16.mxu1 %vm3230_vm1, %v3229_v4 }
  0xee   : > { %v732_v15 = vpop.f32.mrf.mxu0 }
  0xef   : > { %v733_v17 = vadd.f32 %v732_v15, %v681_v14 }
  0xf0   : > { %v2898_v16 = vpop.f32.mrf.mxu0 }
  0xf2   : > { %v735_v18 = vpop.f32.mrf.mxu0 }
  0xf3   : > { %v736_v19 = vadd.f32 %v735_v18, %v681_v14 }
  0xf4   : > { %v2899_v20 = vpop.f32.mrf.mxu0 }
  0xf5   : > { %v802_v21 = vpack.c.bf16 %v736_v19, %v733_v17 }
 0x15f   : > { %v3448_v23 = vpop.f32.mrf.mxu1 }
 0x160   : > { %v790_v27 = vadd.f32 %v789_v24, %v3448_v23 }
 0x161   : > { %v2906_v25 = vpop.f32.mrf.mxu1 }
 0x163   : > { %v3452_v26 = vpop.f32.mrf.mxu1 }
 0x164   : > { %v791_v28 = vadd.f32 %v789_v24, %v3452_v26 }
 0x165   : > { %v2907_v29 = vpop.f32.mrf.mxu1 }
 0x166   : > { %v803_v30 = vpack.c.bf16 %v791_v28, %v790_v27 }
 0x168   : > { %1084 = vrot.lane.b32.xlu0 %v803_v30, %s3231_s24  ;;  %937 = vrot.lane.b32.xlu1 %v803_v30, %s3232_s28  ;;  %v810_v31 = vsel %vm805_vm3, %v803_v30, 0 }
 0x169   : > { %2909 = vmatpush3.bf16.xpose.msra.mxu0 %v810_v31 }
 0x16a   : > { %2920 = vmatprep.subr.bf16.mxu0 %v3229_v4 }
 0x16c   : > { %1231 = vrot.lane.b32.xlu0 %v803_v30, %s3233_s0  ;;  %934 = vrot.lane.b32.xlu1 %v802_v21, %s3232_s28  ;;  %v3509_v30 = vsub.s32 2, %v3435_v11 }
 0x16e   : > { %v795_v31 = vrot.slane %v3441_v13, %v3509_v30 }
 0x170   : > { %1082 = vrot.lane.b32.xlu1 %v802_v21, %s3231_s24  ;;  %2911 = vmatmul.mubr.msk.bf16.vlgmr.msra.gmra.mxu0 %vm805_vm3, %v802_v21 }
 0x171   : > { %2922 = vmatprep.mubr.msk.bf16.mxu0 %vm3230_vm1, %v3229_v4 }
 0x174   : > { %1229 = vrot.lane.b32.xlu1 %v802_v21, %s3233_s0 }
 0x1da   : > { %v938_v32 = vpop.permute.xlu1 %937  ;;  %v1085_v34 = vpop.permute.xlu0 %1084 }
 0x1db   : > { %v943_v33 = vsel %vm805_vm3, %v938_v32, 0  ;;  %v1090_v36 = vsel %vm805_vm3, %v1085_v34, 0 }
 0x1dc   : > { %2921 = vmatpush3.bf16.xpose.msra.mxu0 %v943_v33 }
 0x1dd   : > { %2932 = vmatprep.subr.bf16.mxu0 %v3229_v4 }
 0x1de   : > { %v935_v35 = vpop.permute.xlu1 %934  ;;  %v1232_v37 = vpop.permute.xlu0 %1231 }
 0x1df   : > { %v1237_v39 = vsel %vm805_vm3, %v1232_v37, 0 }
 0x1e2   : > { %v1083_v38 = vpop.permute.xlu1 %1082 }
 0x1e3   : > { %2923 = vmatmul.mubr.msk.bf16.vlgmr.msra.gmra.mxu0 %vm805_vm3, %v935_v35 }
 0x1e4   : > { %2933 = vmatpush3.bf16.xpose.msra.mxu0 %v1090_v36  ;;  %2934 = vmatprep.mubr.msk.bf16.mxu0 %vm3230_vm1, %v3229_v4 }
 0x1e5   : > { %2944 = vmatprep.subr.bf16.mxu0 %v3229_v4 }
 0x1e6   : > { %v1230_v40 = vpop.permute.xlu1 %1229 }
 0x1eb   : > { %2935 = vmatmul.mubr.msk.bf16.vlgmr.msra.gmra.mxu0 %vm805_vm3, %v1083_v38 }
 0x1ec   : > { %2945 = vmatpush3.bf16.xpose.msra.mxu0 %v1237_v39  ;;  %2946 = vmatprep.mubr.msk.bf16.mxu0 %vm3230_vm1, %v3229_v4 }
 0x1ed   : > { %2956 = vmatprep.subr.bf16.mxu0 %v3229_v4 }
 0x1f3   : > { %2947 = vmatmul.mubr.msk.bf16.vlgmr.msra.gmra.mxu0 %vm805_vm3, %v1230_v40 }
 0x1f4   : > { %2960 = vmatprep.mubr.msk.bf16.mxu0 %vm3230_vm1, %v3229_v4 }
 0x230   : > { %v846_v41 = vpop.f32.mrf.mxu0 }
 0x231   : > { %v853_v43 = vmul.f32 0.35355338, %v846_v41 }
 0x232   : > { %v2912_v44 = vpop.f32.mrf.mxu0 }
 0x233   : > { %v3485_v45 = vadd.f32 %v853_v43, %v670_v42 }
 0x234   : > { %v849_v46 = vpop.f32.mrf.mxu0 }
 0x235   : > { %v854_v48 = vmul.f32 0.35355338, %v849_v46  ;;  %v858_v49 = vsel %vm857_vm4, %v3485_v45, -inf }
 0x236   : > { %859 = vmax.xlane.f32.xlu0 %v858_v49  ;;  %v2913_v50 = vpop.f32.mrf.mxu0 }
 0x237   : > { %v3492_v51 = vadd.f32 %v854_v48, %v671_v47 }
 0x239   : > { %v861_v52 = vsel %vm857_vm4, %v3492_v51, -inf }
 0x23a   : > { %862 = vmax.xlane.f32.xlu1 %v861_v52 }
 0x2a3   : > { %v979_v53 = vpop.f32.mrf.mxu0 }
 0x2a4   : > { %v986_v54 = vmul.f32 0.35355338, %v979_v53 }
 0x2a5   : > { %v2924_v55 = vpop.f32.mrf.mxu0 }
 0x2a6   : > { %v3496_v56 = vadd.f32 %v986_v54, %v670_v42 }
 0x2a7   : > { %v982_v57 = vpop.f32.mrf.mxu0 }
 0x2a8   : > { %v987_v58 = vmul.f32 0.35355338, %v982_v57  ;;  %v990_v59 = vsel %vm857_vm4, %v3496_v56, -inf }
 0x2a9   : > { %991 = vmax.xlane.f32.xlu0 %v990_v59  ;;  %v2925_v60 = vpop.f32.mrf.mxu0 }
 0x2aa   : > { %v3500_v61 = vadd.f32 %v987_v58, %v671_v47 }
 0x2ab   : > { %v1126_v62 = vpop.f32.mrf.mxu0 }
 0x2ac   : > { %v1133_v63 = vmul.f32 0.35355338, %v1126_v62  ;;  %v993_v0 = vsel %vm857_vm4, %v3500_v61, -inf }
 0x2ad   : > { %994 = vmax.xlane.f32.xlu0 %v993_v0  ;;  %v2936_v1 = vpop.f32.mrf.mxu0 }
 0x2ae   : > { %v1135_v7 = vadd.f32 %v1133_v63, %v670_v42 }
 0x2af   : > { %v1129_v8 = vpop.f32.mrf.mxu0 }
 0x2b0   : > { %v1134_v9 = vmul.f32 0.35355338, %v1129_v8  ;;  %v1137_v10 = vsel %vm857_vm4, %v1135_v7, -inf }
 0x2b1   : > { %1138 = vmax.xlane.f32.xlu1 %v1137_v10  ;;  %v2937_v14 = vpop.f32.mrf.mxu0 }
 0x2b2   : > { %v1136_v15 = vadd.f32 %v1134_v9, %v671_v47 }
 0x2b3   : > { %v1273_v16 = vpop.f32.mrf.mxu0 }
 0x2b4   : > { %v1280_v17 = vmul.f32 0.35355338, %v1273_v16  ;;  %v1140_v18 = vsel %vm857_vm4, %v1136_v15, -inf }
 0x2b5   : > { %1141 = vmax.xlane.f32.xlu0 %v1140_v18  ;;  %v2948_v19 = vpop.f32.mrf.mxu0 }
 0x2b6   : > { %v1282_v20 = vadd.f32 %v1280_v17, %v670_v42 }
 0x2b7   : > { %v1276_v21 = vpop.f32.mrf.mxu0 }
 0x2b8   : > { %v1281_v24 = vmul.f32 0.35355338, %v1276_v21  ;;  %v1284_v25 = vsel %vm857_vm4, %v1282_v20, -inf }
 0x2b9   : > { %1285 = vmax.xlane.f32.xlu1 %v1284_v25  ;;  %v2949_v27 = vpop.f32.mrf.mxu0 }
 0x2ba   : > { %v1283_v28 = vadd.f32 %v1281_v24, %v671_v47 }
 0x2bc   : > { %v1287_v29 = vsel %vm857_vm4, %v1283_v28, -inf }
 0x2bd   : > { %1288 = vmax.xlane.f32.xlu0 %v1287_v29 }
 0x2bf   : > { %v860_v43 = vpop.xlane.xlu0 %859 }
 0x2c0   : > { %v864_v44 = vsub.f32 %v3485_v45, %v860_v43 }
 0x2c2   : > { %v866_v47 = vmul.f32 1.442695, %v864_v44 }
 0x2c3   : > { %v863_v32 = vpop.xlane.xlu1 %862 }
 0x2ca   : > { %797 = vrot.lane.b32.xlu1 %v795_v31, %s3234_s3 }
 0x332   : > { %v992_v46 = vpop.xlane.xlu0 %991 }
 0x333   : > { %v996_v48 = vsub.f32 %v3496_v56, %v992_v46 }
 0x335   : > { %v998_v50 = vmul.f32 1.442695, %v996_v48 }
 0x336   : > { %v995_v49 = vpop.xlane.xlu0 %994 }
 0x337   : > { %v997_v52 = vsub.f32 %v3500_v61, %v995_v49 }
 0x339   : > { %v1000_v54 = vmul.f32 1.442695, %v997_v52 }
 0x33a   : > { %v1139_v33 = vpop.xlane.xlu1 %1138 }
 0x33b   : > { %v1143_v34 = vsub.f32 %v1135_v7, %v1139_v33 }
 0x33d   : > { %v1145_v35 = vmul.f32 1.442695, %v1143_v34 }
 0x33e   : > { %v1142_v53 = vpop.xlane.xlu0 %1141 }
 0x33f   : > { %3106 = vpow2.f32 %v1145_v35  ;;  %v1144_v45 = vsub.f32 %v1136_v15, %v1142_v53 }
 0x340   : > { %3108 = vpow2.f32 %v866_v47 }
 0x341   : > { %v1147_v55 = vmul.f32 1.442695, %v1144_v45 }
 0x342   : > { %v1286_v36 = vpop.xlane.xlu1 %1285 }
 0x343   : > { %v1290_v57 = vsub.f32 %v1282_v20, %v1286_v36 }
 0x345   : > { %v1292_v59 = vmul.f32 1.442695, %v1290_v57 }
 0x346   : > { %v798_v37 = vpop.permute.xlu1 %797  ;;  %v1289_v58 = vpop.xlane.xlu0 %1288 }
 0x347   : > { %v800_v38 = vadd.f32 %v798_v37, %v3448_v23  ;;  %v801_v39 = vadd.f32 %v798_v37, %v3452_v26  ;;  %v865_v23 = vsub.f32 %v3492_v51, %v863_v32  ;;  %v1291_v56 = vsub.f32 %v1283_v28, %v1289_v58 }
 0x349   : > { %v804_v40 = vpack.c.bf16 %v801_v39, %v800_v38  ;;  %v868_v26 = vmul.f32 1.442695, %v865_v23  ;;  %v1294_v63 = vmul.f32 1.442695, %v1291_v56 }
 0x34b   : > { %884 = vrot.lane.b32.xlu0 %v804_v40, %s3228_s7  ;;  %3110 = vpow2.f32 %v868_v26 }
 0x34c   : > { %v3517_v41 = vpop.eup %3106  ;;  %3112 = vpow2.f32 %v998_v50 }
 0x34d   : > { %v1149_v42 = vsel %vm857_vm4, %v3517_v41, 0.0  ;;  %3114 = vpow2.f32 %v1000_v54  ;;  %v3109_v51 = vpop.eup %3108 }
 0x34e   : > { %1150 = vadd.xlane.f32.xlu1 %v1149_v42  ;;  %3116 = vpow2.f32 %v1147_v55  ;;  %v870_v60 = vsel %vm857_vm4, %v3109_v51, 0.0 }
 0x34f   : > { %1024 = vrot.lane.b32.xlu0 %v804_v40, %s3235_s30  ;;  %3118 = vpow2.f32 %v1292_v59 }
 0x350   : > { %3120 = vpow2.f32 %v1294_v63 }
 0x358   : > { %v3111_v62 = vpop.eup %3110 }
 0x359   : > { %v873_v61 = vsel %vm857_vm4, %v3111_v62, 0.0  ;;  %v3113_v0 = vpop.eup %3112 }
 0x35a   : > { %v1002_v1 = vsel %vm857_vm4, %v3113_v0, 0.0  ;;  %v3115_v7 = vpop.eup %3114 }
 0x35b   : > { %v1005_v8 = vsel %vm857_vm4, %v3115_v7, 0.0  ;;  %v3117_v9 = vpop.eup %3116 }
 0x35c   : > { %v1152_v10 = vsel %vm857_vm4, %v3117_v9, 0.0  ;;  %v3532_v14 = vpop.eup %3118 }
 0x35d   : > { %v1296_v15 = vsel %vm857_vm4, %v3532_v14, 0.0  ;;  %v3121_v16 = vpop.eup %3120 }
 0x35e   : > { %v1299_v17 = vsel %vm857_vm4, %v3121_v16, 0.0 }
 0x35f   : > { %1171 = vrot.lane.b32.xlu1 %v804_v40, %s3236_s5 }
 0x36e   : > { %871 = vadd.xlane.f32.xlu0 %v870_v60 }
 0x372   : > { %874 = vadd.xlane.f32.xlu0 %v873_v61 }
 0x376   : > { %1003 = vadd.xlane.f32.xlu0 %v1002_v1 }
 0x37a   : > { %1006 = vadd.xlane.f32.xlu0 %v1005_v8 }
 0x37e   : > { %1153 = vadd.xlane.f32.xlu0 %v1152_v10 }
 0x382   : > { %1297 = vadd.xlane.f32.xlu0 %v1296_v15 }
 0x386   : > { %1300 = vadd.xlane.f32.xlu0 %v1299_v17 }
 0x39c   : > { %1318 = vrot.lane.b32.xlu0 %v804_v40, %s3237_s6 }
 0x3bd   : > { %v885_v18 = vpop.permute.xlu0 %884 }
 0x3be   : > { %2915 = vmatpush3.bf16.msra.mxu1 %v885_v18 }
 0x3bf   : > { %2926 = vmatprep.subr.bf16.mxu1 %v3229_v4 }
 0x3c1   : > { %v1025_v19 = vpop.permute.xlu0 %1024 }
 0x3d7   : > { %v1151_v29 = vpop.xlane.xlu1 %1150 }
 0x3db   : > { %v1172_v44 = vpop.permute.xlu1 %1171 }
 0x3f7   : > { %v872_v20 = vpop.xlane.xlu0 %871 }
 0x3f8   : > { %3122 = vrcp.f32 %v872_v20 }
 0x3fb   : > { %v875_v21 = vpop.xlane.xlu0 %874 }
 0x3fc   : > { %3124 = vrcp.f32 %v875_v21  ;;  %v1381_v21 = vsub.s32 3, %v3435_v11 }
 0x3ff   : > { %v1004_v24 = vpop.xlane.xlu0 %1003 }
 0x400   : > { %3126 = vrcp.f32 %v1004_v24  ;;  %v1382_v24 = vrot.slane %v3441_v13, %v1381_v21 }
 0x403   : > { %v1007_v25 = vpop.xlane.xlu0 %1006 }
 0x404   : > { %3128 = vrcp.f32 %v1007_v25 }
 0x405   : > { %v3123_v27 = vpop.eup %3122 }
 0x406   : > { %v878_v28 = vmul.f32 %v3123_v27, %v3109_v51 }
 0x407   : > { %v1154_v31 = vpop.xlane.xlu0 %1153 }
 0x408   : > { %3130 = vrcp.f32 %v1154_v31  ;;  %880 = vst.msk [vmem:[%s3389_s13] sm:$0xff] %vm857_vm4, %v878_v28 }
 0x409   : > { %v3125_v32 = vpop.eup %3124  ;;  %3132 = vrcp.f32 %v1151_v29 }
 0x40a   : > { %v879_v33 = vmul.f32 %v3125_v32, %v3111_v62 }
 0x40b   : > { %v1298_v34 = vpop.xlane.xlu0 %1297 }
 0x40c   : > { %v882_v35 = vpack.c.bf16 %v879_v33, %v878_v28  ;;  %881 = vst.msk [vmem:[%s3389_s13 + $0x8] sm:$0xff] %vm857_vm4, %v879_v33 }
 0x40d   : > { %v3127_v36 = vpop.eup %3126 }
 0x40e   : > { %2917 = vmatmul.mubr.msk.bf16.vlgmr.msra.gmra.mxu1 %vm857_vm4, %v882_v35  ;;  %v3547_v39 = vmul.f32 %v3127_v36, %v3113_v0 }
 0x40f   : > { %2927 = vmatpush3.bf16.msra.mxu1 %v1025_v19  ;;  %v1301_v37 = vpop.xlane.xlu0 %1300  ;;  %2928 = vmatprep.mubr.msk.bf16.mxu1 %vm3230_vm1, %v3229_v4 }
 0x410   : > { %3134 = vrcp.f32 %v1301_v37  ;;  %2938 = vmatprep.subr.bf16.mxu1 %v3229_v4  ;;  %v3610_v37 = vld [vmem:[%s3358_s19 + $0x8] sm:$0xff]  }
 0x411   : > { %v3129_v38 = vpop.eup %3128  ;;  %3136 = vrcp.f32 %v1298_v34 }
 0x412   : > { %v3549_v40 = vmul.f32 %v3129_v38, %v3115_v7 }
 0x413   : > { %v1319_v49 = vpop.permute.xlu0 %1318 }
 0x414   : > { %v1023_v42 = vpack.c.bf16 %v3549_v40, %v3547_v39 }
 0x415   : > { %v3131_v43 = vpop.eup %3130 }
 0x416   : > { %2929 = vmatmul.mubr.msk.bf16.vlgmr.msra.gmra.mxu1 %vm857_vm4, %v1023_v42  ;;  %v3133_v46 = vpop.eup %3132  ;;  %v3557_v47 = vmul.f32 %v3131_v43, %v3117_v9 }
 0x417   : > { %2939 = vmatpush3.bf16.msra.mxu1 %v1172_v44  ;;  %2940 = vmatprep.mubr.msk.bf16.mxu1 %vm3230_vm1, %v3229_v4  ;;  %v3560_v23 = vmul.f32 %v3133_v46, %v3517_v41 }
 0x418   : > { %2950 = vmatprep.subr.bf16.mxu1 %v3229_v4 }
 0x419   : > { %v1170_v26 = vpack.c.bf16 %v3557_v47, %v3560_v23 }
 0x41d   : > { %v3135_v48 = vpop.eup %3134 }
 0x41e   : > { %2941 = vmatmul.mubr.msk.bf16.vlgmr.msra.gmra.mxu1 %vm857_vm4, %v1170_v26  ;;  %v3137_v50 = vpop.eup %3136  ;;  %v3567_v52 = vmul.f32 %v3135_v48, %v3121_v16 }
 0x41f   : > { %2951 = vmatpush3.bf16.msra.mxu1 %v1319_v49  ;;  %2952 = vmatprep.mubr.msk.bf16.mxu1 %vm3230_vm1, %v3229_v4  ;;  %v3571_v53 = vmul.f32 %v3137_v50, %v3532_v14 }
 0x420   : > { %2964 = vmatprep.subr.bf16.mxu1 %v3229_v4 }
 0x421   : > { %v1317_v41 = vpack.c.bf16 %v3567_v52, %v3571_v53 }
 0x426   : > { %2953 = vmatmul.mubr.msk.bf16.vlgmr.msra.gmra.mxu1 %vm857_vm4, %v1317_v41 }
 0x427   : > { %2968 = vmatprep.mubr.msk.bf16.mxu1 %vm3230_vm1, %v3229_v4  ;;  %2965 = vmatpush3.bf16.msra.mxu1 %v3610_v37 }
 0x428   : > { %2966 = vmatprep.subr.bf16.mxu1 %v3229_v4 }
 0x4ce   : > { %v924_v54 = vpop.f32.mrf.mxu1 }
 0x4cf   : > { %931 = vst.msk [vmem:[#allocation3] sm:$0xff] %vm805_vm3, %v924_v54 }
 0x4d0   : > { %v2918_v45 = vpop.f32.mrf.mxu1 }
 0x4d2   : > { %v927_v55 = vpop.f32.mrf.mxu1 }
 0x4d3   : > { %932 = vst.msk [vmem:[#allocation3 + $0x8] sm:$0xff] %vm805_vm3, %v927_v55 }
 0x4d4   : > { %v2919_v57 = vpop.f32.mrf.mxu1 }
 0x4d6   : > { %v1064_v51 = vpop.f32.mrf.mxu1 }
 0x4d7   : > { %1073 = vrot.lane.b32.xlu0 %v1064_v51, %s3238_s21 }
 0x4d8   : > { %v2930_v58 = vpop.f32.mrf.mxu1 }
 0x4d9   : > { %v1474_v58 = vld [vmem:[%s3920_s1] sm:$0xff] }
 0x4da   : > { %v1067_v59 = vpop.f32.mrf.mxu1 }
 0x4db   : > { %1075 = vrot.lane.b32.xlu0 %v1067_v59, %s3238_s21  ;;  %v1475_v59 = vld [vmem:[%s3920_s1 + $0x8] sm:$0xff] }
 0x4dc   : > { %v2931_v56 = vpop.f32.mrf.mxu1 }
 0x4de   : > { %v1211_v60 = vpop.f32.mrf.mxu1 }
 0x4df   : > { %1220 = vrot.lane.b32.xlu0 %v1211_v60, %s3239_s20 }
 0x4e0   : > { %v2942_v62 = vpop.f32.mrf.mxu1 }
 0x4e1   : > { %v1544_v62 = vpack.c.bf16 %v1475_v59, %v1474_v58 }
 0x4e2   : > { %v1214_v63 = vpop.f32.mrf.mxu1 }
 0x4e3   : > { %1222 = vrot.lane.b32.xlu1 %v1214_v63, %s3239_s20  ;;  %v1464_v63 = vsub.s32 4, %v3435_v11 }
 0x4e4   : > { %v2943_v61 = vpop.f32.mrf.mxu1 }
 0x4e6   : > { %v1358_v0 = vpop.f32.mrf.mxu1 }
 0x4e7   : > { %1367 = vrot.lane.b32.xlu0 %v1358_v0, %s3940_s12 }
 0x4e8   : > { %v2954_v1 = vpop.f32.mrf.mxu1 }
 0x4e9   : > { %v1465_v1 = vrot.slane %v3441_v13, %v1464_v63 }
 0x4ea   : > { %v1361_v7 = vpop.f32.mrf.mxu1 }
 0x4eb   : > { %1369 = vrot.lane.b32.xlu1 %v1361_v7, %s3940_s12  ;;  %1385 = vrot.lane.b32.xlu0 %v3403_v2, %s3234_s3  ;;  %v1470_v7 = vsub.s32 5, %v3435_v11  ;;  %s3961_s12 = sld [smem:[#allocation15_spill]] (!%p2816_p5) }
 0x4ec   : > { %v2955_v8 = vpop.f32.mrf.mxu1 }
 0x4ef   : > { %1383 = vrot.lane.b32.xlu1 %v3407_v3, %s3234_s3 }
 0x549   : > { %v1074_v9 = vpop.permute.xlu0 %1073 }
 0x54a   : > { %1080 = vst.msk [vmem:[#allocation3] sm:$0xff] %vm1079_vm5, %v1074_v9 }
 0x54d   : > { %v1076_v10 = vpop.permute.xlu0 %1075 }
 0x54e   : > { %1081 = vst.msk [vmem:[#allocation3 + $0x8] sm:$0xff] %vm1079_vm5, %v1076_v10 }
 0x551   : > { %v1221_v14 = vpop.permute.xlu0 %1220 }
 0x552   : > { %1227 = vst.msk [vmem:[#allocation3] sm:$0xff] %vm1226_vm6, %v1221_v14  ;;  %v1471_v14 = vrot.slane %v3441_v13, %v1470_v7 }
 0x555   : > { %v1223_v15 = vpop.permute.xlu1 %1222 }
 0x556   : > { %1228 = vst.msk [vmem:[#allocation3 + $0x8] sm:$0xff] %vm1226_vm6, %v1223_v15 }
 0x559   : > { %v1368_v2 = vpop.permute.xlu0 %1367 }
 0x55a   : > { %1374 = vst.msk [vmem:[#allocation3] sm:$0xff] %vm1373_vm7, %v1368_v2 }
 0x55d   : > { %v1370_v16 = vpop.permute.xlu1 %1369  ;;  %v1386_v3 = vpop.permute.xlu0 %1385 }
 0x55e   : > { %1375 = vst.msk [vmem:[#allocation3 + $0x8] sm:$0xff] %vm1373_vm7, %v1370_v16  ;;  %2957 = vmatpush3.bf16.msra.mxu0 %v1386_v3 }
 0x55f   : > { %2958 = vmatprep.subr.bf16.mxu0 %v3229_v4 }
 0x561   : > { %v1384_v17 = vpop.permute.xlu1 %1383  ;;  %v1376_v18 = vld [vmem:[#allocation3] sm:$0xff] }
 0x562   : > { %2959 = vmatpush3.bf16.msra.mxu0 %v1384_v17  ;;  %v3654_v17 = vld [vmem:[%s3363_s14] sm:$0x3f] }
 0x563   : > { %2972 = vmatprep.subr.bf16.mxu0 %v3229_v4 }
 0x565   : > { %v1377_v19 = vld [vmem:[#allocation3 + $0x8] sm:$0xff] }
 0x566   : > { %v1378_v20 = vpack.c.bf16 %v1377_v19, %v1376_v18  ;;  %v1598_v18 = vrot.slane %v3654_v17, %v3446_v22 }
 0x568   : > { %2961 = vmatmul.mubr.msk.bf16.vlgmr.msra.gmra.mxu0 %vm694_vm2, %v1378_v20 }
 0x569   : > { %2976 = vmatprep.mubr.msk.bf16.mxu0 %vm3230_vm1, %v3229_v4 }
 0x628   : > { %v1426_v25 = vpop.f32.mrf.mxu0 }
 0x629   : > { %v1427_v27 = vadd.f32 %v1426_v25, %v1382_v24 }
 0x62a   : > { %v2962_v28 = vpop.f32.mrf.mxu0 }
 0x62b   : > { %v1433_v29 = vadd.f32 %v1427_v27, %v3414_v5  ;;  %v3617_v5 = vld [vmem:[%s3358_s19] sm:$0xff]  }
 0x62c   : > { %v1429_v31 = vpop.f32.mrf.mxu0  ;;  %2967 = vmatpush3.bf16.msra.mxu1 %v3617_v5 }
 0x62d   : > { %v1430_v32 = vadd.f32 %v1429_v31, %v1382_v24  ;;  %v1435_v33 = vsel %vm694_vm2, %v1433_v29, 0.0  ;;  %2980 = vmatprep.subr.bf16.mxu1 %v3229_v4 }
 0x62e   : > { %1436 = vadd.xlane.f32.xlu0 %v1435_v33  ;;  %v2963_v34 = vpop.f32.mrf.mxu0 }
 0x62f   : > { %v1434_v35 = vadd.f32 %v1430_v32, %v3416_v6  ;;  %v1487_v32 = vrot.slane %v3654_v17, %v3438_v12 }
 0x631   : > { %v1438_v36 = vsel %vm694_vm2, %v1434_v35, 0.0 }
 0x632   : > { %1439 = vadd.xlane.f32.xlu1 %v1438_v36 }
 0x643   : > { %1547 = vrot.lane.b32.xlu1 %v3610_v37, %s3228_s7 }
 0x6b7   : > { %v1437_v38 = vpop.xlane.xlu0 %1436 }
 0x6b8   : > { %v1442_v6 = vmul.f32 0.03125, %v1437_v38 }
 0x6ba   : > { %v1444_v42 = vsub.f32 %v1433_v29, %v1442_v6 }
 0x6bb   : > { %v1440_v43 = vpop.xlane.xlu1 %1439 }
 0x6bc   : > { %v1443_v44 = vmul.f32 0.03125, %v1440_v43  ;;  %v1446_v46 = vmul.f32 %v1444_v42, %v1444_v42 }
 0x6be   : > { %v1445_v26 = vsub.f32 %v1434_v35, %v1443_v44  ;;  %v1448_v48 = vsel %vm694_vm2, %v1446_v46, 0.0 }
 0x6bf   : > { %1449 = vadd.xlane.f32.xlu0 %v1448_v48  ;;  %v1548_v41 = vpop.permute.xlu1 %1547 }
 0x6c0   : > { %v1447_v49 = vmul.f32 %v1445_v26, %v1445_v26  ;;  %2973 = vmatpush3.bf16.msra.mxu0 %v1548_v41 }
 0x6c1   : > { %2974 = vmatprep.subr.bf16.mxu0 %v3229_v4 }
 0x6c2   : > { %v1451_v50 = vsel %vm694_vm2, %v1447_v49, 0.0 }
 0x6c3   : > { %1452 = vadd.xlane.f32.xlu0 %v1451_v50 }
 0x6d9   : > { %1545 = vrot.lane.b32.xlu0 %v3617_v5, %s3228_s7 }
 0x748   : > { %v1450_v54 = vpop.xlane.xlu0 %1449 }
 0x749   : > { %v1454_v45 = vmul.f32 0.03125, %v1450_v54 }
 0x74b   : > { %v1456_v55 = vadd.f32 1e-05, %v1454_v45 }
 0x74c   : > { %v1453_v57 = vpop.xlane.xlu0 %1452 }
 0x74d   : > { %3138 = vrsqrt.f32 %v1456_v55  ;;  %v1455_v51 = vmul.f32 0.03125, %v1453_v57 }
 0x74f   : > { %v1457_v56 = vadd.f32 1e-05, %v1455_v51 }
 0x750   : > { %v1546_v60 = vpop.permute.xlu0 %1545 }
 0x751   : > { %3140 = vrsqrt.f32 %v1457_v56  ;;  %2975 = vmatpush3.bf16.msra.mxu0 %v1546_v60 }
 0x752   : > { %2986 = vmatprep.subr.bf16.mxu0 %v3229_v4 }
 0x754   : > { %2977 = vmatmul.mubr.msk.bf16.vlgmr.msra.gmra.mxu0 %vm694_vm2, %v1544_v62 }
 0x755   : > { %2988 = vmatprep.mubr.msk.bf16.mxu0 %vm3230_vm1, %v3229_v4 }
 0x75a   : > { %v3139_v61 = vpop.eup %3138 }
 0x75b   : > { %v1460_v0 = vmul.f32 %v3139_v61, %v1444_v42 }
 0x75d   : > { %v1466_v10 = vmul.f32 %v1465_v1, %v1460_v0 }
 0x75e   : > { %v3141_v8 = vpop.eup %3140 }
 0x75f   : > { %v1461_v9 = vmul.f32 %v3141_v8, %v1445_v26  ;;  %v3644_v2 = vadd.f32 %v1471_v14, %v1466_v10 }
 0x761   : > { %v1467_v15 = vmul.f32 %v1465_v1, %v1461_v9 }
 0x763   : > { %v3646_v16 = vadd.f32 %v1471_v14, %v1467_v15 }
 0x765   : > { %v1483_v3 = vpack.c.bf16 %v3646_v16, %v3644_v2 }
 0x767   : > { %2969 = vmatmul.mubr.msk.bf16.vlgmr.msra.gmra.mxu1 %vm694_vm2, %v1483_v3 }
 0x768   : > { %2982 = vmatprep.mubr.msk.bf16.mxu1 %vm3230_vm1, %v3229_v4 }
 0x814   : > { %v3658_v19 = vpop.f32.mrf.mxu0 }
 0x815   : > { %v1599_v20 = vadd.f32 %v1598_v18, %v3658_v19 }
 0x816   : > { %v2978_v13 = vpop.f32.mrf.mxu0 }
 0x818   : > { %v3661_v24 = vpop.f32.mrf.mxu0 }
 0x819   : > { %v1600_v25 = vadd.f32 %v1598_v18, %v3661_v24 }
 0x81a   : > { %v2979_v27 = vpop.f32.mrf.mxu0 }
 0x81b   : > { %v1612_v28 = vpack.c.bf16 %v1600_v25, %v1599_v20 }
 0x81d   : > { %1889 = vrot.lane.b32.xlu0 %v1612_v28, %s3231_s24  ;;  %1744 = vrot.lane.b32.xlu1 %v1612_v28, %s3232_s28  ;;  %v1618_v29 = vsel %vm805_vm3, %v1612_v28, 0 }
 0x81e   : > { %2981 = vmatpush3.bf16.xpose.msra.mxu1 %v1618_v29 }
 0x81f   : > { %2992 = vmatprep.subr.bf16.mxu1 %v3229_v4 }
 0x821   : > { %2034 = vrot.lane.b32.xlu0 %v1612_v28, %s3233_s0 }
 0x827   : > { %v1537_v31 = vpop.f32.mrf.mxu1 }
 0x828   : > { %v1538_v35 = vadd.f32 %v1537_v31, %v1487_v32 }
 0x829   : > { %v2970_v33 = vpop.f32.mrf.mxu1 }
 0x82b   : > { %v1540_v34 = vpop.f32.mrf.mxu1 }
 0x82c   : > { %v1541_v36 = vadd.f32 %v1540_v34, %v1487_v32 }
 0x82d   : > { %v2971_v38 = vpop.f32.mrf.mxu1 }
 0x82e   : > { %v1611_v6 = vpack.c.bf16 %v1541_v36, %v1538_v35 }
 0x830   : > { %1741 = vrot.lane.b32.xlu1 %v1611_v6, %s3232_s28  ;;  %2983 = vmatmul.mubr.msk.bf16.vlgmr.msra.gmra.mxu1 %vm805_vm3, %v1611_v6 }
 0x831   : > { %2994 = vmatprep.mubr.msk.bf16.mxu1 %vm3230_vm1, %v3229_v4 }
 0x834   : > { %1887 = vrot.lane.b32.xlu1 %v1611_v6, %s3231_s24  ;;  %s3957_s24 = sld [smem:[#allocation9_spill]] }
 0x838   : > { %2032 = vrot.lane.b32.xlu1 %v1611_v6, %s3233_s0 }
 0x83a   : > { %v1476_v45 = vld [vmem:[%s3957_s24] sm:$0xff]  ;;  %v1477_v59 = vld [vmem:[%s3957_s24 + $0x8] sm:$0xff] }
 0x88f   : > { %v1745_v42 = vpop.permute.xlu1 %1744  ;;  %v1890_v44 = vpop.permute.xlu0 %1889 }
 0x890   : > { %v1750_v43 = vsel %vm805_vm3, %v1745_v42, 0  ;;  %v1895_v26 = vsel %vm805_vm3, %v1890_v44, 0 }
 0x891   : > { %2993 = vmatpush3.bf16.xpose.msra.mxu1 %v1750_v43 }
 0x892   : > { %3004 = vmatprep.subr.bf16.mxu1 %v3229_v4 }
 0x893   : > { %v2035_v48 = vpop.permute.xlu0 %2034 }
 0x894   : > { %v2040_v50 = vsel %vm805_vm3, %v2035_v48, 0 }
 0x8a2   : > { %v1742_v46 = vpop.permute.xlu1 %1741 }
 0x8a3   : > { %2995 = vmatmul.mubr.msk.bf16.vlgmr.msra.gmra.mxu1 %vm805_vm3, %v1742_v46 }
 0x8a4   : > { %3005 = vmatpush3.bf16.xpose.msra.mxu1 %v1895_v26  ;;  %3006 = vmatprep.mubr.msk.bf16.mxu1 %vm3230_vm1, %v3229_v4 }
 0x8a5   : > { %3016 = vmatprep.subr.bf16.mxu1 %v3229_v4 }
 0x8a6   : > { %v1888_v49 = vpop.permute.xlu1 %1887 }
 0x8aa   : > { %v2033_v41 = vpop.permute.xlu1 %2032 }
 0x8ab   : > { %3007 = vmatmul.mubr.msk.bf16.vlgmr.msra.gmra.mxu1 %vm805_vm3, %v1888_v49 }
 0x8ac   : > { %3017 = vmatpush3.bf16.xpose.msra.mxu1 %v2040_v50  ;;  %3018 = vmatprep.mubr.msk.bf16.mxu1 %vm3230_vm1, %v3229_v4 }
 0x8ad   : > { %3028 = vmatprep.subr.bf16.mxu1 %v3229_v4 }
 0x8b3   : > { %3019 = vmatmul.mubr.msk.bf16.vlgmr.msra.gmra.mxu1 %vm805_vm3, %v2033_v41  ;;  %v1604_v41 = vrot.slane %v3654_v17, %v3509_v30 }
 0x8b4   : > { %3032 = vmatprep.mubr.msk.bf16.mxu1 %vm3230_vm1, %v3229_v4 }
 0x8f0   : > { %v1654_v54 = vpop.f32.mrf.mxu1 }
 0x8f1   : > { %v1661_v55 = vmul.f32 0.35355338, %v1654_v54 }
 0x8f2   : > { %v2984_v57 = vpop.f32.mrf.mxu1 }
 0x8f3   : > { %v3695_v51 = vadd.f32 %v1661_v55, %v1476_v45 }
 0x8f4   : > { %v1657_v58 = vpop.f32.mrf.mxu1 }
 0x8f5   : > { %v1662_v56 = vmul.f32 0.35355338, %v1657_v58  ;;  %v1665_v60 = vsel %vm857_vm4, %v3695_v51, -inf }
 0x8f6   : > { %1666 = vmax.xlane.f32.xlu0 %v1665_v60  ;;  %v2985_v62 = vpop.f32.mrf.mxu1 }
 0x8f7   : > { %v1664_v61 = vadd.f32 %v1662_v56, %v1477_v59 }
 0x8f9   : > { %v1668_v0 = vsel %vm857_vm4, %v1664_v61, -inf }
 0x8fa   : > { %1669 = vmax.xlane.f32.xlu1 %v1668_v0 }
 0x963   : > { %v1786_v1 = vpop.f32.mrf.mxu1 }
 0x964   : > { %v1793_v8 = vmul.f32 0.35355338, %v1786_v1 }
 0x965   : > { %v2996_v9 = vpop.f32.mrf.mxu1 }
 0x966   : > { %v1795_v10 = vadd.f32 %v1793_v8, %v1476_v45 }
 0x967   : > { %v1789_v14 = vpop.f32.mrf.mxu1 }
 0x968   : > { %v1794_v15 = vmul.f32 0.35355338, %v1789_v14  ;;  %v1797_v3 = vsel %vm857_vm4, %v1795_v10, -inf }
 0x969   : > { %1798 = vmax.xlane.f32.xlu0 %v1797_v3  ;;  %v2997_v18 = vpop.f32.mrf.mxu1 }
 0x96a   : > { %v1796_v13 = vadd.f32 %v1794_v15, %v1477_v59 }
 0x96b   : > { %v1931_v20 = vpop.f32.mrf.mxu1 }
 0x96c   : > { %v1938_v25 = vmul.f32 0.35355338, %v1931_v20  ;;  %v1800_v27 = vsel %vm857_vm4, %v1796_v13, -inf }
 0x96d   : > { %1801 = vmax.xlane.f32.xlu0 %v1800_v27  ;;  %v3008_v28 = vpop.f32.mrf.mxu1 }
 0x96e   : > { %v1940_v29 = vadd.f32 %v1938_v25, %v1476_v45 }
 0x96f   : > { %v1934_v31 = vpop.f32.mrf.mxu1 }
 0x970   : > { %v1939_v32 = vmul.f32 0.35355338, %v1934_v31  ;;  %v1942_v33 = vsel %vm857_vm4, %v1940_v29, -inf }
 0x971   : > { %1943 = vmax.xlane.f32.xlu1 %v1942_v33  ;;  %v3009_v34 = vpop.f32.mrf.mxu1 }
 0x972   : > { %v1941_v35 = vadd.f32 %v1939_v32, %v1477_v59 }
 0x973   : > { %v2076_v36 = vpop.f32.mrf.mxu1 }
 0x974   : > { %v2083_v38 = vmul.f32 0.35355338, %v2076_v36  ;;  %v1945_v6 = vsel %vm857_vm4, %v1941_v35, -inf }
 0x975   : > { %1946 = vmax.xlane.f32.xlu0 %v1945_v6  ;;  %v3020_v42 = vpop.f32.mrf.mxu1 }
 0x976   : > { %v2085_v43 = vadd.f32 %v2083_v38, %v1476_v45 }
 0x977   : > { %v2079_v44 = vpop.f32.mrf.mxu1 }
 0x978   : > { %v2084_v46 = vmul.f32 0.35355338, %v2079_v44  ;;  %v2087_v26 = vsel %vm857_vm4, %v2085_v43, -inf }
 0x979   : > { %2088 = vmax.xlane.f32.xlu1 %v2087_v26  ;;  %v3021_v48 = vpop.f32.mrf.mxu1 }
 0x97a   : > { %v2086_v49 = vadd.f32 %v2084_v46, %v1477_v59 }
 0x97c   : > { %v2090_v50 = vsel %vm857_vm4, %v2086_v49, -inf }
 0x97d   : > { %2091 = vmax.xlane.f32.xlu0 %v2090_v50 }
 0x97f   : > { %v1667_v8 = vpop.xlane.xlu0 %1666 }
 0x980   : > { %v1671_v9 = vsub.f32 %v3695_v51, %v1667_v8 }
 0x982   : > { %v1673_v15 = vmul.f32 1.442695, %v1671_v9 }
 0x983   : > { %v1670_v54 = vpop.xlane.xlu1 %1669 }
 0x984   : > { %v1672_v3 = vsub.f32 %v1664_v61, %v1670_v54 }
 0x98a   : > { %1606 = vrot.lane.b32.xlu1 %v1604_v41, %s3234_s3 }
 0x9f2   : > { %v1799_v14 = vpop.xlane.xlu0 %1798 }
 0x9f6   : > { %v1802_v18 = vpop.xlane.xlu0 %1801 }
 0x9f7   : > { %v1804_v25 = vsub.f32 %v1796_v13, %v1802_v18 }
 0x9f9   : > { %v1807_v28 = vmul.f32 1.442695, %v1804_v25 }
 0x9fa   : > { %v1944_v55 = vpop.xlane.xlu1 %1943 }
 0x9fb   : > { %v1948_v57 = vsub.f32 %v1940_v29, %v1944_v55 }
 0x9fd   : > { %v1950_v58 = vmul.f32 1.442695, %v1948_v57 }
 0x9fe   : > { %v1947_v27 = vpop.xlane.xlu0 %1946 }
 0x9ff   : > { %3142 = vpow2.f32 %v1950_v58  ;;  %v1949_v29 = vsub.f32 %v1941_v35, %v1947_v27 }
 0xa00   : > { %3144 = vpow2.f32 %v1673_v15 }
 0xa01   : > { %v1952_v31 = vmul.f32 1.442695, %v1949_v29 }
 0xa02   : > { %v2089_v45 = vpop.xlane.xlu1 %2088 }
 0xa03   : > { %v2093_v32 = vsub.f32 %v2085_v43, %v2089_v45 }
 0xa05   : > { %v2095_v61 = vmul.f32 1.442695, %v2093_v32 }
 0xa06   : > { %v1607_v56 = vpop.permute.xlu1 %1606  ;;  %v2092_v33 = vpop.xlane.xlu0 %2091 }
 0xa07   : > { %v1609_v60 = vadd.f32 %v1607_v56, %v3658_v19  ;;  %v1610_v62 = vadd.f32 %v1607_v56, %v3661_v24  ;;  %v1675_v19 = vmul.f32 1.442695, %v1672_v3  ;;  %v1803_v24 = vsub.f32 %v1795_v10, %v1799_v14 }
 0xa08   : > { %v2094_v34 = vsub.f32 %v2086_v49, %v2092_v33 }
 0xa09   : > { %v1613_v59 = vpack.c.bf16 %v1610_v62, %v1609_v60  ;;  %3146 = vpow2.f32 %v1675_v19  ;;  %v1805_v20 = vmul.f32 1.442695, %v1803_v24 }
 0xa0a   : > { %v2097_v38 = vmul.f32 1.442695, %v2094_v34 }
 0xa0b   : > { %1691 = vrot.lane.b32.xlu0 %v1613_v59, %s3228_s7  ;;  %3148 = vpow2.f32 %v1805_v20  ;;  %s3958_s7 = smov 24  }
 0xa0c   : > { %v3715_v0 = vpop.eup %3142  ;;  %3150 = vpow2.f32 %v1807_v28 }
 0xa0d   : > { %v1954_v1 = vsel %vm857_vm4, %v3715_v0, 0.0  ;;  %v3145_v51 = vpop.eup %3144  ;;  %3152 = vpow2.f32 %v1952_v31 }
 0xa0e   : > { %1955 = vadd.xlane.f32.xlu1 %v1954_v1  ;;  %v1677_v10 = vsel %vm857_vm4, %v3145_v51, 0.0  ;;  %3154 = vpow2.f32 %v2095_v61 }
 0xa0f   : > { %1830 = vrot.lane.b32.xlu0 %v1613_v59, %s3235_s30  ;;  %3156 = vpow2.f32 %v2097_v38 }
 0xa16   : > { %v3147_v36 = vpop.eup %3146 }
 0xa17   : > { %v1680_v13 = vsel %vm857_vm4, %v3147_v36, 0.0 }
 0xa18   : > { %v3149_v6 = vpop.eup %3148 }
 0xa19   : > { %v1809_v35 = vsel %vm857_vm4, %v3149_v6, 0.0  ;;  %v3151_v42 = vpop.eup %3150 }
 0xa1a   : > { %v1812_v43 = vsel %vm857_vm4, %v3151_v42, 0.0  ;;  %v3153_v44 = vpop.eup %3152 }
 0xa1b   : > { %v1957_v46 = vsel %vm857_vm4, %v3153_v44, 0.0  ;;  %v3155_v26 = vpop.eup %3154 }
 0xa1c   : > { %v2099_v48 = vsel %vm857_vm4, %v3155_v26, 0.0  ;;  %v3157_v49 = vpop.eup %3156 }
 0xa1d   : > { %v2102_v50 = vsel %vm857_vm4, %v3157_v49, 0.0 }
 0xa1f   : > { %1975 = vrot.lane.b32.xlu1 %v1613_v59, %s3236_s5  ;;  %s3959_s5 = scalar_lea.vmem %s3928_s9, %s3343_s23  ;;  %s3241_s23 = smov 48  }
 0xa20   : > { %v2807_v11 = vld [vmem:[%s3959_s5] ss:$0 sm:$0xff] }
 0xa2e   : > { %1678 = vadd.xlane.f32.xlu0 %v1677_v10 }
 0xa32   : > { %1681 = vadd.xlane.f32.xlu0 %v1680_v13 }
 0xa36   : > { %1810 = vadd.xlane.f32.xlu0 %v1809_v35 }
 0xa3a   : > { %1813 = vadd.xlane.f32.xlu0 %v1812_v43 }
 0xa3e   : > { %1958 = vadd.xlane.f32.xlu0 %v1957_v46 }
 0xa42   : > { %2100 = vadd.xlane.f32.xlu0 %v2099_v48 }
 0xa46   : > { %2103 = vadd.xlane.f32.xlu0 %v2102_v50 }
 0xa5c   : > { %2120 = vrot.lane.b32.xlu0 %v1613_v59, %s3237_s6 }
 0xa7d   : > { %v1692_v41 = vpop.permute.xlu0 %1691 }
 0xa7e   : > { %2987 = vmatpush3.bf16.msra.mxu0 %v1692_v41 }
 0xa7f   : > { %2998 = vmatprep.subr.bf16.mxu0 %v3229_v4 }
 0xa81   : > { %v1831_v54 = vpop.permute.xlu0 %1830 }
 0xa97   : > { %v1956_v62 = vpop.xlane.xlu1 %1955 }
 0xa9b   : > { %v1976_v27 = vpop.permute.xlu1 %1975 }
 0xab7   : > { %v1679_v55 = vpop.xlane.xlu0 %1678 }
 0xab8   : > { %3158 = vrcp.f32 %v1679_v55 }
 0xabb   : > { %v1682_v57 = vpop.xlane.xlu0 %1681 }
 0xabc   : > { %3160 = vrcp.f32 %v1682_v57 }
 0xabf   : > { %v1811_v58 = vpop.xlane.xlu0 %1810 }
 0xac0   : > { %3162 = vrcp.f32 %v1811_v58 }
 0xac3   : > { %v1814_v45 = vpop.xlane.xlu0 %1813 }
 0xac4   : > { %3164 = vrcp.f32 %v1814_v45 }
 0xac5   : > { %v3159_v56 = vpop.eup %3158 }
 0xac6   : > { %v1685_v60 = vmul.f32 %v3159_v56, %v3145_v51 }
 0xac7   : > { %v1959_v1 = vpop.xlane.xlu0 %1958 }
 0xac8   : > { %3166 = vrcp.f32 %v1959_v1  ;;  %1687 = vst.msk [vmem:[%s3394_s27] sm:$0xff] %vm857_vm4, %v1685_v60 }
 0xac9   : > { %v3161_v59 = vpop.eup %3160  ;;  %3168 = vrcp.f32 %v1956_v62 }
 0xaca   : > { %v1686_v8 = vmul.f32 %v3161_v59, %v3147_v36 }
 0xacb   : > { %v2101_v9 = vpop.xlane.xlu0 %2100 }
 0xacc   : > { %v1689_v14 = vpack.c.bf16 %v1686_v8, %v1685_v60  ;;  %1688 = vst.msk [vmem:[%s3394_s27 + $0x8] sm:$0xff] %vm857_vm4, %v1686_v8 }
 0xacd   : > { %v3163_v15 = vpop.eup %3162 }
 0xace   : > { %2989 = vmatmul.mubr.msk.bf16.vlgmr.msra.gmra.mxu0 %vm857_vm4, %v1689_v14  ;;  %v3739_v24 = vmul.f32 %v3163_v15, %v3149_v6 }
 0xacf   : > { %2999 = vmatpush3.bf16.msra.mxu0 %v1831_v54  ;;  %v2104_v3 = vpop.xlane.xlu0 %2103  ;;  %3000 = vmatprep.mubr.msk.bf16.mxu0 %vm3230_vm1, %v3229_v4 }
 0xad0   : > { %3170 = vrcp.f32 %v2104_v3  ;;  %3010 = vmatprep.subr.bf16.mxu0 %v3229_v4 }
 0xad1   : > { %v3165_v19 = vpop.eup %3164  ;;  %3172 = vrcp.f32 %v2101_v9  ;;  %v2183_v9 = vrot.slane %v3654_v17, %v1381_v21 }
 0xad2   : > { %v3741_v18 = vmul.f32 %v3165_v19, %v3151_v42 }
 0xad3   : > { %v2121_v33 = vpop.permute.xlu0 %2120 }
 0xad4   : > { %v1829_v20 = vpack.c.bf16 %v3741_v18, %v3739_v24 }
 0xad5   : > { %v3167_v25 = vpop.eup %3166 }
 0xad6   : > { %3001 = vmatmul.mubr.msk.bf16.vlgmr.msra.gmra.mxu0 %vm857_vm4, %v1829_v20  ;;  %v3169_v28 = vpop.eup %3168  ;;  %v3749_v29 = vmul.f32 %v3167_v25, %v3153_v44 }
 0xad7   : > { %3011 = vmatpush3.bf16.msra.mxu0 %v1976_v27  ;;  %3012 = vmatprep.mubr.msk.bf16.mxu0 %vm3230_vm1, %v3229_v4  ;;  %v3752_v31 = vmul.f32 %v3169_v28, %v3715_v0 }
 0xad8   : > { %3022 = vmatprep.subr.bf16.mxu0 %v3229_v4 }
 0xad9   : > { %v1974_v32 = vpack.c.bf16 %v3749_v29, %v3752_v31 }
 0xadd   : > { %v3171_v51 = vpop.eup %3170 }
 0xade   : > { %3013 = vmatmul.mubr.msk.bf16.vlgmr.msra.gmra.mxu0 %vm857_vm4, %v1974_v32  ;;  %v3173_v61 = vpop.eup %3172  ;;  %v3759_v34 = vmul.f32 %v3171_v51, %v3157_v49 }
 0xadf   : > { %3023 = vmatpush3.bf16.msra.mxu0 %v2121_v33  ;;  %3024 = vmatprep.mubr.msk.bf16.mxu0 %vm3230_vm1, %v3229_v4  ;;  %v3762_v10 = vmul.f32 %v3173_v61, %v3155_v26 }
 0xae0   : > { %3036 = vmatprep.subr.bf16.mxu0 %v3229_v4 }
 0xae1   : > { %v2119_v0 = vpack.c.bf16 %v3759_v34, %v3762_v10 }
 0xae6   : > { %3025 = vmatmul.mubr.msk.bf16.vlgmr.msra.gmra.mxu0 %vm857_vm4, %v2119_v0 }
 0xae7   : > { %3040 = vmatprep.mubr.msk.bf16.mxu0 %vm3230_vm1, %v3229_v4 }
 0xb8e   : > { %v1731_v36 = vpop.f32.mrf.mxu0 }
 0xb8f   : > { %1738 = vst.msk [vmem:[#allocation3] sm:$0xff] %vm805_vm3, %v1731_v36 }
 0xb90   : > { %v2990_v38 = vpop.f32.mrf.mxu0 }
 0xb92   : > { %v1734_v13 = vpop.f32.mrf.mxu0 }
 0xb93   : > { %1739 = vst.msk [vmem:[#allocation3 + $0x8] sm:$0xff] %vm805_vm3, %v1734_v13 }
 0xb94   : > { %v2991_v6 = vpop.f32.mrf.mxu0 }
 0xb96   : > { %v1870_v35 = vpop.f32.mrf.mxu0 }
 0xb97   : > { %1879 = vrot.lane.b32.xlu0 %v1870_v35, %s3238_s21 }
 0xb98   : > { %v3002_v42 = vpop.f32.mrf.mxu0 }
 0xb99   : > { %v3101_v42 = vld [vmem:[%s3368_s26] sm:$0xff]  }
 0xb9a   : > { %v1873_v43 = vpop.f32.mrf.mxu0 }
 0xb9b   : > { %1881 = vrot.lane.b32.xlu0 %v1873_v43, %s3238_s21  ;;  %v3102_v43 = vld [vmem:[%s3379_s18 + $0x18] sm:$0xff]  }
 0xb9c   : > { %v3003_v44 = vpop.f32.mrf.mxu0 }
 0xb9e   : > { %v2015_v46 = vpop.f32.mrf.mxu0 }
 0xb9f   : > { %2024 = vrot.lane.b32.xlu0 %v2015_v46, %s3239_s20 }
 0xba0   : > { %v3014_v26 = vpop.f32.mrf.mxu0 }
 0xba2   : > { %v2018_v48 = vpop.f32.mrf.mxu0 }
 0xba3   : > { %2026 = vrot.lane.b32.xlu1 %v2018_v48, %s3239_s20 }
 0xba4   : > { %v3015_v49 = vpop.f32.mrf.mxu0 }
 0xba6   : > { %v2160_v50 = vpop.f32.mrf.mxu0 }
 0xba7   : > { %2169 = vrot.lane.b32.xlu0 %v2160_v50, %s3958_s7 }
 0xba8   : > { %v3026_v41 = vpop.f32.mrf.mxu0 }
 0xbaa   : > { %v2163_v54 = vpop.f32.mrf.mxu0 }
 0xbab   : > { %2171 = vrot.lane.b32.xlu1 %v2163_v54, %s3958_s7  ;;  %2186 = vrot.lane.b32.xlu0 %v3610_v37, %s3234_s3 }
 0xbac   : > { %v3027_v55 = vpop.f32.mrf.mxu0 }
 0xbad   : > { %v2265_v55 = vrot.slane %v3654_v17, %v1464_v63  ;;  %v3104_v63 = vld [vmem:[%s3379_s18 + $0x8] sm:$0xff]  }
 0xbaf   : > { %2184 = vrot.lane.b32.xlu1 %v3617_v5, %s3234_s3 }
 0xc09   : > { %v1880_v57 = vpop.permute.xlu0 %1879 }
 0xc0a   : > { %1885 = vst.msk [vmem:[#allocation3] sm:$0xff] %vm1079_vm5, %v1880_v57 }
 0xc0d   : > { %v1882_v58 = vpop.permute.xlu0 %1881 }
 0xc0e   : > { %1886 = vst.msk [vmem:[#allocation3 + $0x8] sm:$0xff] %vm1079_vm5, %v1882_v58 }
 0xc11   : > { %v2025_v45 = vpop.permute.xlu0 %2024 }
 0xc12   : > { %2030 = vst.msk [vmem:[#allocation3] sm:$0xff] %vm1226_vm6, %v2025_v45 }
 0xc15   : > { %v2027_v56 = vpop.permute.xlu1 %2026 }
 0xc16   : > { %2031 = vst.msk [vmem:[#allocation3 + $0x8] sm:$0xff] %vm1226_vm6, %v2027_v56  ;;  %v2271_v56 = vrot.slane %v3654_v17, %v1470_v7 }
 0xc19   : > { %v2170_v60 = vpop.permute.xlu0 %2169 }
 0xc1a   : > { %2175 = vst.msk [vmem:[#allocation3] sm:$0xff] %vm1373_vm7, %v2170_v60 }
 0xc1d   : > { %v2172_v37 = vpop.permute.xlu1 %2171  ;;  %v2187_v62 = vpop.permute.xlu0 %2186 }
 0xc1e   : > { %2176 = vst.msk [vmem:[#allocation3 + $0x8] sm:$0xff] %vm1373_vm7, %v2172_v37  ;;  %3029 = vmatpush3.bf16.msra.mxu1 %v2187_v62 }
 0xc1f   : > { %3030 = vmatprep.subr.bf16.mxu1 %v3229_v4 }
 0xc21   : > { %v2185_v5 = vpop.permute.xlu1 %2184  ;;  %v2177_v1 = vld [vmem:[#allocation3] sm:$0xff] }
 0xc22   : > { %3031 = vmatpush3.bf16.msra.mxu1 %v2185_v5 }
 0xc23   : > { %3044 = vmatprep.subr.bf16.mxu1 %v3229_v4 }
 0xc25   : > { %v2178_v59 = vld [vmem:[#allocation3 + $0x8] sm:$0xff] }
 0xc26   : > { %v2179_v8 = vpack.c.bf16 %v2178_v59, %v2177_v1  ;;  %v3103_v1 = vld [vmem:[%s3379_s18 + $0x10] sm:$0xff]   ;;  %v3105_v59 = vld [vmem:[%s3379_s18] sm:$0xff]  }
 0xc28   : > { %3033 = vmatmul.mubr.msk.bf16.vlgmr.msra.gmra.mxu1 %vm694_vm2, %v2179_v8 }
 0xc29   : > { %3052 = vmatprep.mubr.msk.bf16.mxu1 %vm3230_vm1, %v3229_v4  ;;  %3045 = vmatpush3.bf16.msra.mxu1 %v3102_v43 }
 0xc2a   : > { %3046 = vmatprep.subr.bf16.mxu1 %v3229_v4 }
 0xc2d   : > { %3047 = vmatpush3.bf16.msra.mxu1 %v3103_v1 }
 0xc2e   : > { %3048 = vmatprep.subr.bf16.mxu1 %v3229_v4 }
 0xc31   : > { %3049 = vmatpush3.bf16.msra.mxu1 %v3104_v63 }
 0xc32   : > { %3050 = vmatprep.subr.bf16.mxu1 %v3229_v4 }
 0xc35   : > { %3051 = vmatpush3.bf16.msra.mxu1 %v3105_v59 }
 0xce8   : > { %v2227_v14 = vpop.f32.mrf.mxu1 }
 0xce9   : > { %v2228_v15 = vadd.f32 %v2227_v14, %v2183_v9 }
 0xcea   : > { %v3034_v3 = vpop.f32.mrf.mxu1 }
 0xceb   : > { %v2234_v19 = vadd.f32 %v2228_v15, %v3644_v2 }
 0xcec   : > { %v2230_v20 = vpop.f32.mrf.mxu1 }
 0xced   : > { %v2231_v25 = vadd.f32 %v2230_v20, %v2183_v9  ;;  %v2236_v27 = vsel %vm694_vm2, %v2234_v19, 0.0 }
 0xcee   : > { %2237 = vadd.xlane.f32.xlu0 %v2236_v27  ;;  %v3035_v28 = vpop.f32.mrf.mxu1 }
 0xcef   : > { %v2235_v32 = vadd.f32 %v2231_v25, %v3646_v16  ;;  %v3100_v16 = vld [vmem:[%s3368_s26 + $0x8] sm:$0xff]   ;;  %v3824_v25 = vld [vmem:[%s3384_s25] sm:$0x7] }
 0xcf0   : > { %3037 = vmatpush3.bf16.msra.mxu0 %v3100_v16 }
 0xcf1   : > { %v2239_v51 = vsel %vm694_vm2, %v2235_v32, 0.0  ;;  %3038 = vmatprep.subr.bf16.mxu0 %v3229_v4  ;;  %v2357_v4 = vrot.slane %v3824_v25, %v3438_v12 }
 0xcf2   : > { %2240 = vadd.xlane.f32.xlu1 %v2239_v51 }
 0xcf4   : > { %3039 = vmatpush3.bf16.msra.mxu0 %v3101_v42 }
 0xd77   : > { %v2238_v33 = vpop.xlane.xlu0 %2237 }
 0xd78   : > { %v2242_v21 = vmul.f32 0.03125, %v2238_v33 }
 0xd7a   : > { %v2244_v61 = vsub.f32 %v2234_v19, %v2242_v21 }
 0xd7b   : > { %v2241_v0 = vpop.xlane.xlu1 %2240 }
 0xd7c   : > { %v2243_v36 = vmul.f32 0.03125, %v2241_v0  ;;  %v2246_v2 = vmul.f32 %v2244_v61, %v2244_v61 }
 0xd7e   : > { %v2245_v38 = vsub.f32 %v2235_v32, %v2243_v36  ;;  %v2248_v13 = vsel %vm694_vm2, %v2246_v2, 0.0 }
 0xd7f   : > { %2249 = vadd.xlane.f32.xlu0 %v2248_v13 }
 0xd80   : > { %v2247_v6 = vmul.f32 %v2245_v38, %v2245_v38 }
 0xd82   : > { %v2251_v35 = vsel %vm694_vm2, %v2247_v6, 0.0 }
 0xd83   : > { %2252 = vadd.xlane.f32.xlu0 %v2251_v35 }
 0xe08   : > { %v2250_v44 = vpop.xlane.xlu0 %2249 }
 0xe09   : > { %v2254_v46 = vmul.f32 0.03125, %v2250_v44 }
 0xe0b   : > { %v2256_v26 = vadd.f32 1e-05, %v2254_v46 }
 0xe0c   : > { %v2253_v48 = vpop.xlane.xlu0 %2252 }
 0xe0d   : > { %3174 = vrsqrt.f32 %v2256_v26  ;;  %v2255_v49 = vmul.f32 0.03125, %v2253_v48 }
 0xe0f   : > { %v2257_v50 = vadd.f32 1e-05, %v2255_v49 }
 0xe11   : > { %3176 = vrsqrt.f32 %v2257_v50 }
 0xe1a   : > { %v3175_v41 = vpop.eup %3174 }
 0xe1b   : > { %v2260_v54 = vmul.f32 %v3175_v41, %v2244_v61 }
 0xe1d   : > { %v2266_v45 = vmul.f32 %v2265_v55, %v2260_v54 }
 0xe1e   : > { %v3177_v57 = vpop.eup %3176 }
 0xe1f   : > { %v2261_v58 = vmul.f32 %v3177_v57, %v2245_v38  ;;  %v2272_v37 = vadd.f32 %v2271_v56, %v2266_v45 }
 0xe21   : > { %v2267_v60 = vmul.f32 %v2265_v55, %v2261_v58 }
 0xe23   : > { %v2273_v62 = vadd.f32 %v2271_v56, %v2267_v60 }
 0xe25   : > { %v2288_v5 = vpack.c.bf16 %v2273_v62, %v2272_v37 }
 0xe27   : > { %3041 = vmatmul.mubr.msk.bf16.vlgmr.msra.gmra.mxu0 %vm694_vm2, %v2288_v5 }
 0xee7   : > { %v2344_v7 = vpop.f32.mrf.mxu0 }
 0xee8   : > { %v2345_v8 = vadd.f32 %v2807_v11, %v2344_v7 }
 0xee9   : > { %v3042_v17 = vpop.f32.mrf.mxu0 }
 0xeea   : > { %v2351_v3 = vmax.f32 %v2345_v8, 0.0 }
 0xeeb   : > { %v2347_v9 = vpop.f32.mrf.mxu0 }
 0xeec   : > { %v2348_v14 = vadd.f32 %v2807_v11, %v2347_v9 }
 0xeed   : > { %v3043_v15 = vpop.f32.mrf.mxu0 }
 0xeee   : > { %v2352_v19 = vmax.f32 %v2348_v14, 0.0 }
 0xef0   : > { %v2353_v20 = vpack.c.bf16 %v2352_v19, %v2351_v3 }
 0xef2   : > { %3053 = vmatmul.mubr.msk.bf16.vlgmr.msra.gmra.mxu1 %vm2382_vm8, %v2353_v20 }
 0xfb2   : > { %v2420_v27 = vpop.f32.mrf.mxu1 }
 0xfb3   : > { %v2421_v28 = vadd.f32 %v2420_v27, %v2357_v4 }
 0xfb4   : > { %v3054_v32 = vpop.f32.mrf.mxu1 }
 0xfb5   : > { %v2427_v51 = vadd.f32 %v2421_v28, %v2272_v37 }
 0xfb6   : > { %v2423_v33 = vpop.f32.mrf.mxu1 }
 0xfb7   : > { %v2424_v21 = vadd.f32 %v2423_v33, %v2357_v4  ;;  %v2429_v61 = vsel %vm694_vm2, %v2427_v51, 0.0 }
 0xfb8   : > { %2430 = vadd.xlane.f32.xlu1 %v2429_v61  ;;  %v3055_v0 = vpop.f32.mrf.mxu1 }
 0xfb9   : > { %v2428_v36 = vadd.f32 %v2424_v21, %v2273_v62 }
 0xfbb   : > { %v2432_v2 = vsel %vm694_vm2, %v2428_v36, 0.0 }
 0xfbc   : > { %2433 = vadd.xlane.f32.xlu0 %v2432_v2 }
 0xfc9   : > { %1014 = vrot.lane.b32.xlu1 %v3547_v39, %s3239_s20 }
 0xfcd   : > { %1161 = vrot.lane.b32.xlu1 %v3560_v23, %s3234_s3 }
 0xfd1   : > { %1163 = vrot.lane.b32.xlu1 %v3557_v47, %s3234_s3 }
 0xfd2   : > { %1016 = vrot.lane.b32.xlu0 %v3549_v40, %s3239_s20 }
 0xfd5   : > { %1310 = vrot.lane.b32.xlu1 %v3567_v52, %s3241_s23 }
 0xfd6   : > { %1308 = vrot.lane.b32.xlu0 %v3571_v53, %s3241_s23 }
 0xfd9   : > { %1823 = vrot.lane.b32.xlu1 %v3741_v18, %s3239_s20 }
 0xfda   : > { %1821 = vrot.lane.b32.xlu0 %v3739_v24, %s3239_s20 }
 0xfde   : > { %1966 = vrot.lane.b32.xlu0 %v3752_v31, %s3234_s3 }
0x1041   : > { %v2431_v12 = vpop.xlane.xlu1 %2430 }
0x1042   : > { %v2435_v39 = vmul.f32 0.03125, %v2431_v12 }
0x1044   : > { %v2437_v40 = vsub.f32 %v2427_v51, %v2435_v39 }
0x1045   : > { %v1015_v47 = vpop.permute.xlu1 %1014  ;;  %v2434_v23 = vpop.xlane.xlu0 %2433 }
0x1046   : > { %1021 = vst.msk [vmem:[%s3389_s13] sm:$0xff] %vm1020_vm9, %v1015_v47  ;;  %v2436_v52 = vmul.f32 0.03125, %v2434_v23  ;;  %v2439_v53 = vmul.f32 %v2437_v40, %v2437_v40 }
0x1048   : > { %v2438_v18 = vsub.f32 %v2428_v36, %v2436_v52  ;;  %v2441_v24 = vsel %vm694_vm2, %v2439_v53, 0.0 }
0x1049   : > { %2442 = vadd.xlane.f32.xlu1 %v2441_v24  ;;  %v1162_v31 = vpop.permute.xlu1 %1161  ;;  %v1017_v38 = vpop.permute.xlu0 %1016 }
0x104a   : > { %1168 = vst.msk [vmem:[%s3389_s13] sm:$0xff] %vm1167_vm10, %v1162_v31  ;;  %v2440_v13 = vmul.f32 %v2438_v18, %v2438_v18 }
0x104b   : > { %1022 = vst.msk [vmem:[%s3389_s13 + $0x8] sm:$0xff] %vm1020_vm9, %v1017_v38 }
0x104c   : > { %v2444_v6 = vsel %vm694_vm2, %v2440_v13, 0.0 }
0x104d   : > { %v1164_v35 = vpop.permute.xlu1 %1163  ;;  %2445 = vadd.xlane.f32.xlu0 %v2444_v6  ;;  %v1309_v16 = vpop.permute.xlu0 %1308 }
0x104e   : > { %1169 = vst.msk [vmem:[%s3389_s13 + $0x8] sm:$0xff] %vm1167_vm10, %v1164_v35 }
0x104f   : > { %1315 = vst.msk [vmem:[%s3389_s13] sm:$0xff] %vm1314_vm11, %v1309_v16 }
0x1051   : > { %v1311_v42 = vpop.permute.xlu1 %1310  ;;  %v1822_v43 = vpop.permute.xlu0 %1821 }
0x1052   : > { %1316 = vst.msk [vmem:[%s3389_s13 + $0x8] sm:$0xff] %vm1314_vm11, %v1311_v42  ;;  %s3960_s13 = sld [smem:[#allocation14_spill]] (!%p2816_p5) }
0x1053   : > { %1827 = vst.msk [vmem:[%s3394_s27] sm:$0xff] %vm1020_vm9, %v1822_v43 }
0x1055   : > { %v1824_v44 = vpop.permute.xlu1 %1823  ;;  %v1967_v46 = vpop.permute.xlu0 %1966 }
0x1056   : > { %1828 = vst.msk [vmem:[%s3394_s27 + $0x8] sm:$0xff] %vm1020_vm9, %v1824_v44 }
0x1057   : > { %1972 = vst.msk [vmem:[%s3394_s27] sm:$0xff] %vm1167_vm10, %v1967_v46 }
0x105a   : > { %2111 = vrot.lane.b32.xlu1 %v3762_v10, %s3241_s23  ;;  %v2464_v10 = vrot.slane %v3824_v25, %v3509_v30 }
0x105e   : > { %2113 = vrot.lane.b32.xlu1 %v3759_v34, %s3241_s23 }
0x1063   : > { %1968 = vrot.lane.b32.xlu0 %v3749_v29, %s3234_s3  ;;  %v2458_v29 = vrot.slane %v3824_v25, %v3446_v22 }
0x10d2   : > { %v2443_v26 = vpop.xlane.xlu1 %2442 }
0x10d3   : > { %v2447_v48 = vmul.f32 0.03125, %v2443_v26 }
0x10d5   : > { %v2449_v49 = vadd.f32 1e-05, %v2447_v48 }
0x10d6   : > { %v2112_v50 = vpop.permute.xlu1 %2111  ;;  %v2446_v41 = vpop.xlane.xlu0 %2445 }
0x10d7   : > { %3178 = vrsqrt.f32 %v2449_v49  ;;  %2117 = vst.msk [vmem:[%s3394_s27] sm:$0xff] %vm1314_vm11, %v2112_v50  ;;  %v2448_v54 = vmul.f32 0.03125, %v2446_v41 }
0x10d9   : > { %v2450_v55 = vadd.f32 1e-05, %v2448_v54 }
0x10da   : > { %v2114_v57 = vpop.permute.xlu1 %2113  ;;  %v1969_v58 = vpop.permute.xlu0 %1968 }
0x10db   : > { %3180 = vrsqrt.f32 %v2450_v55  ;;  %1973 = vst.msk [vmem:[%s3394_s27 + $0x8] sm:$0xff] %vm1167_vm10, %v1969_v58 }
0x10dc   : > { %2118 = vst.msk [vmem:[%s3394_s27 + $0x8] sm:$0xff] %vm1314_vm11, %v2114_v57 }
0x10e4   : > { %v3179_v34 = vpop.eup %3178 }
0x10e5   : > { %v2453_v45 = vmul.f32 %v3179_v34, %v2437_v40 }
0x10e7   : > { %v2459_v56 = vmul.f32 %v2458_v29, %v2453_v45 }
0x10e8   : > { %v3181_v60 = vpop.eup %3180 }
0x10e9   : > { %v2465_v37 = vadd.f32 %v2464_v10, %v2459_v56  ;;  %v2454_v62 = vmul.f32 %v3181_v60, %v2438_v18 }
0x10eb   : > { %2467 = vst.msk [vmem:[#allocation2] sm:$0xff] %vm694_vm2, %v2465_v37  ;;  %v2460_v5 = vmul.f32 %v2458_v29, %v2454_v62  ;;  %2472 = sbr.rel (%p2816_p5) target bundleno = 4857 (0x12f9), region = 84 }
0x10ed   : > { %v2466_v1 = vadd.f32 %v2464_v10, %v2460_v5 }
0x10ef   : > { %2468 = vst.msk [vmem:[#allocation2 + $0x8] sm:$0xff] %vm694_vm2, %v2466_v1 }
0x10f0   : > { %v3182_v22 = vld [vmem:[%s3960_s13 + $0x8] sm:$0xff]   ;;  %v3242_v63 = vmov 0.0   ;;  %v3183_v30 = vld [vmem:[%s3960_s13] sm:$0xff]   ;;  %vm3243_vm12 = vmmov 0   ;;  %v2473_v59 = vpack.c.bf16 %v2466_v1, %v2465_v37 }
0x10f1   : > { %3056 = vmatprep.subr.bf16.mxu0 %v3242_v63  ;;  %3060 = vmatprep.mubr.msk.bf16.mxu0 %vm3243_vm12, %v3242_v63  ;;  %v2817_v11 = vld [vmem:[%s3961_s12] ss:$0 sm:$0xff] }
0x10f2   : > { %3057 = vmatpush3.bf16.msra.mxu0 %v3182_v22 }
0x10f3   : > { %3058 = vmatprep.subr.bf16.mxu0 %v3242_v63 }
0x10f6   : > { %3059 = vmatpush3.bf16.msra.mxu0 %v3183_v30 }
0x10f9   : > { %3061 = vmatmul.mubr.msk.bf16.vlgmr.msra.gmra.mxu0 %vm694_vm2, %v2473_v59 }
0x11b9   : > { %v2534_v7 = vpop.f32.mrf.mxu0 }
0x11ba   : > { %v2535_v17 = vadd.f32 %v2817_v11, %v2534_v7 }
0x11bb   : > { %v3062_v8 = vpop.f32.mrf.mxu0 }
0x11bc   : > { %v2541_v9 = vsel %vm694_vm2, %v2535_v17, -inf }
0x11bd   : > { %2542 = vmax.xlane.f32.xlu0 %v2541_v9  ;;  %v2537_v14 = vpop.f32.mrf.mxu0 }
0x11be   : > { %v2538_v15 = vadd.f32 %v2817_v11, %v2537_v14 }
0x11bf   : > { %v3063_v3 = vpop.f32.mrf.mxu0 }
0x11c0   : > { %v2544_v19 = vsel %vm694_vm2, %v2538_v15, -inf }
0x11c1   : > { %2545 = vmax.xlane.f32.xlu0 %v2544_v19 }
0x1246   : > { %v2543_v20 = vpop.xlane.xlu0 %2542 }
0x1247   : > { %v2547_v25 = vsub.f32 %v2535_v17, %v2543_v20 }
0x1249   : > { %v2549_v4 = vmul.f32 1.442695, %v2547_v25 }
0x124a   : > { %v2546_v27 = vpop.xlane.xlu0 %2545 }
0x124b   : > { %3184 = vpow2.f32 %v2549_v4  ;;  %v2548_v28 = vsub.f32 %v2538_v15, %v2546_v27 }
0x124d   : > { %v2551_v32 = vmul.f32 1.442695, %v2548_v28 }
0x124f   : > { %3186 = vpow2.f32 %v2551_v32 }
0x1258   : > { %v3185_v51 = vpop.eup %3184 }
0x1259   : > { %v2553_v33 = vsel %vm694_vm2, %v3185_v51, 0.0 }
0x125a   : > { %2554 = vadd.xlane.f32.xlu1 %v2553_v33 }
0x125c   : > { %v3187_v21 = vpop.eup %3186 }
0x125d   : > { %v2556_v61 = vsel %vm694_vm2, %v3187_v21, 0.0 }
0x125e   : > { %2557 = vadd.xlane.f32.xlu1 %v2556_v61 }
0x12e3   : > { %v2555_v0 = vpop.xlane.xlu1 %2554 }
0x12e4   : > { %3188 = vrcp.f32 %v2555_v0 }
0x12e7   : > { %v2558_v36 = vpop.xlane.xlu1 %2557 }
0x12e8   : > { %3190 = vrcp.f32 %v2558_v36 }
0x12f1   : > { %v3189_v2 = vpop.eup %3188 }
0x12f2   : > { %v2561_v12 = vmul.f32 %v3189_v2, %v3185_v51 }
0x12f4   : > { %2563 = vst.msk [vmem:[#allocation4] sm:$0xff] %vm694_vm2, %v2561_v12 }
0x12f5   : > { %v3191_v39 = vpop.eup %3190 }
0x12f6   : > { %v2562_v40 = vmul.f32 %v3191_v39, %v3187_v21 }
0x12f8   : > { %2564 = vst.msk [vmem:[#allocation4 + $0x8] sm:$0xff] %vm694_vm2, %v2562_v40 }
0x12f9 PF: > { %p3068_p6 = scmp.eq.s32.totalorder %s3337_s22, 1  ;;  %s3244_s19 = smov [#allocation4]  }
0x12fa   : > { %s2581_s4 = sshll.u32 %s3244_s19, 4  ;;  %s2582_s4 = int_to_ptr.vmem [resolvable:$true] %s2581_s4 }
0x12fb   : > { %s3192_s14 = scalar_lea.vmem %s2582_s4, 256  ;;  %p3199_p10 = scmp.lt.s32.totalorder %s2582_s4, %s2582_s4 }
0x12fc   : > { %p3193_p7 = scmp.ne.s32.totalorder %s2582_s4, %s3192_s14  ;;  %p3200_p11 = scmp.lt.s32.totalorder %s3192_s14, %s3192_s14 }
0x12fe   : > { %p3194_p8 = pnand %p3193_p7, %p3068_p6  ;;  %p3201_p12 = por %p3200_p11, %p3199_p10 }
0x1300   : > { %p3195_p9 = pneg %p3194_p8 }
0x1302   : > { %p3202_p13 = pnand %p3201_p12, %p3195_p9 }
0x1304   : > { %3205 = shalt.err (!%p3202_p13)
}
0x1305   : > { %s3245_s29 = smov 128   ;;  %s3962_s7 = sld [smem:[#allocation16_spill]] }
0x130b   : > { %3065 = dma.vmem_to_hbm [thread:$0]  (%p3068_p6), %s2582_s4, 256, %s3962_s7, [#allocation5], %s3245_s29, %s3245_s29, %s3238_s21  }
0x130c   : > { %3221 = dma.done.wait (%p3068_p6), [#allocation5], 256  }
0x130d   : > { %3223 = vsyncadd (%p3068_p6), [#allocation5], 4294967040 }
0x130e PF: > { %s3963_s26 = sld [smem:[#allocation7_spill]] }
0x1314   : > { %s28_s21 = sadd.s32 1, %s3963_s26  }
0x1315   : > { %p25_p0 = scmp.ge.s32.totalorder %s28_s21, 4  }
0x1317   :  { %27 = sbr.rel (!%p25_p0) target bundleno = 11 (0xb), region = 156 }
0x131c   :  { %2619 = vsyncpa [#allocation5], 1 }
0x131d   :  { %2621 = vsyncpa [#allocation5 + $0x1], 1 }

</bundles_post_ra>
